<compile_context>
chip_gen: v7x
topology: tpu7x:2x2x1
jax: 0.10.0
libtpu: 0.0.40
codegen_flags: <defaults>
</compile_context>

<pallas_src>
import functools

import jax
import jax.numpy as jnp
from jax.experimental import pallas as pl
from jax.experimental.pallas import tpu as pltpu


# ----------------------------------------------------------------------------
# Fused kernel: conv1+BN+ReLU+pool -> conv2+BN+ReLU+pool -> flatten -> FC1+ReLU+FC2
# ----------------------------------------------------------------------------
def _fused_kernel(Bt, p1_ref, w1_ref, b1_ref, w2_ref, b2_ref,
                  fw1_ref, fb1_ref, fw2_ref, fb2_ref, out_ref):
    f32 = jnp.float32

    # ---- layer1: conv(1->16)+BN+ReLU + 2x2 maxpool, one matmul per pool quadrant ----
    # p1_ref[0, q]: (14*Bt, 126)  rows = (row-parity p, row t, image m), lanes = j*9 + tap
    # w1_ref:       (126, 256)    column-banded (j -> padded col b=j+1), BN scale folded
    # b1_ref:       (1, 256)      folded conv+BN bias (zero in the b=0 / b=15 pad columns)
    m1 = None
    for q in range(4):
        zq = jnp.dot(p1_ref[0, q], w1_ref[...], preferred_element_type=f32)
        m1 = zq if m1 is None else jnp.maximum(m1, zq)
    y1 = jnp.maximum(m1 + b1_ref[...], 0.0)          # (14*Bt, 256)
    # y1 rows: p=0 block = even pooled rows i=2t, p=1 block = odd pooled rows i=2t+1
    # y1 lanes: b*16 + c with b = j+1 (b=0 and b=15 are the zero "same"-padding columns)

    # Row-parity slabs of the zero-padded 16x16x16 map (values only, no scratch):
    top = y1[0:7 * Bt]                                # padded rows a = 2u+1, u = 0..6
    bot = y1[7 * Bt:14 * Bt]                          # padded rows a = 2u+2, u = 0..6
    zrow = jnp.zeros((Bt, 256), f32)
    ye0 = jnp.concatenate([zrow, bot[0:6 * Bt]], axis=0)    # padded rows a = 2u
    yo1 = jnp.concatenate([top[Bt:7 * Bt], zrow], axis=0)   # padded rows a = 2u+3

    # ---- layer2: conv(16->32)+BN+ReLU + 2x2 maxpool via 6 banded matmuls ----
    # w2_ref[ky]: (256, 512)  rows = (in col b, cin), cols = qx*256 + v*32 + cout
    #             (kx shift, channel contraction, BN scale and col-pool quadrant folded in)
    z_odd = jnp.dot(ye0, w2_ref[0], preferred_element_type=f32)
    z_odd += jnp.dot(top, w2_ref[1], preferred_element_type=f32)
    z_odd += jnp.dot(bot, w2_ref[2], preferred_element_type=f32)
    z_even = jnp.dot(top, w2_ref[0], preferred_element_type=f32)
    z_even += jnp.dot(bot, w2_ref[1], preferred_element_type=f32)
    z_even += jnp.dot(yo1, w2_ref[2], preferred_element_type=f32)
    zo = z_odd + b2_ref[...]                          # conv rows 2u+1 (row-pool partner 1)
    ze = z_even + b2_ref[...]                         # conv rows 2u+2 (row-pool partner 2)
    pm = jnp.maximum(jnp.maximum(zo[:, 0:256], zo[:, 256:512]),
                     jnp.maximum(ze[:, 0:256], ze[:, 256:512]))
    y2 = jnp.maximum(pm, 0.0)                         # (7*Bt, 256): rows (u, m), lanes v*32+c

    # ---- FC1 (+ReLU) + FC2: contraction over u as 7 accumulated matmuls ----
    # fw1_ref[u]: (256, 128) rows = v*32 + cout, already permuted for the NCHW flatten.
    h = jnp.dot(y2[0:Bt], fw1_ref[0], preferred_element_type=f32)
    for u in range(1, 7):
        h += jnp.dot(y2[u * Bt:(u + 1) * Bt], fw1_ref[u], preferred_element_type=f32)
    h = jnp.maximum(h + fb1_ref[...], 0.0)            # (Bt, 128)
    logits = jnp.dot(h, fw2_ref[...], preferred_element_type=f32) + fb2_ref[...]
    out_ref[0] = logits.astype(out_ref.dtype)         # dense (Bt, 128) store


# ----------------------------------------------------------------------------
# pallas_call wrapper
# ----------------------------------------------------------------------------
def fused_forward(p1, params, Bt, nsteps):
    kernel = functools.partial(_fused_kernel, Bt)
    rep2 = lambda s: (0, 0)          # resident weights: constant block index
    rep3 = lambda s: (0, 0, 0)
    out = pl.pallas_call(
        kernel,
        out_shape=jax.ShapeDtypeStruct((nsteps, Bt, 128), jnp.float32),
        grid=(nsteps,),
        in_specs=[
            pl.BlockSpec((1, 4, 14 * Bt, 126), lambda s: (s, 0, 0, 0)),  # conv1 patches
            pl.BlockSpec((126, 256), rep2),                              # conv1 banded weight
            pl.BlockSpec((1, 256), rep2),                                # conv1 folded bias
            pl.BlockSpec((3, 256, 512), rep3),                           # conv2 banded weights
            pl.BlockSpec((1, 512), rep2),                                # conv2 folded bias
            pl.BlockSpec((7, 256, 128), rep3),                           # fc1 weight (per u)
            pl.BlockSpec((1, 128), rep2),                                # fc1 bias
            pl.BlockSpec((128, 128), rep2),                              # fc2 weight (padded)
            pl.BlockSpec((1, 128), rep2),                                # fc2 bias (padded)
        ],
        out_specs=pl.BlockSpec((1, Bt, 128), lambda s: (s, 0, 0)),
        compiler_params=pltpu.CompilerParams(dimension_semantics=("parallel",)),
    )(p1, params["w1"], params["b1"], params["w2"], params["b2"],
      params["fc1w"], params["fc1b"], params["fc2w"], params["fc2b"])
    return out.reshape(nsteps * Bt, 128)


# ----------------------------------------------------------------------------
# Wrapper-side prep: conv1 im2col of the raw input (single fused XLA gather, 28 KB/image)
# ----------------------------------------------------------------------------
def build_conv1_patches(x, Bt):
    """x: (Bp, 28, 28) -> (Bp//Bt, 4, 14*Bt, 126).
    dim1 = pool quadrant (qy*2+qx); rows = (row-parity p, row t, image m); lane = j*9+tap."""
    Bp = x.shape[0]
    ns = Bp // Bt
    xp = jnp.pad(x, ((0, 0), (1, 1), (1, 1)))               # (Bp, 30, 30), conv padding=1
    per_q = []
    for qy in (0, 1):
        for qx in (0, 1):
            taps = [xp[:, qy + ky:qy + ky + 28:2, qx + kx:qx + kx + 28:2]
                    for ky in range(3) for kx in range(3)]
            per_q.append(jnp.stack(taps, axis=-1))          # (Bp, 14, 14, 9) over pooled (i, j)
    t = jnp.stack(per_q, axis=1)                            # (Bp, q, i, j, tap)
    t = t.reshape(ns, Bt, 4, 7, 2, 126)                     # i -> (t, p); (j, tap) -> lane
    t = t.transpose(0, 2, 4, 3, 1, 5)                       # (step, q, p, t, m, lane)
    return t.reshape(ns, 4, 14 * Bt, 126)


def choose_batch_tile(B):
    if B >= 16:
        return 8
    if B >= 2:
        return max(1, B // 2)        # keep >= 2 grid steps for v7x's two TensorCores
    return 1


# ----------------------------------------------------------------------------
# Parameters (deterministic, synthetic); BN fold + band/flatten folds done once at init
# ----------------------------------------------------------------------------
def fold_bn(conv_bias, gamma, beta, running_mean, running_var, eps=1e-5):
    scale = gamma / jnp.sqrt(running_var + eps)
    bias = (conv_bias - running_mean) * scale + beta
    return scale, bias


def init_params(key, num_classes=10):
    assert num_classes <= 128
    ks = jax.random.split(key, 16)
    f32 = jnp.float32
    p = {}

    # layer1: Conv2d(1, 16, 3, padding=1) + BatchNorm2d(16) (eval-mode running stats)
    w1 = jax.random.normal(ks[0], (16, 1, 3, 3), f32) * 0.2            # OIHW
    b1 = jax.random.normal(ks[1], (16,), f32) * 0.1
    g1 = 0.8 + 0.4 * jax.random.uniform(ks[2], (16,), f32)
    be1 = jax.random.normal(ks[3], (16,), f32) * 0.1
    rm1 = jax.random.normal(ks[4], (16,), f32) * 0.1
    rv1 = 0.5 + jax.random.uniform(ks[5], (16,), f32)
    s1, c1 = fold_bn(b1, g1, be1, rm1, rv1)
    w1mat = jnp.transpose(w1, (2, 3, 1, 0)).reshape(9, 16) * s1[None, :]     # (tap, cout)
    sel1 = (jnp.arange(16)[None, :] == (jnp.arange(14) + 1)[:, None]).astype(f32)  # j -> b=j+1
    p["w1"] = jnp.einsum('jb,tc->jtbc', sel1, w1mat).reshape(126, 256)
    bmask = sel1.sum(axis=0)                                                 # 1 for b=1..14
    p["b1"] = (bmask[:, None] * c1[None, :]).reshape(1, 256)

    # layer2: Conv2d(16, 32, 3, padding=1) + BatchNorm2d(32)
    w2 = jax.random.normal(ks[6], (32, 16, 3, 3), f32) * 0.1
    b2 = jax.random.normal(ks[7], (32,), f32) * 0.1
    g2 = 0.8 + 0.4 * jax.random.uniform(ks[8], (32,), f32)
    be2 = jax.random.normal(ks[9], (32,), f32) * 0.1
    rm2 = jax.random.normal(ks[10], (32,), f32) * 0.1
    rv2 = 0.5 + jax.random.uniform(ks[11], (32,), f32)
    s2, c2 = fold_bn(b2, g2, be2, rm2, rv2)
    w2f = jnp.transpose(w2, (2, 3, 1, 0)) * s2[None, None, None, :]          # (ky,kx,cin,cout)
    b_i = jnp.arange(16).reshape(16, 1, 1, 1)
    qx_i = jnp.arange(2).reshape(1, 2, 1, 1)
    v_i = jnp.arange(8).reshape(1, 1, 8, 1)
    kx_i = jnp.arange(3).reshape(1, 1, 1, 3)
    sel2 = ((b_i == 2 * v_i + qx_i + kx_i) & (v_i < 7)).astype(f32)          # (b, qx, v, kx)
    p["w2"] = jnp.einsum('bqvx,yxcn->ybcqvn', sel2, w2f).reshape(3, 256, 512)
    vmask = (jnp.arange(8) < 7).astype(f32)
    p["b2"] = jnp.broadcast_to((vmask[:, None] * c2[None, :])[None, :, :],
                               (2, 8, 32)).reshape(1, 512)

    # fc1: Linear(32*7*7, 128). Rows re-ordered from PyTorch (c, h, w) flatten to the
    # kernel's (u, v*32+c) layout once at init -> no runtime flatten/transpose.
    fc1w = jax.random.normal(ks[12], (32 * 7 * 7, 128), f32) * 0.02          # (c*49+u*7+v, n)
    fc1w = fc1w.reshape(32, 7, 7, 128).transpose(1, 2, 0, 3)                 # (u, v, c, n)
    fc1w = jnp.pad(fc1w, ((0, 0), (0, 1), (0, 0), (0, 0)))                   # pad v -> 8
    p["fc1w"] = fc1w.reshape(7, 256, 128)
    p["fc1b"] = (jax.random.normal(ks[13], (128,), f32) * 0.02).reshape(1, 128)

    # fc2: Linear(128, num_classes), columns zero-padded to 128 for a dense lane store.
    fc2w = jax.random.normal(ks[14], (128, num_classes), f32) * 0.05
    fc2b = jax.random.normal(ks[15], (num_classes,), f32) * 0.02
    p["fc2w"] = jnp.pad(fc2w, ((0, 0), (0, 128 - num_classes)))
    p["fc2b"] = jnp.pad(fc2b, (0, 128 - num_classes)).reshape(1, 128)
    return p


@functools.partial(jax.jit, static_argnames=("num_classes",))
def complex_model_forward(x_nchw, params, num_classes=10):
    B = x_nchw.shape[0]
    x = x_nchw.reshape(B, 28, 28).astype(jnp.float32)     # NCHW with C=1 -> (B, H, W)
    Bt = choose_batch_tile(B)
    nsteps = -(-B // Bt)
    Bpad = nsteps * Bt
    if Bpad != B:
        x = jnp.pad(x, ((0, Bpad - B), (0, 0), (0, 0)))   # zero-image remainder padding
    p1 = build_conv1_patches(x, Bt)                       # (nsteps, 4, 14*Bt, 126)
    out = fused_forward(p1, params, Bt, nsteps)           # (Bpad, 128)
    return out[:B, :num_classes]


if __name__ == "__main__":
    key = jax.random.PRNGKey(0)
    k_x, k_p = jax.random.split(key)
    # Input shape implied by fc1 = Linear(32*7*7, ...): 1x28x28 images.
    x = jax.random.normal(k_x, (2, 1, 28, 28), jnp.float32)
    params = init_params(k_p, num_classes=10)

    out = complex_model_forward(x, params, num_classes=10)
    jax.block_until_ready(out)
    assert out.shape == (2, 10)
    print("KERNEL_OK")
</pallas_src>

<mosaic_0001>
module attributes {stable_mosaic.version = 11 : i64} {
  func.func @_fused_kernel(%arg0: i32, %arg1: memref<1x4x14x126xf32, #tpu.memory_space<vmem>>, %arg2: memref<126x256xf32, #tpu.memory_space<vmem>>, %arg3: memref<1x256xf32, #tpu.memory_space<vmem>>, %arg4: memref<3x256x512xf32, #tpu.memory_space<vmem>>, %arg5: memref<1x512xf32, #tpu.memory_space<vmem>>, %arg6: memref<7x256x128xf32, #tpu.memory_space<vmem>>, %arg7: memref<1x128xf32, #tpu.memory_space<vmem>>, %arg8: memref<128x128xf32, #tpu.memory_space<vmem>>, %arg9: memref<1x128xf32, #tpu.memory_space<vmem>>, %arg10: memref<1x1x128xf32, #tpu.memory_space<vmem>>) attributes {dimension_semantics = [#tpu.dimension_semantics<parallel>], iteration_bounds = array<i64: 2>, scalar_prefetch = 0 : i64, scratch_operands = 0 : i64, tpu.core_type = #tpu.core_type<tc>, window_params = [{transform_indices = @transform_0, window_bounds = array<i64: 1, 4, 14, 126>}, {pipeline_mode = #tpu.pipeline_mode<synchronous>, transform_indices = @transform_1, window_bounds = array<i64: 126, 256>}, {pipeline_mode = #tpu.pipeline_mode<synchronous>, transform_indices = @transform_2, window_bounds = array<i64: 1, 256>}, {pipeline_mode = #tpu.pipeline_mode<synchronous>, transform_indices = @transform_3, window_bounds = array<i64: 3, 256, 512>}, {pipeline_mode = #tpu.pipeline_mode<synchronous>, transform_indices = @transform_4, window_bounds = array<i64: 1, 512>}, {pipeline_mode = #tpu.pipeline_mode<synchronous>, transform_indices = @transform_5, window_bounds = array<i64: 7, 256, 128>}, {pipeline_mode = #tpu.pipeline_mode<synchronous>, transform_indices = @transform_6, window_bounds = array<i64: 1, 128>}, {pipeline_mode = #tpu.pipeline_mode<synchronous>, transform_indices = @transform_7, window_bounds = array<i64: 128, 128>}, {pipeline_mode = #tpu.pipeline_mode<synchronous>, transform_indices = @transform_8, window_bounds = array<i64: 1, 128>}, {transform_indices = @transform_9, window_bounds = array<i64: 1, 1, 128>}]} {
    %c0 = arith.constant 0 : index
    %c0_0 = arith.constant 0 : index
    %c0_1 = arith.constant 0 : index
    %c0_2 = arith.constant 0 : index
    %0 = vector.load %arg1[%c0, %c0_0, %c0_1, %c0_2] : memref<1x4x14x126xf32, #tpu.memory_space<vmem>>, vector<1x1x14x126xf32>
    %1 = vector.shape_cast %0 : vector<1x1x14x126xf32> to vector<14x126xf32>
    %c0_3 = arith.constant 0 : index
    %c0_4 = arith.constant 0 : index
    %2 = vector.load %arg2[%c0_3, %c0_4] : memref<126x256xf32, #tpu.memory_space<vmem>>, vector<126x256xf32>
    %cst = arith.constant dense<0.000000e+00> : vector<14x256xf32>
    %3 = tpu.matmul %1, %2, %cst {dimension_numbers = #tpu.dot_dimension_numbers<[1], [0], [0], [1], [0, 0, 1, 1], [], []>} : vector<14x126xf32>, vector<126x256xf32>, vector<14x256xf32> -> vector<14x256xf32>
    %c0_5 = arith.constant 0 : index
    %c1 = arith.constant 1 : index
    %c0_6 = arith.constant 0 : index
    %c0_7 = arith.constant 0 : index
    %4 = vector.load %arg1[%c0_5, %c1, %c0_6, %c0_7] : memref<1x4x14x126xf32, #tpu.memory_space<vmem>>, vector<1x1x14x126xf32>
    %5 = vector.shape_cast %4 : vector<1x1x14x126xf32> to vector<14x126xf32>
    %c0_8 = arith.constant 0 : index
    %c0_9 = arith.constant 0 : index
    %6 = vector.load %arg2[%c0_8, %c0_9] : memref<126x256xf32, #tpu.memory_space<vmem>>, vector<126x256xf32>
    %cst_10 = arith.constant dense<0.000000e+00> : vector<14x256xf32>
    %7 = tpu.matmul %5, %6, %cst_10 {dimension_numbers = #tpu.dot_dimension_numbers<[1], [0], [0], [1], [0, 0, 1, 1], [], []>} : vector<14x126xf32>, vector<126x256xf32>, vector<14x256xf32> -> vector<14x256xf32>
    %8 = arith.maximumf %3, %7 : vector<14x256xf32>
    %c0_11 = arith.constant 0 : index
    %c2 = arith.constant 2 : index
    %c0_12 = arith.constant 0 : index
    %c0_13 = arith.constant 0 : index
    %9 = vector.load %arg1[%c0_11, %c2, %c0_12, %c0_13] : memref<1x4x14x126xf32, #tpu.memory_space<vmem>>, vector<1x1x14x126xf32>
    %10 = vector.shape_cast %9 : vector<1x1x14x126xf32> to vector<14x126xf32>
    %c0_14 = arith.constant 0 : index
    %c0_15 = arith.constant 0 : index
    %11 = vector.load %arg2[%c0_14, %c0_15] : memref<126x256xf32, #tpu.memory_space<vmem>>, vector<126x256xf32>
    %cst_16 = arith.constant dense<0.000000e+00> : vector<14x256xf32>
    %12 = tpu.matmul %10, %11, %cst_16 {dimension_numbers = #tpu.dot_dimension_numbers<[1], [0], [0], [1], [0, 0, 1, 1], [], []>} : vector<14x126xf32>, vector<126x256xf32>, vector<14x256xf32> -> vector<14x256xf32>
    %13 = arith.maximumf %8, %12 : vector<14x256xf32>
    %c0_17 = arith.constant 0 : index
    %c3 = arith.constant 3 : index
    %c0_18 = arith.constant 0 : index
    %c0_19 = arith.constant 0 : index
    %14 = vector.load %arg1[%c0_17, %c3, %c0_18, %c0_19] : memref<1x4x14x126xf32, #tpu.memory_space<vmem>>, vector<1x1x14x126xf32>
    %15 = vector.shape_cast %14 : vector<1x1x14x126xf32> to vector<14x126xf32>
    %c0_20 = arith.constant 0 : index
    %c0_21 = arith.constant 0 : index
    %16 = vector.load %arg2[%c0_20, %c0_21] : memref<126x256xf32, #tpu.memory_space<vmem>>, vector<126x256xf32>
    %cst_22 = arith.constant dense<0.000000e+00> : vector<14x256xf32>
    %17 = tpu.matmul %15, %16, %cst_22 {dimension_numbers = #tpu.dot_dimension_numbers<[1], [0], [0], [1], [0, 0, 1, 1], [], []>} : vector<14x126xf32>, vector<126x256xf32>, vector<14x256xf32> -> vector<14x256xf32>
    %18 = arith.maximumf %13, %17 : vector<14x256xf32>
    %c0_23 = arith.constant 0 : index
    %c0_24 = arith.constant 0 : index
    %19 = vector.load %arg3[%c0_23, %c0_24] : memref<1x256xf32, #tpu.memory_space<vmem>>, vector<1x256xf32>
    %20 = vector.broadcast %19 : vector<1x256xf32> to vector<14x256xf32>
    %21 = arith.addf %18, %20 : vector<14x256xf32>
    %cst_25 = arith.constant 0.000000e+00 : f32
    %22 = vector.broadcast %cst_25 : f32 to vector<14x256xf32>
    %23 = arith.maximumf %21, %22 : vector<14x256xf32>
    %24 = vector.extract_strided_slice %23 {offsets = [0, 0], sizes = [7, 256], strides = [1, 1]} : vector<14x256xf32> to vector<7x256xf32>
    %25 = vector.extract_strided_slice %23 {offsets = [7, 0], sizes = [7, 256], strides = [1, 1]} : vector<14x256xf32> to vector<7x256xf32>
    %cst_26 = arith.constant 0.000000e+00 : f32
    %26 = vector.broadcast %cst_26 : f32 to vector<1x256xf32>
    %27 = vector.extract_strided_slice %25 {offsets = [0, 0], sizes = [6, 256], strides = [1, 1]} : vector<7x256xf32> to vector<6x256xf32>
    %28 = tpu.concatenate %26, %27 in 0 : vector<1x256xf32>, vector<6x256xf32> -> vector<7x256xf32>
    %29 = vector.extract_strided_slice %24 {offsets = [1, 0], sizes = [6, 256], strides = [1, 1]} : vector<7x256xf32> to vector<6x256xf32>
    %30 = tpu.concatenate %29, %26 in 0 : vector<6x256xf32>, vector<1x256xf32> -> vector<7x256xf32>
    %c0_27 = arith.constant 0 : index
    %c0_28 = arith.constant 0 : index
    %c0_29 = arith.constant 0 : index
    %31 = vector.load %arg4[%c0_27, %c0_28, %c0_29] : memref<3x256x512xf32, #tpu.memory_space<vmem>>, vector<1x256x512xf32>
    %32 = vector.shape_cast %31 : vector<1x256x512xf32> to vector<256x512xf32>
    %cst_30 = arith.constant dense<0.000000e+00> : vector<7x512xf32>
    %33 = tpu.matmul %28, %32, %cst_30 {dimension_numbers = #tpu.dot_dimension_numbers<[1], [0], [0], [1], [0, 0, 1, 1], [], []>} : vector<7x256xf32>, vector<256x512xf32>, vector<7x512xf32> -> vector<7x512xf32>
    %c1_31 = arith.constant 1 : index
    %c0_32 = arith.constant 0 : index
    %c0_33 = arith.constant 0 : index
    %34 = vector.load %arg4[%c1_31, %c0_32, %c0_33] : memref<3x256x512xf32, #tpu.memory_space<vmem>>, vector<1x256x512xf32>
    %35 = vector.shape_cast %34 : vector<1x256x512xf32> to vector<256x512xf32>
    %cst_34 = arith.constant dense<0.000000e+00> : vector<7x512xf32>
    %36 = tpu.matmul %24, %35, %cst_34 {dimension_numbers = #tpu.dot_dimension_numbers<[1], [0], [0], [1], [0, 0, 1, 1], [], []>} : vector<7x256xf32>, vector<256x512xf32>, vector<7x512xf32> -> vector<7x512xf32>
    %37 = arith.addf %33, %36 : vector<7x512xf32>
    %c2_35 = arith.constant 2 : index
    %c0_36 = arith.constant 0 : index
    %c0_37 = arith.constant 0 : index
    %38 = vector.load %arg4[%c2_35, %c0_36, %c0_37] : memref<3x256x512xf32, #tpu.memory_space<vmem>>, vector<1x256x512xf32>
    %39 = vector.shape_cast %38 : vector<1x256x512xf32> to vector<256x512xf32>
    %cst_38 = arith.constant dense<0.000000e+00> : vector<7x512xf32>
    %40 = tpu.matmul %25, %39, %cst_38 {dimension_numbers = #tpu.dot_dimension_numbers<[1], [0], [0], [1], [0, 0, 1, 1], [], []>} : vector<7x256xf32>, vector<256x512xf32>, vector<7x512xf32> -> vector<7x512xf32>
    %41 = arith.addf %37, %40 : vector<7x512xf32>
    %c0_39 = arith.constant 0 : index
    %c0_40 = arith.constant 0 : index
    %c0_41 = arith.constant 0 : index
    %42 = vector.load %arg4[%c0_39, %c0_40, %c0_41] : memref<3x256x512xf32, #tpu.memory_space<vmem>>, vector<1x256x512xf32>
    %43 = vector.shape_cast %42 : vector<1x256x512xf32> to vector<256x512xf32>
    %cst_42 = arith.constant dense<0.000000e+00> : vector<7x512xf32>
    %44 = tpu.matmul %24, %43, %cst_42 {dimension_numbers = #tpu.dot_dimension_numbers<[1], [0], [0], [1], [0, 0, 1, 1], [], []>} : vector<7x256xf32>, vector<256x512xf32>, vector<7x512xf32> -> vector<7x512xf32>
    %c1_43 = arith.constant 1 : index
    %c0_44 = arith.constant 0 : index
    %c0_45 = arith.constant 0 : index
    %45 = vector.load %arg4[%c1_43, %c0_44, %c0_45] : memref<3x256x512xf32, #tpu.memory_space<vmem>>, vector<1x256x512xf32>
    %46 = vector.shape_cast %45 : vector<1x256x512xf32> to vector<256x512xf32>
    %cst_46 = arith.constant dense<0.000000e+00> : vector<7x512xf32>
    %47 = tpu.matmul %25, %46, %cst_46 {dimension_numbers = #tpu.dot_dimension_numbers<[1], [0], [0], [1], [0, 0, 1, 1], [], []>} : vector<7x256xf32>, vector<256x512xf32>, vector<7x512xf32> -> vector<7x512xf32>
    %48 = arith.addf %44, %47 : vector<7x512xf32>
    %c2_47 = arith.constant 2 : index
    %c0_48 = arith.constant 0 : index
    %c0_49 = arith.constant 0 : index
    %49 = vector.load %arg4[%c2_47, %c0_48, %c0_49] : memref<3x256x512xf32, #tpu.memory_space<vmem>>, vector<1x256x512xf32>
    %50 = vector.shape_cast %49 : vector<1x256x512xf32> to vector<256x512xf32>
    %cst_50 = arith.constant dense<0.000000e+00> : vector<7x512xf32>
    %51 = tpu.matmul %30, %50, %cst_50 {dimension_numbers = #tpu.dot_dimension_numbers<[1], [0], [0], [1], [0, 0, 1, 1], [], []>} : vector<7x256xf32>, vector<256x512xf32>, vector<7x512xf32> -> vector<7x512xf32>
    %52 = arith.addf %48, %51 : vector<7x512xf32>
    %c0_51 = arith.constant 0 : index
    %c0_52 = arith.constant 0 : index
    %53 = vector.load %arg5[%c0_51, %c0_52] : memref<1x512xf32, #tpu.memory_space<vmem>>, vector<1x512xf32>
    %54 = vector.broadcast %53 : vector<1x512xf32> to vector<7x512xf32>
    %55 = arith.addf %41, %54 : vector<7x512xf32>
    %c0_53 = arith.constant 0 : index
    %c0_54 = arith.constant 0 : index
    %56 = vector.load %arg5[%c0_53, %c0_54] : memref<1x512xf32, #tpu.memory_space<vmem>>, vector<1x512xf32>
    %57 = vector.broadcast %56 : vector<1x512xf32> to vector<7x512xf32>
    %58 = arith.addf %52, %57 : vector<7x512xf32>
    %59 = vector.extract_strided_slice %55 {offsets = [0, 0], sizes = [7, 256], strides = [1, 1]} : vector<7x512xf32> to vector<7x256xf32>
    %60 = vector.extract_strided_slice %55 {offsets = [0, 256], sizes = [7, 256], strides = [1, 1]} : vector<7x512xf32> to vector<7x256xf32>
    %61 = arith.maximumf %59, %60 : vector<7x256xf32>
    %62 = vector.extract_strided_slice %58 {offsets = [0, 0], sizes = [7, 256], strides = [1, 1]} : vector<7x512xf32> to vector<7x256xf32>
    %63 = vector.extract_strided_slice %58 {offsets = [0, 256], sizes = [7, 256], strides = [1, 1]} : vector<7x512xf32> to vector<7x256xf32>
    %64 = arith.maximumf %62, %63 : vector<7x256xf32>
    %65 = arith.maximumf %61, %64 : vector<7x256xf32>
    %cst_55 = arith.constant 0.000000e+00 : f32
    %66 = vector.broadcast %cst_55 : f32 to vector<7x256xf32>
    %67 = arith.maximumf %65, %66 : vector<7x256xf32>
    %68 = vector.extract_strided_slice %67 {offsets = [0, 0], sizes = [1, 256], strides = [1, 1]} : vector<7x256xf32> to vector<1x256xf32>
    %c0_56 = arith.constant 0 : index
    %c0_57 = arith.constant 0 : index
    %c0_58 = arith.constant 0 : index
    %69 = vector.load %arg6[%c0_56, %c0_57, %c0_58] : memref<7x256x128xf32, #tpu.memory_space<vmem>>, vector<1x256x128xf32>
    %70 = vector.shape_cast %69 : vector<1x256x128xf32> to vector<256x128xf32>
    %cst_59 = arith.constant dense<0.000000e+00> : vector<1x128xf32>
    %71 = tpu.matmul %68, %70, %cst_59 {dimension_numbers = #tpu.dot_dimension_numbers<[1], [0], [0], [1], [0, 0, 1, 1], [], []>} : vector<1x256xf32>, vector<256x128xf32>, vector<1x128xf32> -> vector<1x128xf32>
    %72 = vector.extract_strided_slice %67 {offsets = [1, 0], sizes = [1, 256], strides = [1, 1]} : vector<7x256xf32> to vector<1x256xf32>
    %c1_60 = arith.constant 1 : index
    %c0_61 = arith.constant 0 : index
    %c0_62 = arith.constant 0 : index
    %73 = vector.load %arg6[%c1_60, %c0_61, %c0_62] : memref<7x256x128xf32, #tpu.memory_space<vmem>>, vector<1x256x128xf32>
    %74 = vector.shape_cast %73 : vector<1x256x128xf32> to vector<256x128xf32>
    %cst_63 = arith.constant dense<0.000000e+00> : vector<1x128xf32>
    %75 = tpu.matmul %72, %74, %cst_63 {dimension_numbers = #tpu.dot_dimension_numbers<[1], [0], [0], [1], [0, 0, 1, 1], [], []>} : vector<1x256xf32>, vector<256x128xf32>, vector<1x128xf32> -> vector<1x128xf32>
    %76 = arith.addf %71, %75 : vector<1x128xf32>
    %77 = vector.extract_strided_slice %67 {offsets = [2, 0], sizes = [1, 256], strides = [1, 1]} : vector<7x256xf32> to vector<1x256xf32>
    %c2_64 = arith.constant 2 : index
    %c0_65 = arith.constant 0 : index
    %c0_66 = arith.constant 0 : index
    %78 = vector.load %arg6[%c2_64, %c0_65, %c0_66] : memref<7x256x128xf32, #tpu.memory_space<vmem>>, vector<1x256x128xf32>
    %79 = vector.shape_cast %78 : vector<1x256x128xf32> to vector<256x128xf32>
    %cst_67 = arith.constant dense<0.000000e+00> : vector<1x128xf32>
    %80 = tpu.matmul %77, %79, %cst_67 {dimension_numbers = #tpu.dot_dimension_numbers<[1], [0], [0], [1], [0, 0, 1, 1], [], []>} : vector<1x256xf32>, vector<256x128xf32>, vector<1x128xf32> -> vector<1x128xf32>
    %81 = arith.addf %76, %80 : vector<1x128xf32>
    %82 = vector.extract_strided_slice %67 {offsets = [3, 0], sizes = [1, 256], strides = [1, 1]} : vector<7x256xf32> to vector<1x256xf32>
    %c3_68 = arith.constant 3 : index
    %c0_69 = arith.constant 0 : index
    %c0_70 = arith.constant 0 : index
    %83 = vector.load %arg6[%c3_68, %c0_69, %c0_70] : memref<7x256x128xf32, #tpu.memory_space<vmem>>, vector<1x256x128xf32>
    %84 = vector.shape_cast %83 : vector<1x256x128xf32> to vector<256x128xf32>
    %cst_71 = arith.constant dense<0.000000e+00> : vector<1x128xf32>
    %85 = tpu.matmul %82, %84, %cst_71 {dimension_numbers = #tpu.dot_dimension_numbers<[1], [0], [0], [1], [0, 0, 1, 1], [], []>} : vector<1x256xf32>, vector<256x128xf32>, vector<1x128xf32> -> vector<1x128xf32>
    %86 = arith.addf %81, %85 : vector<1x128xf32>
    %87 = vector.extract_strided_slice %67 {offsets = [4, 0], sizes = [1, 256], strides = [1, 1]} : vector<7x256xf32> to vector<1x256xf32>
    %c4 = arith.constant 4 : index
    %c0_72 = arith.constant 0 : index
    %c0_73 = arith.constant 0 : index
    %88 = vector.load %arg6[%c4, %c0_72, %c0_73] : memref<7x256x128xf32, #tpu.memory_space<vmem>>, vector<1x256x128xf32>
    %89 = vector.shape_cast %88 : vector<1x256x128xf32> to vector<256x128xf32>
    %cst_74 = arith.constant dense<0.000000e+00> : vector<1x128xf32>
    %90 = tpu.matmul %87, %89, %cst_74 {dimension_numbers = #tpu.dot_dimension_numbers<[1], [0], [0], [1], [0, 0, 1, 1], [], []>} : vector<1x256xf32>, vector<256x128xf32>, vector<1x128xf32> -> vector<1x128xf32>
    %91 = arith.addf %86, %90 : vector<1x128xf32>
    %92 = vector.extract_strided_slice %67 {offsets = [5, 0], sizes = [1, 256], strides = [1, 1]} : vector<7x256xf32> to vector<1x256xf32>
    %c5 = arith.constant 5 : index
    %c0_75 = arith.constant 0 : index
    %c0_76 = arith.constant 0 : index
    %93 = vector.load %arg6[%c5, %c0_75, %c0_76] : memref<7x256x128xf32, #tpu.memory_space<vmem>>, vector<1x256x128xf32>
    %94 = vector.shape_cast %93 : vector<1x256x128xf32> to vector<256x128xf32>
    %cst_77 = arith.constant dense<0.000000e+00> : vector<1x128xf32>
    %95 = tpu.matmul %92, %94, %cst_77 {dimension_numbers = #tpu.dot_dimension_numbers<[1], [0], [0], [1], [0, 0, 1, 1], [], []>} : vector<1x256xf32>, vector<256x128xf32>, vector<1x128xf32> -> vector<1x128xf32>
    %96 = arith.addf %91, %95 : vector<1x128xf32>
    %97 = vector.extract_strided_slice %67 {offsets = [6, 0], sizes = [1, 256], strides = [1, 1]} : vector<7x256xf32> to vector<1x256xf32>
    %c6 = arith.constant 6 : index
    %c0_78 = arith.constant 0 : index
    %c0_79 = arith.constant 0 : index
    %98 = vector.load %arg6[%c6, %c0_78, %c0_79] : memref<7x256x128xf32, #tpu.memory_space<vmem>>, vector<1x256x128xf32>
    %99 = vector.shape_cast %98 : vector<1x256x128xf32> to vector<256x128xf32>
    %cst_80 = arith.constant dense<0.000000e+00> : vector<1x128xf32>
    %100 = tpu.matmul %97, %99, %cst_80 {dimension_numbers = #tpu.dot_dimension_numbers<[1], [0], [0], [1], [0, 0, 1, 1], [], []>} : vector<1x256xf32>, vector<256x128xf32>, vector<1x128xf32> -> vector<1x128xf32>
    %101 = arith.addf %96, %100 : vector<1x128xf32>
    %c0_81 = arith.constant 0 : index
    %c0_82 = arith.constant 0 : index
    %102 = vector.load %arg7[%c0_81, %c0_82] : memref<1x128xf32, #tpu.memory_space<vmem>>, vector<1x128xf32>
    %103 = arith.addf %101, %102 : vector<1x128xf32>
    %cst_83 = arith.constant 0.000000e+00 : f32
    %104 = vector.broadcast %cst_83 : f32 to vector<1x128xf32>
    %105 = arith.maximumf %103, %104 : vector<1x128xf32>
    %c0_84 = arith.constant 0 : index
    %c0_85 = arith.constant 0 : index
    %106 = vector.load %arg8[%c0_84, %c0_85] : memref<128x128xf32, #tpu.memory_space<vmem>>, vector<128x128xf32>
    %cst_86 = arith.constant dense<0.000000e+00> : vector<1x128xf32>
    %107 = tpu.matmul %105, %106, %cst_86 {dimension_numbers = #tpu.dot_dimension_numbers<[1], [0], [0], [1], [0, 0, 1, 1], [], []>} : vector<1x128xf32>, vector<128x128xf32>, vector<1x128xf32> -> vector<1x128xf32>
    %c0_87 = arith.constant 0 : index
    %c0_88 = arith.constant 0 : index
    %108 = vector.load %arg9[%c0_87, %c0_88] : memref<1x128xf32, #tpu.memory_space<vmem>>, vector<1x128xf32>
    %109 = arith.addf %107, %108 : vector<1x128xf32>
    %c0_89 = arith.constant 0 : index
    %c0_90 = arith.constant 0 : index
    %c0_91 = arith.constant 0 : index
    %110 = vector.load %arg10[%c0_89, %c0_90, %c0_91] : memref<1x1x128xf32, #tpu.memory_space<vmem>>, vector<1x1x128xf32>
    %111 = vector.shape_cast %110 : vector<1x1x128xf32> to vector<1x128xf32>
    %112 = vector.shape_cast %109 : vector<1x128xf32> to vector<1x1x128xf32>
    tpu.vector_store %arg10[%c0_89, %c0_90, %c0_91], %112 {strides = array<i32>} : memref<1x1x128xf32, #tpu.memory_space<vmem>>, vector<1x1x128xf32>,
    return
  }
  func.func @transform_0(%arg0: i32) -> (i32, i32, i32, i32) {
    %c0_i32 = arith.constant 0 : i32
    %c0_i32_0 = arith.constant 0 : i32
    %c0_i32_1 = arith.constant 0 : i32
    %c0_i32_2 = arith.constant 0 : i32
    return %arg0, %c0_i32, %c0_i32_0, %c0_i32_1 : i32, i32, i32, i32
  }
  func.func @transform_1(%arg0: i32) -> (i32, i32) {
    %c0_i32 = arith.constant 0 : i32
    %c0_i32_0 = arith.constant 0 : i32
    %c0_i32_1 = arith.constant 0 : i32
    return %c0_i32, %c0_i32_0 : i32, i32
  }
  func.func @transform_2(%arg0: i32) -> (i32, i32) {
    %c0_i32 = arith.constant 0 : i32
    %c0_i32_0 = arith.constant 0 : i32
    %c0_i32_1 = arith.constant 0 : i32
    return %c0_i32, %c0_i32_0 : i32, i32
  }
  func.func @transform_3(%arg0: i32) -> (i32, i32, i32) {
    %c0_i32 = arith.constant 0 : i32
    %c0_i32_0 = arith.constant 0 : i32
    %c0_i32_1 = arith.constant 0 : i32
    %c0_i32_2 = arith.constant 0 : i32
    return %c0_i32, %c0_i32_0, %c0_i32_1 : i32, i32, i32
  }
  func.func @transform_4(%arg0: i32) -> (i32, i32) {
    %c0_i32 = arith.constant 0 : i32
    %c0_i32_0 = arith.constant 0 : i32
    %c0_i32_1 = arith.constant 0 : i32
    return %c0_i32, %c0_i32_0 : i32, i32
  }
  func.func @transform_5(%arg0: i32) -> (i32, i32, i32) {
    %c0_i32 = arith.constant 0 : i32
    %c0_i32_0 = arith.constant 0 : i32
    %c0_i32_1 = arith.constant 0 : i32
    %c0_i32_2 = arith.constant 0 : i32
    return %c0_i32, %c0_i32_0, %c0_i32_1 : i32, i32, i32
  }
  func.func @transform_6(%arg0: i32) -> (i32, i32) {
    %c0_i32 = arith.constant 0 : i32
    %c0_i32_0 = arith.constant 0 : i32
    %c0_i32_1 = arith.constant 0 : i32
    return %c0_i32, %c0_i32_0 : i32, i32
  }
  func.func @transform_7(%arg0: i32) -> (i32, i32) {
    %c0_i32 = arith.constant 0 : i32
    %c0_i32_0 = arith.constant 0 : i32
    %c0_i32_1 = arith.constant 0 : i32
    return %c0_i32, %c0_i32_0 : i32, i32
  }
  func.func @transform_8(%arg0: i32) -> (i32, i32) {
    %c0_i32 = arith.constant 0 : i32
    %c0_i32_0 = arith.constant 0 : i32
    %c0_i32_1 = arith.constant 0 : i32
    return %c0_i32, %c0_i32_0 : i32, i32
  }
  func.func @transform_9(%arg0: i32) -> (i32, i32, i32) {
    %c0_i32 = arith.constant 0 : i32
    %c0_i32_0 = arith.constant 0 : i32
    %c0_i32_1 = arith.constant 0 : i32
    return %arg0, %c0_i32, %c0_i32_0 : i32, i32, i32
  }
}

</mosaic_0001>

<bundles_post_ra>
// kernel: complex_model_forward.1
= control target key start
LH: loop header
LB: loop body
LE: loop exit
PB: predicated region body
PF: predicated region fallthrough
CT: control target
= control target key end

     0   :  { %s8206_s0 = inlined_call_operand.vmem [shape: f32[2,4,14,126], index: 0, kind: input, shape index: {}]   ;;  %s8207_s1 = inlined_call_operand.vmem [shape: f32[126,256], index: 1, kind: input, shape index: {}]   ;;  %s8208_s2 = inlined_call_operand.vmem [shape: f32[1,256], index: 2, kind: input, shape index: {}]   ;;  %s8209_s3 = inlined_call_operand.vmem [shape: f32[3,256,512], index: 3, kind: input, shape index: {}]   ;;  %s8210_s4 = inlined_call_operand.vmem [shape: f32[1,512], index: 4, kind: input, shape index: {}]   ;;  %s8211_s5 = inlined_call_operand.vmem [shape: f32[7,256,128], index: 5, kind: input, shape index: {}]   ;;  %s8212_s6 = inlined_call_operand.vmem [shape: f32[1,128], index: 6, kind: input, shape index: {}]   ;;  %s8213_s7 = inlined_call_operand.vmem [shape: f32[128,128], index: 7, kind: input, shape index: {}]   ;;  %s8214_s8 = inlined_call_operand.vmem [shape: f32[1,128], index: 8, kind: input, shape index: {}]   ;;  %s8215_s9 = inlined_call_operand.hbm [shape: f32[2,1,128], index: 9, kind: output, shape index: {}]  }
   0x1   :  { %8361 = sst [smem:[#allocation145_spill]] %s8206_s0 }
   0x2   :  { %14 = vsyncpa [#allocation3], 0 }
   0x3   :  { %16 = vsyncpa [#allocation3 + $0x1], 0  ;;  %s5088_s30 = smov 0   ;;  %s5090_s10 = smov 0  }
   0x4   :  { %s5092_s11 = smov 0   ;;  %s5094_s12 = smov 0  }
   0x5 LB: > { %s5109_s13 = sadd.s32 4294967295, %s5031_s12   ;;  %s2969_s14 = sadd.s32 4294967294, %s5031_s12   ;;  %s5031_s12 = sphi %s5094_s12, %s8659_s12   ;;  %s5027_s11 = sphi %s5092_s11, %s8658_s11   ;;  %s5023_s10 = sphi %s5090_s10, %s8657_s10   ;;  %s5019_s30 = sphi %s5088_s30, %s8656_s30  }
   0x6   : > { %s5113_s15 = sadd.s32 1, %s5031_s12   ;;  %s223_s16 = sadd.s32 1, %s5027_s11 }
   0x7   : > { %s220_s17 = ssub.s32 %s5031_s12, %s5113_s15  ;;  %p233_p0 = scmp.ne.s32.totalorder %s5027_s11, %s5023_s10 }
   0x8   : > { %p221_p1 = scmp.eq.s32.totalorder %s220_s17, 0  ;;  %p234_p2 = scmp.eq.s32.totalorder %s5109_s13, 1 }
   0x9   : > { %p239_p3 = scmp.ne.s32.totalorder %s5023_s10, %s5019_s30  ;;  %p240_p4 = scmp.eq.s32.totalorder %s2969_s14, 1 }
   0xa   : > { %s5124_s18 = scalar_select %p221_p1, %s5027_s11, %s223_s16  }
   0xb   : > { %p5126_p5 = por %p234_p2, %p233_p0  ;;  %p5130_p6 = por %p240_p4, %p239_p3 }
   0xc   : > { %p2972_p7 = scmp.ge.s32.totalorder %s5031_s12, 1  ;;  %p290_p8 = scmp.lt.s32.totalorder %s5031_s12, 3 }
   0xe   : > { %p291_p9 = pnand %p2972_p7, %p290_p8 }
  0x10   : > { %294 = sbr.rel (%p291_p9) target bundleno = 1402 (0x57a), region = 56 }
  0x17   : > { %v333_v0 = vld [vmem:[%s8207_s1 + $0x8] sm:$0xff]  ;;  %v335_v1 = vld [vmem:[%s8207_s1 + $0x18] sm:$0xff]  ;;  %v332_v2 = vld [vmem:[%s8207_s1] sm:$0xff]  ;;  %v8216_v7 = vmov 0.0   ;;  %p325_p10 = scmp.lt.s32.totalorder %s5109_s13, 1  ;;  %vm371_vm0 = vcmask 1045504  }
  0x18   : > { %v5145_v3 = vpack.c.bf16 %v335_v1, %v333_v0  ;;  %v334_v4 = vld [vmem:[%s8207_s1 + $0x10] sm:$0xff]  ;;  %v337_v5 = vld [vmem:[%s8207_s1 + $0x28] sm:$0xff]  ;;  %v339_v6 = vld [vmem:[%s8207_s1 + $0x38] sm:$0xff]  ;;  %442 = vmatprep.mubr.f32.mxu0 %v8216_v7  ;;  %528 = vmatprep.mubr.f32.mxu1 %v8216_v7  ;;  %vm5034_vm1 = vmmov 1   ;;  %s8366_s0 = sld [smem:[#allocation145_spill]]  ;;  %vm364_vm3 = vcmask 1031168  }
  0x19   : > { %v5158_v8 = vpack.c.bf16 %v334_v4, %v332_v2  ;;  %v5160_v9 = vpack.c.bf16 %v339_v6, %v337_v5  ;;  %v336_v10 = vld [vmem:[%s8207_s1 + $0x20] sm:$0xff]  ;;  %v338_v11 = vld [vmem:[%s8207_s1 + $0x30] sm:$0xff]  ;;  %v341_v12 = vld [vmem:[%s8207_s1 + $0x48] sm:$0xff]  ;;  %s326_s21 = scalar_select %p325_p10, %s5109_s13, 1  ;;  %vm758_vm4 = vcmask 1040384   ;;  %vm749_vm6 = vcmask 1041408  }
  0x1a   : > { %3759 = vmatprep.subr.bf16.mxu0 %v5145_v3  ;;  %3793 = vmatprep.subr.bf16.mxu1 %v5145_v3  ;;  %v343_v13 = vld [vmem:[%s8207_s1 + $0x58] sm:$0xff]  ;;  %v5178_v14 = vpack.c.bf16 %v338_v11, %v336_v10  ;;  %v340_v16 = vld [vmem:[%s8207_s1 + $0x40] sm:$0xff]  ;;  %v342_v17 = vld [vmem:[%s8207_s1 + $0x50] sm:$0xff]  ;;  %vm5036_vm7 = vmmov 0   ;;  %s3457_s14 = sshll.u32 %s5109_s13, 4  ;;  %s5037_s13 = smov [#allocation2]  }
  0x1b   : > { %3761 = vmatpush1.bf16.msra.mxu0 %v5158_v8  ;;  %3795 = vmatpush1.bf16.msra.mxu1 %v5158_v8  ;;  %v5182_v15 = vpack.c.bf16 %v343_v13, %v341_v12  ;;  %v345_v18 = vld [vmem:[%s8207_s1 + $0x68] sm:$0xff]  ;;  %v347_v19 = vld [vmem:[%s8207_s1 + $0x78] sm:$0xff]  ;;  %v5198_v20 = vpack.c.bf16 %v342_v17, %v340_v16  ;;  %v344_v22 = vld [vmem:[%s8207_s1 + $0x60] sm:$0xff]  ;;  %s3460_s26 = sshll.u32 %s326_s21, 6  ;;  %s8164_s22 = scalar_lea.hbm %s8215_s9, %s3457_s14 }
  0x1c   : > { %3763 = vmatprep.subr.bf16.mxu0 %v5160_v9  ;;  %3797 = vmatprep.subr.bf16.mxu1 %v5160_v9  ;;  %v5202_v21 = vpack.c.bf16 %v347_v19, %v345_v18  ;;  %v346_v23 = vld [vmem:[%s8207_s1 + $0x70] sm:$0xff]  ;;  %v349_v24 = vld [vmem:[%s8207_s1 + $0x88] sm:$0xff]  ;;  %v351_v25 = vld [vmem:[%s8207_s1 + $0x98] sm:$0xff]  ;;  %s4973_s25 = sshll.u32 %s5037_s13, 4  ;;  %s4974_s25 = int_to_ptr.vmem [resolvable:$false] %s4973_s25 }
  0x1d   : > { %v5218_v26 = vpack.c.bf16 %v346_v23, %v344_v22  ;;  %v5222_v27 = vpack.c.bf16 %v351_v25, %v349_v24  ;;  %v348_v28 = vld [vmem:[%s8207_s1 + $0x80] sm:$0xff]  ;;  %v350_v29 = vld [vmem:[%s8207_s1 + $0x90] sm:$0xff]  ;;  %v353_v30 = vld [vmem:[%s8207_s1 + $0xa8] sm:$0xff] }
  0x1e   : > { %v355_v31 = vld [vmem:[%s8207_s1 + $0xb8] sm:$0xff]  ;;  %v5238_v32 = vpack.c.bf16 %v350_v29, %v348_v28  ;;  %v352_v34 = vld [vmem:[%s8207_s1 + $0xa0] sm:$0xff]  ;;  %v354_v35 = vld [vmem:[%s8207_s1 + $0xb0] sm:$0xff]  ;;  %s5302_s29 = scalar_lea.vmem %s8366_s0, %s3460_s26  ;;  %s323_s26 = sand.u32 1, %s5023_s10  }
  0x1f   : > { %3765 = vmatpush1.bf16.msra.mxu0 %v5178_v14  ;;  %3799 = vmatpush1.bf16.msra.mxu1 %v5178_v14  ;;  %v5242_v33 = vpack.c.bf16 %v355_v31, %v353_v30  ;;  %v357_v36 = vld [vmem:[%s8207_s1 + $0xc8] sm:$0xff]  ;;  %v359_v37 = vld [vmem:[%s8207_s1 + $0xd8] sm:$0xff]  ;;  %v5259_v38 = vpack.c.bf16 %v354_v35, %v352_v34  ;;  %v356_v40 = vld [vmem:[%s8207_s1 + $0xc0] sm:$0xff]  ;;  %s324_s0 = scalar_lea.vmem [#allocation2], %s323_s26  ;;  %s2902_s23 = scalar_lea.sflag [#allocation3], %s323_s26 }
  0x20   : > { %3767 = vmatprep.subr.bf16.mxu0 %v5182_v15  ;;  %3801 = vmatprep.subr.bf16.mxu1 %v5182_v15  ;;  %v5263_v39 = vpack.c.bf16 %v359_v37, %v357_v36  ;;  %v358_v41 = vld [vmem:[%s8207_s1 + $0xd0] sm:$0xff]  ;;  %v361_v42 = vld [vmem:[%s8207_s1 + $0xe8] sm:$0xff]  ;;  %v363_v43 = vld [vmem:[%s8207_s1 + $0xf8] sm:$0x3f]  ;;  %s2914_s16 = sshll.u32 %s324_s0, 4  ;;  %s8166_s16 = int_to_ptr.vmem [resolvable:$true] %s2914_s16 }
  0x21   : > { %v3784_v44 = vpack.c.bf16 %v358_v41, %v356_v40  ;;  %v3786_v45 = vpack.c.bf16 %v363_v43, %v361_v42  ;;  %v360_v46 = vld [vmem:[%s8207_s1 + $0xe0] sm:$0xff]  ;;  %v362_v47 = vld [vmem:[%s8207_s1 + $0xf0] sm:$0x3f]  ;;  %vm5289_vm2 = vmpackc.low %vm371_vm0, %vm5034_vm1  ;;  %s4969_s24 = scalar_lea.vmem %s8166_s16, 16  ;;  %p4976_p0 = scmp.lt.s32.totalorder %s8166_s16, %s4974_s25 }
  0x22   : > { %v5293_v49 = vpack.c.bf16 %v362_v47, %v360_v46  ;;  %v330_v50 = vld [vmem:[%s5302_s29] sm:$0xff]  ;;  %v2979_v51 = vld [vmem:[%s5302_s29 + $0x10] sm:$0xff]  ;;  %v331_v52 = vld [vmem:[%s5302_s29 + $0x8] sm:$0x3f]  ;;  %p4970_p11 = scmp.ne.s32.totalorder %s8166_s16, %s4969_s24 }
  0x23   : > { %3769 = vmatpush1.bf16.msra.mxu0 %v5198_v20  ;;  %3803 = vmatpush1.bf16.msra.mxu1 %v5198_v20  ;;  %v2980_v53 = vld [vmem:[%s5302_s29 + $0x18] sm:$0x3f]  ;;  %v2998_v54 = vld [vmem:[%s8209_s3 + $0x408] sm:$0xff]  ;;  %v2997_v60 = vld [vmem:[%s8209_s3 + $0x400] sm:$0xff] }
  0x24   : > { %3771 = vmatprep.subr.bf16.mxu0 %v5202_v21  ;;  %3805 = vmatprep.subr.bf16.mxu1 %v5202_v21  ;;  %v3002_v55 = vld [vmem:[%s8209_s3 + $0x428] sm:$0xff]  ;;  %v3000_v56 = vld [vmem:[%s8209_s3 + $0x418] sm:$0xff]  ;;  %v3001_v61 = vld [vmem:[%s8209_s3 + $0x420] sm:$0xff]  ;;  %p4971_p12 = pnand %p4970_p11, %p5126_p5 }
  0x25   : > { %v3004_v57 = vld [vmem:[%s8209_s3 + $0x438] sm:$0xff]  ;;  %v5364_v58 = vpack.c.bf16 %v3002_v55, %v2998_v54  ;;  %v2999_v62 = vld [vmem:[%s8209_s3 + $0x410] sm:$0xff]  ;;  %v3006_v0 = vld [vmem:[%s8209_s3 + $0x448] sm:$0xff]  ;;  %v5402_v6 = vpack.c.bf16 %v3001_v61, %v2997_v60 }
  0x26   : > { %v5366_v59 = vpack.c.bf16 %v3004_v57, %v3000_v56  ;;  %v3003_v63 = vld [vmem:[%s8209_s3 + $0x430] sm:$0xff]  ;;  %v3010_v1 = vld [vmem:[%s8209_s3 + $0x468] sm:$0xff]  ;;  %v3008_v2 = vld [vmem:[%s8209_s3 + $0x458] sm:$0xff]  ;;  %p4972_p13 = pneg %p4971_p12 }
  0x27   : > { %3773 = vmatpush1.bf16.msra.mxu0 %v5218_v26  ;;  %3807 = vmatpush1.bf16.msra.mxu1 %v5218_v26  ;;  %v2985_v4 = vld [vmem:[%s5302_s29 + $0x20] sm:$0xff]  ;;  %v2991_v5 = vld [vmem:[%s5302_s29 + $0x30] sm:$0xff]  ;;  %v5412_v11 = vpack.c.bf16 %v3010_v1, %v3006_v0  ;;  %v3018_v16 = vld [vmem:[%s8209_s3 + $0x4a8] sm:$0xff] }
  0x28   : > { %3775 = vmatprep.subr.bf16.mxu0 %v5222_v27  ;;  %3809 = vmatprep.subr.bf16.mxu1 %v5222_v27  ;;  %v3009_v10 = vld [vmem:[%s8209_s3 + $0x460] sm:$0xff]  ;;  %v3007_v13 = vld [vmem:[%s8209_s3 + $0x450] sm:$0xff]  ;;  %v3016_v17 = vld [vmem:[%s8209_s3 + $0x498] sm:$0xff] }
  0x29   : > { %v3020_v18 = vld [vmem:[%s8209_s3 + $0x4b8] sm:$0xff]  ;;  %v2986_v19 = vld [vmem:[%s5302_s29 + $0x28] sm:$0x3f]  ;;  %v3013_v23 = vld [vmem:[%s8209_s3 + $0x480] sm:$0xff] }
  0x2a   : > { %v3017_v24 = vld [vmem:[%s8209_s3 + $0x4a0] sm:$0xff]  ;;  %v3019_v28 = vld [vmem:[%s8209_s3 + $0x4b0] sm:$0xff]  ;;  %v3022_v29 = vld [vmem:[%s8209_s3 + $0x4c8] sm:$0xff] }
  0x2b   : > { %3777 = vmatpush1.bf16.msra.mxu0 %v5238_v32  ;;  %3811 = vmatpush1.bf16.msra.mxu1 %v5238_v32  ;;  %v3026_v30 = vld [vmem:[%s8209_s3 + $0x4e8] sm:$0xff]  ;;  %v3024_v31 = vld [vmem:[%s8209_s3 + $0x4d8] sm:$0xff]  ;;  %v3021_v35 = vld [vmem:[%s8209_s3 + $0x4c0] sm:$0xff] }
  0x2c   : > { %3779 = vmatprep.subr.bf16.mxu0 %v5242_v33  ;;  %3813 = vmatprep.subr.bf16.mxu1 %v5242_v33  ;;  %v3025_v36 = vld [vmem:[%s8209_s3 + $0x4e0] sm:$0xff]  ;;  %v5492_v37 = vpack.c.bf16 %v3026_v30, %v3022_v29  ;;  %v3027_v40 = vld [vmem:[%s8209_s3 + $0x4f0] sm:$0xff]  ;;  %v3030_v41 = vld [vmem:[%s8209_s3 + $0x508] sm:$0xff] }
  0x2d   : > { %v3034_v42 = vld [vmem:[%s8209_s3 + $0x528] sm:$0xff]  ;;  %v3032_v43 = vld [vmem:[%s8209_s3 + $0x518] sm:$0xff]  ;;  %v3029_v47 = vld [vmem:[%s8209_s3 + $0x500] sm:$0xff] }
  0x2e   : > { %v3033_v48 = vld [vmem:[%s8209_s3 + $0x520] sm:$0xff]  ;;  %v3042_v54 = vld [vmem:[%s8209_s3 + $0x568] sm:$0xff]  ;;  %v3040_v55 = vld [vmem:[%s8209_s3 + $0x558] sm:$0xff] }
  0x2f   : > { %3781 = vmatpush1.bf16.msra.mxu0 %v5259_v38  ;;  %3815 = vmatpush1.bf16.msra.mxu1 %v5259_v38  ;;  %v3044_v56 = vld [vmem:[%s8209_s3 + $0x578] sm:$0xff]  ;;  %v5552_v57 = vpack.c.bf16 %v3033_v48, %v3029_v47  ;;  %v3037_v61 = vld [vmem:[%s8209_s3 + $0x540] sm:$0xff]  ;;  %v3039_v1 = vld [vmem:[%s8209_s3 + $0x550] sm:$0xff] }
  0x30   : > { %3783 = vmatprep.subr.bf16.mxu0 %v5263_v39  ;;  %3817 = vmatprep.subr.bf16.mxu1 %v5263_v39  ;;  %v3041_v0 = vld [vmem:[%s8209_s3 + $0x560] sm:$0xff]  ;;  %v3060_v30 = vld [vmem:[%s8209_s3 + $0x5f8] sm:$0xff]  ;;  %vm6056_vm5 = vmneg %vm758_vm4 }
  0x31   : > { %v3068_v47 = vld [vmem:[%s8209_s3 + $0x638] sm:$0xff] }
  0x33   : > { %3785 = vmatpush1.bf16.msra.mxu0 %v3784_v44  ;;  %3819 = vmatpush1.bf16.msra.mxu1 %v3784_v44 }
  0x34   : > { %3788 = vmatprep.subr.msk.bf16.mxu0 %vm5289_vm2, %v3786_v45  ;;  %3822 = vmatprep.subr.msk.bf16.mxu1 %vm5289_vm2, %v3786_v45 }
  0x37   : > { %3791 = vmatpush1.bf16.msk.msra.mxu0 %vm5289_vm2, %v5293_v49  ;;  %3825 = vmatpush1.bf16.msk.msra.mxu1 %vm5289_vm2, %v5293_v49 }
  0x38   : > { %3827 = vmatprep.subr.bf16.mxu0 %v5145_v3  ;;  %3861 = vmatprep.subr.bf16.mxu1 %v5145_v3  ;;  %v3012_v3 = vld [vmem:[%s8209_s3 + $0x478] sm:$0xff] }
  0x39   : > { %v5414_v12 = vpack.c.bf16 %v3012_v3, %v3008_v2  ;;  %v3043_v2 = vld [vmem:[%s8209_s3 + $0x570] sm:$0xff]  ;;  %v5576_v3 = vpack.c.bf16 %v3041_v0, %v3037_v61  ;;  %v3070_v61 = vld [vmem:[%s8209_s3 + $0x648] sm:$0xff] }
  0x3a   : > { %2977 = vmatmul.mubr.msk.f32.vlgmr.msra.gmra.mrb[0].mxu0 %vm364_vm3, %v330_v50  ;;  %2983 = vmatmul.mubr.msk.f32.vlgmr.msra.gmra.mrb[0].mxu1 %vm364_vm3, %v2979_v51  ;;  %v3031_v51 = vld [vmem:[%s8209_s3 + $0x510] sm:$0xff]  ;;  %v3074_v0 = vld [vmem:[%s8209_s3 + $0x668] sm:$0xff] }
  0x3b   : > { %3829 = vmatpush1.bf16.msra.mxu0 %v5158_v8  ;;  %3863 = vmatpush1.bf16.msra.mxu1 %v5158_v8  ;;  %v5404_v8 = vpack.c.bf16 %v3003_v63, %v2999_v62  ;;  %v5563_v63 = vpack.c.bf16 %v3044_v56, %v3040_v55  ;;  %v3067_v56 = vld [vmem:[%s8209_s3 + $0x630] sm:$0xff] }
  0x3c   : > { %3831 = vmatprep.subr.bf16.mxu0 %v5160_v9  ;;  %3865 = vmatprep.subr.bf16.mxu1 %v5160_v9  ;;  %v3005_v9 = vld [vmem:[%s8209_s3 + $0x440] sm:$0xff] }
  0x3d   : > { %448 = vmatprep.mubr.f32.mxu0 %v8216_v7  ;;  %534 = vmatprep.mubr.f32.mxu1 %v8216_v7 }
  0x3e   : > { %2978 = vmatmul.mubr.msk.f32.gmra.mrb[2].mxu0 %vm364_vm3, %v331_v52  ;;  %2984 = vmatmul.mubr.msk.f32.gmra.mrb[2].mxu1 %vm364_vm3, %v2980_v53  ;;  %v3035_v52 = vld [vmem:[%s8209_s3 + $0x530] sm:$0xff]  ;;  %v3038_v53 = vld [vmem:[%s8209_s3 + $0x548] sm:$0xff] }
  0x3f   : > { %3833 = vmatpush1.bf16.msra.mxu0 %v5178_v14  ;;  %3867 = vmatpush1.bf16.msra.mxu1 %v5178_v14  ;;  %v3011_v14 = vld [vmem:[%s8209_s3 + $0x470] sm:$0xff]  ;;  %v5554_v60 = vpack.c.bf16 %v3035_v52, %v3031_v51  ;;  %v5561_v62 = vpack.c.bf16 %v3042_v54, %v3038_v53  ;;  %v3061_v52 = vld [vmem:[%s8209_s3 + $0x600] sm:$0xff] }
  0x40   : > { %3835 = vmatprep.subr.bf16.mxu0 %v5182_v15  ;;  %3869 = vmatprep.subr.bf16.mxu1 %v5182_v15  ;;  %v3014_v15 = vld [vmem:[%s8209_s3 + $0x488] sm:$0xff]  ;;  %v5444_v22 = vpack.c.bf16 %v3011_v14, %v3007_v13  ;;  %v3052_v14 = vld [vmem:[%s8209_s3 + $0x5b8] sm:$0xff]  ;;  %v3065_v53 = vld [vmem:[%s8209_s3 + $0x620] sm:$0xff] }
  0x41   : > { %618 = vmatprep.mubr.f32.mxu0 %v8216_v7  ;;  %708 = vmatprep.mubr.f32.mxu1 %v8216_v7  ;;  %v5454_v25 = vpack.c.bf16 %v3018_v16, %v3014_v15  ;;  %v3045_v15 = vld [vmem:[%s8209_s3 + $0x580] sm:$0xff]  ;;  %v3063_v54 = vld [vmem:[%s8209_s3 + $0x610] sm:$0xff]  ;;  %v5680_v55 = vpack.c.bf16 %v3065_v53, %v3061_v52  ;;  %v3090_v52 = vld [vmem:[%s8209_s3 + $0x6e8] sm:$0xff] }
  0x42   : > { %v3049_v16 = vld [vmem:[%s8209_s3 + $0x5a0] sm:$0xff]  ;;  %v3088_v53 = vld [vmem:[%s8209_s3 + $0x6d8] sm:$0xff] }
  0x43   : > { %3837 = vmatpush1.bf16.msra.mxu0 %v5198_v20  ;;  %3871 = vmatpush1.bf16.msra.mxu1 %v5198_v20  ;;  %v2992_v20 = vld [vmem:[%s5302_s29 + $0x38] sm:$0x3f]  ;;  %s4975_s29 = scalar_lea.vmem %s4974_s25, 32 }
  0x44   : > { %3839 = vmatprep.subr.bf16.mxu0 %v5202_v21  ;;  %3873 = vmatprep.subr.bf16.mxu1 %v5202_v21  ;;  %v5442_v21 = vpack.c.bf16 %v3009_v10, %v3005_v9  ;;  %v3050_v9 = vld [vmem:[%s8209_s3 + $0x5a8] sm:$0xff]  ;;  %v3048_v10 = vld [vmem:[%s8209_s3 + $0x598] sm:$0xff]  ;;  %p4977_p1 = scmp.lt.s32.totalorder %s4975_s29, %s4969_s24 }
  0x46   : > { %p4978_p2 = por %p4977_p1, %p4976_p0 }
  0x47   : > { %3841 = vmatpush1.bf16.msra.mxu0 %v5218_v26  ;;  %3875 = vmatpush1.bf16.msra.mxu1 %v5218_v26  ;;  %v5456_v26 = vpack.c.bf16 %v3020_v18, %v3016_v17  ;;  %v5604_v17 = vpack.c.bf16 %v3052_v14, %v3048_v10  ;;  %v5606_v18 = vpack.c.bf16 %v3049_v16, %v3045_v15  ;;  %v3069_v10 = vld [vmem:[%s8209_s3 + $0x640] sm:$0xff]  ;;  %v3071_v16 = vld [vmem:[%s8209_s3 + $0x650] sm:$0xff] }
  0x48   : > { %3843 = vmatprep.subr.bf16.mxu0 %v5222_v27  ;;  %3877 = vmatprep.subr.bf16.mxu1 %v5222_v27  ;;  %v3015_v27 = vld [vmem:[%s8209_s3 + $0x490] sm:$0xff]  ;;  %v3073_v15 = vld [vmem:[%s8209_s3 + $0x660] sm:$0xff]  ;;  %p4979_p3 = pnand %p4978_p2, %p4972_p13 }
  0x49   : > { %v5482_v34 = vpack.c.bf16 %v3019_v28, %v3015_v27  ;;  %v3058_v27 = vld [vmem:[%s8209_s3 + $0x5e8] sm:$0xff]  ;;  %v3056_v28 = vld [vmem:[%s8209_s3 + $0x5d8] sm:$0xff] }
  0x4b   : > { %3845 = vmatpush1.bf16.msra.mxu0 %v5238_v32  ;;  %3879 = vmatpush1.bf16.msra.mxu1 %v5238_v32  ;;  %v3028_v32 = vld [vmem:[%s8209_s3 + $0x4f8] sm:$0xff] }
  0x4c   : > { %3847 = vmatprep.subr.bf16.mxu0 %v5242_v33  ;;  %3881 = vmatprep.subr.bf16.mxu1 %v5242_v33  ;;  %v5480_v33 = vpack.c.bf16 %v3017_v24, %v3013_v23  ;;  %v3054_v24 = vld [vmem:[%s8209_s3 + $0x5c8] sm:$0xff] }
  0x4d   : > { %v5628_v29 = vpack.c.bf16 %v3058_v27, %v3054_v24  ;;  %v3082_v24 = vld [vmem:[%s8209_s3 + $0x6a8] sm:$0xff]  ;;  %v3080_v27 = vld [vmem:[%s8209_s3 + $0x698] sm:$0xff] }
  0x4f   : > { %3849 = vmatpush1.bf16.msra.mxu0 %v5259_v38  ;;  %3883 = vmatpush1.bf16.msra.mxu1 %v5259_v38  ;;  %v5494_v38 = vpack.c.bf16 %v3028_v32, %v3024_v31  ;;  %v3053_v31 = vld [vmem:[%s8209_s3 + $0x5c0] sm:$0xff] }
  0x50   : > { %3851 = vmatprep.subr.bf16.mxu0 %v5263_v39  ;;  %3885 = vmatprep.subr.bf16.mxu1 %v5263_v39  ;;  %v3023_v39 = vld [vmem:[%s8209_s3 + $0x4d0] sm:$0xff]  ;;  %v3057_v32 = vld [vmem:[%s8209_s3 + $0x5e0] sm:$0xff] }
  0x51   : > { %v5518_v46 = vpack.c.bf16 %v3027_v40, %v3023_v39  ;;  %v3055_v39 = vld [vmem:[%s8209_s3 + $0x5d0] sm:$0xff] }
  0x52   : > { %v3059_v40 = vld [vmem:[%s8209_s3 + $0x5f0] sm:$0xff] }
  0x53   : > { %3853 = vmatpush1.bf16.msra.mxu0 %v3784_v44  ;;  %3887 = vmatpush1.bf16.msra.mxu1 %v3784_v44  ;;  %v3036_v44 = vld [vmem:[%s8209_s3 + $0x538] sm:$0xff] }
  0x54   : > { %3856 = vmatprep.subr.msk.bf16.mxu0 %vm5289_vm2, %v3786_v45  ;;  %3890 = vmatprep.subr.msk.bf16.mxu1 %vm5289_vm2, %v3786_v45  ;;  %v5516_v45 = vpack.c.bf16 %v3025_v36, %v3021_v35  ;;  %v5530_v50 = vpack.c.bf16 %v3036_v44, %v3032_v43  ;;  %v5640_v35 = vpack.c.bf16 %v3060_v30, %v3056_v28  ;;  %v3066_v43 = vld [vmem:[%s8209_s3 + $0x628] sm:$0xff]  ;;  %v3064_v44 = vld [vmem:[%s8209_s3 + $0x618] sm:$0xff] }
  0x55   : > { %v5642_v36 = vpack.c.bf16 %v3057_v32, %v3053_v31  ;;  %v5668_v51 = vpack.c.bf16 %v3068_v47, %v3064_v44  ;;  %v5728_v28 = vpack.c.bf16 %v3073_v15, %v3069_v10  ;;  %v3084_v30 = vld [vmem:[%s8209_s3 + $0x6b8] sm:$0xff]  ;;  %v3083_v44 = vld [vmem:[%s8209_s3 + $0x6b0] sm:$0xff]  ;;  %v3086_v47 = vld [vmem:[%s8209_s3 + $0x6c8] sm:$0xff] }
  0x56   : > { %v3087_v10 = vld [vmem:[%s8209_s3 + $0x6d0] sm:$0xff] }
  0x57   : > { %3859 = vmatpush1.bf16.msk.msra.mxu0 %vm5289_vm2, %v5293_v49  ;;  %3893 = vmatpush1.bf16.msk.msra.mxu1 %vm5289_vm2, %v5293_v49  ;;  %v5528_v49 = vpack.c.bf16 %v3034_v42, %v3030_v41  ;;  %v3062_v41 = vld [vmem:[%s8209_s3 + $0x608] sm:$0xff]  ;;  %v5654_v42 = vpack.c.bf16 %v3059_v40, %v3055_v39  ;;  %8367 = vst [vmem:[#allocation5_spill] sm:$0xff] %v5728_v28  ;;  %v3077_v39 = vld [vmem:[%s8209_s3 + $0x680] sm:$0xff] }
  0x58   : > { %3895 = vmatprep.subr.bf16.mxu0 %v5364_v58  ;;  %3959 = vmatprep.subr.bf16.mxu1 %v5366_v59  ;;  %v5666_v48 = vpack.c.bf16 %v3066_v43, %v3062_v41  ;;  %v3081_v40 = vld [vmem:[%s8209_s3 + $0x6a0] sm:$0xff]  ;;  %v3079_v41 = vld [vmem:[%s8209_s3 + $0x690] sm:$0xff]  ;;  %v5749_v43 = vpack.c.bf16 %v3084_v30, %v3080_v27  ;;  %v3100_v27 = vld [vmem:[%s8209_s3 + $0x738] sm:$0xff] }
  0x5a   : > { %2989 = vmatmul.mubr.msk.f32.vlgmr.msra.gmra.mrb[4].mxu0 %vm364_vm3, %v2985_v4  ;;  %2995 = vmatmul.mubr.msk.f32.vlgmr.msra.gmra.mrb[4].mxu1 %vm364_vm3, %v2991_v5  ;;  %v5578_v4 = vpack.c.bf16 %v3043_v2, %v3039_v1  ;;  %v3046_v5 = vld [vmem:[%s8209_s3 + $0x588] sm:$0xff]  ;;  %v5693_v1 = vpack.c.bf16 %v3067_v56, %v3063_v54  ;;  %v5695_v2 = vpack.c.bf16 %v3074_v0, %v3070_v61  ;;  %v3092_v54 = vld [vmem:[%s8209_s3 + $0x6f8] sm:$0xff] }
  0x5b   : > { %624 = vmatprep.mubr.f32.mxu0 %v8216_v7  ;;  %714 = vmatprep.mubr.f32.mxu1 %v8216_v7  ;;  %v5593_v13 = vpack.c.bf16 %v3050_v9, %v3046_v5  ;;  %v3072_v5 = vld [vmem:[%s8209_s3 + $0x658] sm:$0xff]  ;;  %8370 = vst [vmem:[#allocation8_spill] sm:$0xff] %v5749_v43  ;;  %v5767_v56 = vpack.c.bf16 %v3081_v40, %v3077_v39 }
  0x5c   : > { %3897 = vmatpush1.bf16.msra.mxu0 %v5402_v6  ;;  %3961 = vmatpush1.bf16.msra.mxu1 %v5404_v8  ;;  %v3076_v9 = vld [vmem:[%s8209_s3 + $0x678] sm:$0xff]  ;;  %v5771_v61 = vpack.c.bf16 %v3083_v44, %v3079_v41  ;;  %v5773_v0 = vpack.c.bf16 %v3090_v52, %v3086_v47  ;;  %v5785_v15 = vpack.c.bf16 %v3092_v54, %v3088_v53  ;;  %v3093_v41 = vld [vmem:[%s8209_s3 + $0x700] sm:$0xff]  ;;  %v3095_v47 = vld [vmem:[%s8209_s3 + $0x710] sm:$0xff] }
  0x5d   : > { %3899 = vmatprep.subr.bf16.mxu0 %v5412_v11  ;;  %3963 = vmatprep.subr.bf16.mxu1 %v5414_v12  ;;  %v5707_v14 = vpack.c.bf16 %v3076_v9, %v3072_v5  ;;  %8371 = vst [vmem:[#allocation9_spill] sm:$0xff] %v5767_v56  ;;  %v3085_v5 = vld [vmem:[%s8209_s3 + $0x6c0] sm:$0xff]  ;;  %v3099_v53 = vld [vmem:[%s8209_s3 + $0x730] sm:$0xff]  ;;  %v3102_v54 = vld [vmem:[%s8209_s3 + $0x748] sm:$0xff] }
  0x5e   : > { %2990 = vmatmul.mubr.msk.f32.gmra.mrb[6].mxu0 %vm364_vm3, %v2986_v19  ;;  %2996 = vmatmul.mubr.msk.f32.gmra.mrb[6].mxu1 %vm364_vm3, %v2992_v20  ;;  %v3047_v19 = vld [vmem:[%s8209_s3 + $0x590] sm:$0xff]  ;;  %8372 = vst [vmem:[#allocation10_spill] sm:$0xff] %v5771_v61  ;;  %8373 = vst [vmem:[#allocation11_spill] sm:$0xff] %v5773_v0  ;;  %v3089_v9 = vld [vmem:[%s8209_s3 + $0x6e0] sm:$0xff] }
  0x5f   : > { %v3051_v20 = vld [vmem:[%s8209_s3 + $0x5b0] sm:$0xff]  ;;  %8374 = vst [vmem:[#allocation12_spill] sm:$0xff] %v5785_v15  ;;  %v5803_v30 = vpack.c.bf16 %v3089_v9, %v3085_v5  ;;  %v3097_v44 = vld [vmem:[%s8209_s3 + $0x720] sm:$0xff]  ;;  %v3106_v5 = vld [vmem:[%s8209_s3 + $0x768] sm:$0xff] }
  0x60   : > { %3901 = vmatpush1.bf16.msra.mxu0 %v5442_v21  ;;  %3965 = vmatpush1.bf16.msra.mxu1 %v5444_v22  ;;  %v5615_v23 = vpack.c.bf16 %v3051_v20, %v3047_v19  ;;  %v3075_v19 = vld [vmem:[%s8209_s3 + $0x670] sm:$0xff]  ;;  %v3078_v20 = vld [vmem:[%s8209_s3 + $0x688] sm:$0xff]  ;;  %v3104_v9 = vld [vmem:[%s8209_s3 + $0x758] sm:$0xff] }
  0x61   : > { %3903 = vmatprep.subr.bf16.mxu0 %v5454_v25  ;;  %3967 = vmatprep.subr.bf16.mxu1 %v5456_v26  ;;  %v5735_v31 = vpack.c.bf16 %v3075_v19, %v3071_v16  ;;  %v5737_v32 = vpack.c.bf16 %v3082_v24, %v3078_v20  ;;  %v3091_v16 = vld [vmem:[%s8209_s3 + $0x6f0] sm:$0xff]  ;;  %v3094_v19 = vld [vmem:[%s8209_s3 + $0x708] sm:$0xff]  ;;  %v3096_v24 = vld [vmem:[%s8209_s3 + $0x718] sm:$0xff]  ;;  %8375 = vst [vmem:[#allocation13_spill] sm:$0xff] %v5803_v30 }
  0x62   : > { %v3098_v20 = vld [vmem:[%s8209_s3 + $0x728] sm:$0xff]  ;;  %v5807_v39 = vpack.c.bf16 %v3091_v16, %v3087_v10  ;;  %v5821_v52 = vpack.c.bf16 %v3100_v27, %v3096_v24  ;;  %v3108_v10 = vld [vmem:[%s8209_s3 + $0x778] sm:$0xff]  ;;  %v5839_v16 = vpack.c.bf16 %v3097_v44, %v3093_v41  ;;  %v3101_v24 = vld [vmem:[%s8209_s3 + $0x740] sm:$0xff] }
  0x63   : > { %8368 = vst [vmem:[#allocation6_spill] sm:$0xff] %v5735_v31  ;;  %8369 = vst [vmem:[#allocation7_spill] sm:$0xff] %v5737_v32  ;;  %v5809_v40 = vpack.c.bf16 %v3098_v20, %v3094_v19  ;;  %v5843_v19 = vpack.c.bf16 %v3099_v53, %v3095_v47  ;;  %v5845_v20 = vpack.c.bf16 %v3106_v5, %v3102_v54  ;;  %v3105_v27 = vld [vmem:[%s8209_s3 + $0x760] sm:$0xff]  ;;  %v3103_v44 = vld [vmem:[%s8209_s3 + $0x750] sm:$0xff] }
  0x64   : > { %3905 = vmatpush1.bf16.msra.mxu0 %v5480_v33  ;;  %3969 = vmatpush1.bf16.msra.mxu1 %v5482_v34  ;;  %8376 = vst [vmem:[#allocation14_spill] sm:$0xff] %v5807_v39  ;;  %8378 = vst [vmem:[#allocation16_spill] sm:$0xff] %v5821_v52  ;;  %v5854_v41 = vpack.c.bf16 %v3108_v10, %v3104_v9  ;;  %v3107_v47 = vld [vmem:[%s8209_s3 + $0x770] sm:$0xff]  ;;  %v5863_v53 = vpack.c.bf16 %v3105_v27, %v3101_v24  ;;  %v3110_v5 = vld [vmem:[%s8209_s3 + $0x788] sm:$0xff] }
  0x65   : > { %3907 = vmatprep.subr.bf16.mxu0 %v5492_v37  ;;  %3971 = vmatprep.subr.bf16.mxu1 %v5494_v38  ;;  %8377 = vst [vmem:[#allocation15_spill] sm:$0xff] %v5809_v40  ;;  %8379 = vst [vmem:[#allocation17_spill] sm:$0xff] %v5839_v16  ;;  %v5867_v54 = vpack.c.bf16 %v3107_v47, %v3103_v44  ;;  %v3114_v9 = vld [vmem:[%s8209_s3 + $0x7a8] sm:$0xff]  ;;  %v3112_v10 = vld [vmem:[%s8209_s3 + $0x798] sm:$0xff] }
  0x66   : > { %8380 = vst [vmem:[#allocation18_spill] sm:$0xff] %v5843_v19  ;;  %8381 = vst [vmem:[#allocation19_spill] sm:$0xff] %v5845_v20  ;;  %v5881_v24 = vpack.c.bf16 %v3114_v9, %v3110_v5  ;;  %v3116_v27 = vld [vmem:[%s8209_s3 + $0x7b8] sm:$0xff]  ;;  %v3109_v44 = vld [vmem:[%s8209_s3 + $0x780] sm:$0xff] }
  0x67   : > { %8382 = vst [vmem:[#allocation20_spill] sm:$0xff] %v5854_v41  ;;  %8383 = vst [vmem:[#allocation21_spill] sm:$0xff] %v5863_v53  ;;  %v3113_v47 = vld [vmem:[%s8209_s3 + $0x7a0] sm:$0xff]  ;;  %v5892_v7 = vpack.c.bf16 %v3116_v27, %v3112_v10  ;;  %v3111_v5 = vld [vmem:[%s8209_s3 + $0x790] sm:$0xff] }
  0x68   : > { %3909 = vmatpush1.bf16.msra.mxu0 %v5516_v45  ;;  %3973 = vmatpush1.bf16.msra.mxu1 %v5518_v46  ;;  %8384 = vst [vmem:[#allocation22_spill] sm:$0xff] %v5867_v54  ;;  %8385 = vst [vmem:[#allocation23_spill] sm:$0xff] %v5881_v24  ;;  %v3115_v9 = vld [vmem:[%s8209_s3 + $0x7b0] sm:$0xff]  ;;  %v3118_v10 = vld [vmem:[%s8209_s3 + $0x7c8] sm:$0xff] }
  0x69   : > { %3911 = vmatprep.subr.bf16.mxu0 %v5528_v49  ;;  %3975 = vmatprep.subr.bf16.mxu1 %v5530_v50  ;;  %8386 = vst [vmem:[#allocation24_spill] sm:$0xff] %v5892_v7  ;;  %v3122_v27 = vld [vmem:[%s8209_s3 + $0x7e8] sm:$0xff] }
  0x6c   : > { %3913 = vmatpush1.bf16.msra.mxu0 %v5552_v57  ;;  %3977 = vmatpush1.bf16.msra.mxu1 %v5554_v60 }
  0x6d   : > { %3915 = vmatprep.subr.bf16.mxu0 %v5561_v62  ;;  %3979 = vmatprep.subr.bf16.mxu1 %v5563_v63 }
  0x70   : > { %3917 = vmatpush1.bf16.msra.mxu0 %v5576_v3  ;;  %3981 = vmatpush1.bf16.msra.mxu1 %v5578_v4 }
  0x71   : > { %3919 = vmatprep.subr.bf16.mxu0 %v5593_v13  ;;  %3983 = vmatprep.subr.bf16.mxu1 %v5604_v17 }
  0x74   : > { %3921 = vmatpush1.bf16.msra.mxu0 %v5606_v18  ;;  %3985 = vmatpush1.bf16.msra.mxu1 %v5615_v23 }
  0x75   : > { %3923 = vmatprep.subr.bf16.mxu0 %v5628_v29  ;;  %3987 = vmatprep.subr.bf16.mxu1 %v5640_v35 }
  0x78   : > { %3925 = vmatpush1.bf16.msra.mxu0 %v5642_v36  ;;  %3989 = vmatpush1.bf16.msra.mxu1 %v5654_v42 }
  0x79   : > { %3927 = vmatprep.subr.bf16.mxu0 %v5666_v48  ;;  %3991 = vmatprep.subr.bf16.mxu1 %v5668_v51 }
  0x7c   : > { %3929 = vmatpush1.bf16.msra.mxu0 %v5680_v55  ;;  %3993 = vmatpush1.bf16.msra.mxu1 %v5693_v1 }
  0x7d   : > { %3931 = vmatprep.subr.bf16.mxu0 %v5695_v2  ;;  %3995 = vmatprep.subr.bf16.mxu1 %v5707_v14 }
  0x80   : > { %3933 = vmatpush1.bf16.msra.mxu0 %v5728_v28  ;;  %3997 = vmatpush1.bf16.msra.mxu1 %v5735_v31  ;;  %v798_v28 = vld [vmem:[%s8209_s3 + $0xf8] sm:$0xff] }
  0x81   : > { %3935 = vmatprep.subr.bf16.mxu0 %v5737_v32  ;;  %3999 = vmatprep.subr.bf16.mxu1 %v5749_v43 }
  0x84   : > { %3937 = vmatpush1.bf16.msra.mxu0 %v5767_v56  ;;  %4001 = vmatpush1.bf16.msra.mxu1 %v5771_v61  ;;  %v767_v61 = vld [vmem:[%s8209_s3] sm:$0xff] }
  0x85   : > { %3939 = vmatprep.subr.bf16.mxu0 %v5773_v0  ;;  %4003 = vmatprep.subr.bf16.mxu1 %v5785_v15 }
  0x88   : > { %3941 = vmatpush1.bf16.msra.mxu0 %v5803_v30  ;;  %4005 = vmatpush1.bf16.msra.mxu1 %v5807_v39  ;;  %v727_v39 = vlaneseq }
  0x89   : > { %3943 = vmatprep.subr.bf16.mxu0 %v5809_v40  ;;  %4007 = vmatprep.subr.bf16.mxu1 %v5821_v52 }
  0x8a   : > { %v5962_v30 = vshrl.u32 %v727_v39, 7 }
  0x8c   : > { %3945 = vmatpush1.bf16.msra.mxu0 %v5839_v16  ;;  %4009 = vmatpush1.bf16.msra.mxu1 %v5843_v19  ;;  %8395 = vst [vmem:[#allocation33_spill] sm:$0xff] %v5962_v30 }
  0x8d   : > { %3947 = vmatprep.subr.bf16.mxu0 %v5845_v20  ;;  %4011 = vmatprep.subr.bf16.mxu1 %v5854_v41 }
  0x90   : > { %3949 = vmatpush1.bf16.msra.mxu0 %v5863_v53  ;;  %4013 = vmatpush1.bf16.msra.mxu1 %v5867_v54  ;;  %v5894_v53 = vpack.c.bf16 %v3113_v47, %v3109_v44  ;;  %v5903_v54 = vpack.c.bf16 %v3115_v9, %v3111_v5  ;;  %v3120_v44 = vld [vmem:[%s8209_s3 + $0x7d8] sm:$0xff]  ;;  %v5917_v47 = vpack.c.bf16 %v3122_v27, %v3118_v10  ;;  %v3117_v9 = vld [vmem:[%s8209_s3 + $0x7c0] sm:$0xff]  ;;  %v3119_v10 = vld [vmem:[%s8209_s3 + $0x7d0] sm:$0xff] }
  0x91   : > { %3951 = vmatprep.subr.bf16.mxu0 %v5881_v24  ;;  %4015 = vmatprep.subr.bf16.mxu1 %v5892_v7  ;;  %v3124_v5 = vld [vmem:[%s8209_s3 + $0x7f8] sm:$0xff]  ;;  %v3123_v27 = vld [vmem:[%s8209_s3 + $0x7f0] sm:$0xff] }
  0x92   : > { %8387 = vst [vmem:[#allocation25_spill] sm:$0xff] %v5894_v53  ;;  %8388 = vst [vmem:[#allocation26_spill] sm:$0xff] %v5903_v54  ;;  %v5928_v7 = vpack.c.bf16 %v3124_v5, %v3120_v44  ;;  %v772_v44 = vld [vmem:[%s8209_s3 + $0x28] sm:$0xff]  ;;  %v770_v5 = vld [vmem:[%s8209_s3 + $0x18] sm:$0xff] }
  0x93   : > { %8389 = vst [vmem:[#allocation27_spill] sm:$0xff] %v5917_v47 }
  0x94   : > { %3953 = vmatpush1.bf16.msra.mxu0 %v5894_v53  ;;  %4017 = vmatpush1.bf16.msra.mxu1 %v5903_v54  ;;  %v3121_v53 = vld [vmem:[%s8209_s3 + $0x7e0] sm:$0xff]  ;;  %8390 = vst [vmem:[#allocation28_spill] sm:$0xff] %v5928_v7  ;;  %v5939_v54 = vpack.c.bf16 %v3123_v27, %v3119_v10  ;;  %v774_v10 = vld [vmem:[%s8209_s3 + $0x38] sm:$0xff] }
  0x95   : > { %v5930_v24 = vpack.c.bf16 %v3121_v53, %v3117_v9  ;;  %3955 = vmatprep.subr.bf16.mxu0 %v5917_v47  ;;  %4019 = vmatprep.subr.bf16.mxu1 %v5928_v7  ;;  %v768_v53 = vld [vmem:[%s8209_s3 + $0x8] sm:$0xff]  ;;  %v5958_v27 = vpack.c.bf16 %v774_v10, %v770_v5  ;;  %v8240_v5 = vsub.s32 0, %v5962_v30  ;;  %v725_v10 = vld [vmem:[%s8208_s2] sm:$0x3] }
  0x96   : > { %8392 = vst [vmem:[#allocation30_spill] sm:$0xff] %v5939_v54  ;;  %v5953_v9 = vpack.c.bf16 %v772_v44, %v768_v53 }
  0x97   : > { %8391 = vst [vmem:[#allocation29_spill] sm:$0xff] %v5930_v24  ;;  %8394 = vst [vmem:[#allocation32_spill] sm:$0xff] %v5958_v27 }
  0x98   : > { %3957 = vmatpush1.bf16.msra.mxu0 %v5930_v24  ;;  %4021 = vmatpush1.bf16.msra.mxu1 %v5939_v54  ;;  %8393 = vst [vmem:[#allocation31_spill] sm:$0xff] %v5953_v9 }
  0x99   : > { %4023 = vmatprep.subr.bf16.mxu0 %v5953_v9  ;;  %4087 = vmatprep.subr.bf16.mxu1 %v5958_v27 }
 0x10d   : > { %v444_v24 = vpop.f32.mrb[0].mxu0  ;;  %v530_v7 = vpop.f32.mrb[0].mxu1 }
 0x10e   : > { %v541_v47 = vmax.f32 %v444_v24, %v530_v7  ;;  %v446_v41 = vpop.f32.mrb[1].mxu0  ;;  %v532_v20 = vpop.f32.mrb[1].mxu1  ;;  %v8241_v7 = vsub.s32 1, %v5962_v30 }
 0x10f   : > { %v542_v19 = vmax.f32 %v446_v41, %v532_v20 }
 0x110   : > { %v734_v39 = vrot.slane %v725_v10, %v8241_v7 }
 0x111   : > { %v450_v16 = vpop.f32.mrb[2].mxu0  ;;  %v536_v54 = vpop.f32.mrb[2].mxu1 }
 0x112   : > { %v543_v53 = vmax.f32 %v450_v16, %v536_v54  ;;  %v452_v44 = vpop.f32.mrb[3].mxu0  ;;  %v538_v52 = vpop.f32.mrb[3].mxu1  ;;  %v5971_v16 = vrot.slane %v725_v10, %v8240_v5  ;;  %v773_v10 = vld [vmem:[%s8209_s3 + $0x30] sm:$0xff] }
 0x113   : > { %v544_v40 = vmax.f32 %v452_v44, %v538_v52 }
 0x12d   : > { %v620_v24 = vpop.f32.mrb[4].mxu0  ;;  %v710_v27 = vpop.f32.mrb[4].mxu1 }
 0x12e   : > { %v631_v20 = vmax.f32 %v541_v47, %v620_v24  ;;  %v622_v41 = vpop.f32.mrb[5].mxu0  ;;  %v712_v52 = vpop.f32.mrb[5].mxu1  ;;  %v771_v47 = vld [vmem:[%s8209_s3 + $0x20] sm:$0xff] }
 0x12f   : > { %v632_v54 = vmax.f32 %v542_v19, %v622_v41 }
 0x130   : > { %v721_v44 = vmax.f32 %v631_v20, %v710_v27  ;;  %v769_v27 = vld [vmem:[%s8209_s3 + $0x10] sm:$0xff]  ;;  %v776_v20 = vld [vmem:[%s8209_s3 + $0x48] sm:$0xff] }
 0x131   : > { %v722_v9 = vmax.f32 %v632_v54, %v712_v52  ;;  %v626_v15 = vpop.f32.mrb[6].mxu0  ;;  %v5975_v0 = vpop.f32.mrb[6].mxu1 }
 0x132   : > { %v737_v24 = vadd.f32 %v5971_v16, %v721_v44  ;;  %v5984_v5 = vmax.f32 %v543_v53, %v626_v15  ;;  %v628_v19 = vpop.f32.mrb[7].mxu0  ;;  %v718_v41 = vpop.f32.mrb[7].mxu1  ;;  %v780_v15 = vld [vmem:[%s8209_s3 + $0x68] sm:$0xff]  ;;  %v778_v53 = vld [vmem:[%s8209_s3 + $0x58] sm:$0xff] }
 0x133   : > { %v738_v52 = vadd.f32 %v734_v39, %v722_v9  ;;  %v634_v54 = vmax.f32 %v544_v40, %v628_v19  ;;  %v782_v44 = vld [vmem:[%s8209_s3 + $0x78] sm:$0xff]  ;;  %v6008_v9 = vpack.c.bf16 %v771_v47, %v767_v61  ;;  %v6010_v40 = vpack.c.bf16 %v773_v10, %v769_v27  ;;  %v775_v19 = vld [vmem:[%s8209_s3 + $0x40] sm:$0xff]  ;;  %v777_v61 = vld [vmem:[%s8209_s3 + $0x50] sm:$0xff] }
 0x134   : > { %v6015_v43 = vmax.f32 %v737_v24, 0.0  ;;  %v6017_v32 = vpack.c.bf16 %v780_v15, %v776_v20  ;;  %v6019_v31 = vpack.c.bf16 %v782_v44, %v778_v53  ;;  %v781_v47 = vld [vmem:[%s8209_s3 + $0x70] sm:$0xff]  ;;  %v784_v24 = vld [vmem:[%s8209_s3 + $0x88] sm:$0xff]  ;;  %v783_v53 = vld [vmem:[%s8209_s3 + $0x80] sm:$0xff] }
 0x135   : > { %v6006_v30 = vmax.f32 %v738_v52, 0.0  ;;  %v724_v56 = vmax.f32 %v634_v54, %v718_v41  ;;  %8396 = vst [vmem:[#allocation34_spill] sm:$0xff] %v6008_v9  ;;  %8397 = vst [vmem:[#allocation35_spill] sm:$0xff] %v6010_v40  ;;  %v779_v52 = vld [vmem:[%s8209_s3 + $0x60] sm:$0xff]  ;;  %v788_v27 = vld [vmem:[%s8209_s3 + $0xa8] sm:$0xff]  ;;  %v6053_v54 = vpack.c.bf16 %v781_v47, %v777_v61 }
 0x136   : > { %8398 = vst [vmem:[#allocation36_spill] sm:$0xff] %v6017_v32  ;;  %8399 = vst [vmem:[#allocation37_spill] sm:$0xff] %v6019_v31  ;;  %v6051_v20 = vpack.c.bf16 %v779_v52, %v775_v19  ;;  %v787_v44 = vld [vmem:[%s8209_s3 + $0xa0] sm:$0xff]  ;;  %v785_v19 = vld [vmem:[%s8209_s3 + $0x90] sm:$0xff] }
 0x137   : > { %v6030_v41 = vadd.f32 %v734_v39, %v724_v56  ;;  %1088 = vmatprep.mubr.f32.mxu0 %v6006_v30  ;;  %1159 = vmatprep.mubr.f32.mxu1 %v6006_v30  ;;  %v786_v56 = vld [vmem:[%s8209_s3 + $0x98] sm:$0xff]  ;;  %8400 = vst [vmem:[#allocation38_spill] sm:$0xff] %v6053_v54  ;;  %v789_v52 = vld [vmem:[%s8209_s3 + $0xb0] sm:$0xff]  ;;  %v792_v61 = vld [vmem:[%s8209_s3 + $0xc8] sm:$0xff]  ;;  %v753_v7 = vrot.slane %v6006_v30, 6 }
 0x138   : > { %1089 = vmatmul.mubr.f32.vlgmr.msra.gmra.mrb[8].mxu0 %v6015_v43  ;;  %1160 = vmatmul.mubr.f32.vlgmr.msra.gmra.mrb[8].mxu1 %v6015_v43  ;;  %v790_v39 = vld [vmem:[%s8209_s3 + $0xb8] sm:$0xff] }
 0x139   : > { %v8253_v10 = vmax.f32 %v6030_v41, 0.0  ;;  %4025 = vmatpush1.bf16.msra.mxu0 %v6008_v9  ;;  %4089 = vmatpush1.bf16.msra.mxu1 %v6010_v40  ;;  %v796_v40 = vld [vmem:[%s8209_s3 + $0xe8] sm:$0xff]  ;;  %v794_v9 = vld [vmem:[%s8209_s3 + $0xd8] sm:$0xff] }
 0x13a   : > { %4027 = vmatprep.subr.bf16.mxu0 %v6017_v32  ;;  %4091 = vmatprep.subr.bf16.mxu1 %v6019_v31  ;;  %v6080_v32 = vpack.c.bf16 %v788_v27, %v784_v24  ;;  %v6082_v31 = vpack.c.bf16 %v790_v39, %v786_v56  ;;  %v6096_v27 = vpack.c.bf16 %v787_v44, %v783_v53  ;;  %v791_v39 = vld [vmem:[%s8209_s3 + $0xc0] sm:$0xff]  ;;  %v793_v53 = vld [vmem:[%s8209_s3 + $0xd0] sm:$0xff] }
 0x13b   : > { %v754_v47 = vrot.slane %v8253_v10, 6  ;;  %v6098_v56 = vpack.c.bf16 %v789_v52, %v785_v19  ;;  %v795_v10 = vld [vmem:[%s8209_s3 + $0xe0] sm:$0xff]  ;;  %v797_v44 = vld [vmem:[%s8209_s3 + $0xf0] sm:$0xff]  ;;  %v800_v19 = vld [vmem:[%s8209_s3 + $0x108] sm:$0xff] }
 0x13c   : > { %8403 = vst [vmem:[#allocation39_spill] sm:$0xff] %v6082_v31  ;;  %8404 = vst [vmem:[#allocation40_spill] sm:$0xff] %v6096_v27  ;;  %v6136_v52 = vpack.c.bf16 %v795_v10, %v791_v39  ;;  %v801_v10 = vld [vmem:[%s8209_s3 + $0x110] sm:$0xff] }
 0x13d   : > { %4029 = vmatpush1.bf16.msra.mxu0 %v6051_v20  ;;  %4093 = vmatpush1.bf16.msra.mxu1 %v6053_v54  ;;  %v755_v24 = vsel %vm749_vm6, %v753_v7, %v754_v47  ;;  %8405 = vst [vmem:[#allocation41_spill] sm:$0xff] %v6098_v56  ;;  %v6110_v54 = vpack.c.bf16 %v796_v40, %v792_v61  ;;  %v806_v40 = vld [vmem:[%s8209_s3 + $0x138] sm:$0xff]  ;;  %v799_v47 = vld [vmem:[%s8209_s3 + $0x100] sm:$0xff]  ;;  %v805_v39 = vld [vmem:[%s8209_s3 + $0x130] sm:$0xff] }
 0x13e   : > { %3126 = vmatprep.mubr.msk.f32.mxu0 %vm6056_vm5, %v755_v24  ;;  %3130 = vmatprep.mubr.msk.f32.mxu1 %vm6056_vm5, %v755_v24  ;;  %v6112_v7 = vpack.c.bf16 %v798_v28, %v794_v9  ;;  %v804_v28 = vld [vmem:[%s8209_s3 + $0x128] sm:$0xff]  ;;  %v802_v9 = vld [vmem:[%s8209_s3 + $0x118] sm:$0xff]  ;;  %8408 = vst [vmem:[#allocation44_spill] sm:$0xff] %v6136_v52  ;;  %v6138_v61 = vpack.c.bf16 %v797_v44, %v793_v53  ;;  %v803_v24 = vld [vmem:[%s8209_s3 + $0x120] sm:$0xff] }
 0x13f   : > { %8406 = vst [vmem:[#allocation42_spill] sm:$0xff] %v6110_v54  ;;  %4031 = vmatprep.subr.bf16.mxu0 %v6080_v32  ;;  %4095 = vmatprep.subr.bf16.mxu1 %v6082_v31  ;;  %v6148_v31 = vpack.c.bf16 %v804_v28, %v800_v19  ;;  %v808_v53 = vld [vmem:[%s8209_s3 + $0x148] sm:$0xff]  ;;  %v810_v19 = vld [vmem:[%s8209_s3 + $0x158] sm:$0xff] }
 0x140   : > { %8407 = vst [vmem:[#allocation43_spill] sm:$0xff] %v6112_v7  ;;  %8409 = vst [vmem:[#allocation45_spill] sm:$0xff] %v6138_v61  ;;  %v812_v44 = vld [vmem:[%s8209_s3 + $0x168] sm:$0xff]  ;;  %v814_v28 = vld [vmem:[%s8209_s3 + $0x178] sm:$0xff] }
 0x141   : > { %4033 = vmatpush1.bf16.msra.mxu0 %v6096_v27  ;;  %4097 = vmatpush1.bf16.msra.mxu1 %v6098_v56  ;;  %8410 = vst [vmem:[#allocation46_spill] sm:$0xff] %v6148_v31  ;;  %v6150_v27 = vpack.c.bf16 %v806_v40, %v802_v9  ;;  %v6172_v9 = vpack.c.bf16 %v803_v24, %v799_v47  ;;  %v809_v47 = vld [vmem:[%s8209_s3 + $0x150] sm:$0xff] }
 0x142   : > { %4035 = vmatprep.subr.bf16.mxu0 %v6110_v54  ;;  %4099 = vmatprep.subr.bf16.mxu1 %v6112_v7  ;;  %v6174_v40 = vpack.c.bf16 %v805_v39, %v801_v10  ;;  %v807_v7 = vld [vmem:[%s8209_s3 + $0x140] sm:$0xff]  ;;  %v6184_v56 = vpack.c.bf16 %v812_v44, %v808_v53  ;;  %v813_v24 = vld [vmem:[%s8209_s3 + $0x170] sm:$0xff]  ;;  %v816_v10 = vld [vmem:[%s8209_s3 + $0x188] sm:$0xff] }
 0x143   : > { %8411 = vst [vmem:[#allocation47_spill] sm:$0xff] %v6150_v27  ;;  %8412 = vst [vmem:[#allocation48_spill] sm:$0xff] %v6172_v9  ;;  %v811_v54 = vld [vmem:[%s8209_s3 + $0x160] sm:$0xff]  ;;  %v820_v39 = vld [vmem:[%s8209_s3 + $0x1a8] sm:$0xff] }
 0x144   : > { %8413 = vst [vmem:[#allocation49_spill] sm:$0xff] %v6174_v40  ;;  %8414 = vst [vmem:[#allocation50_spill] sm:$0xff] %v6184_v56  ;;  %v818_v53 = vld [vmem:[%s8209_s3 + $0x198] sm:$0xff] }
 0x145   : > { %4037 = vmatpush1.bf16.msra.mxu0 %v6136_v52  ;;  %4101 = vmatpush1.bf16.msra.mxu1 %v6138_v61  ;;  %v6186_v52 = vpack.c.bf16 %v814_v28, %v810_v19  ;;  %v822_v44 = vld [vmem:[%s8209_s3 + $0x1b8] sm:$0xff]  ;;  %v6208_v19 = vpack.c.bf16 %v811_v54, %v807_v7  ;;  %v6210_v28 = vpack.c.bf16 %v813_v24, %v809_v47  ;;  %v817_v54 = vld [vmem:[%s8209_s3 + $0x190] sm:$0xff]  ;;  %v824_v47 = vld [vmem:[%s8209_s3 + $0x1c8] sm:$0xff] }
 0x146   : > { %4039 = vmatprep.subr.bf16.mxu0 %v6148_v31  ;;  %4103 = vmatprep.subr.bf16.mxu1 %v6150_v27  ;;  %v815_v27 = vld [vmem:[%s8209_s3 + $0x180] sm:$0xff]  ;;  %v6220_v61 = vpack.c.bf16 %v820_v39, %v816_v10  ;;  %v821_v7 = vld [vmem:[%s8209_s3 + $0x1b0] sm:$0xff]  ;;  %v828_v24 = vld [vmem:[%s8209_s3 + $0x1e8] sm:$0xff] }
 0x147   : > { %8415 = vst [vmem:[#allocation51_spill] sm:$0xff] %v6186_v52  ;;  %8416 = vst [vmem:[#allocation52_spill] sm:$0xff] %v6208_v19  ;;  %v819_v31 = vld [vmem:[%s8209_s3 + $0x1a0] sm:$0xff]  ;;  %v826_v10 = vld [vmem:[%s8209_s3 + $0x1d8] sm:$0xff] }
 0x148   : > { %8417 = vst [vmem:[#allocation53_spill] sm:$0xff] %v6210_v28  ;;  %8418 = vst [vmem:[#allocation54_spill] sm:$0xff] %v6220_v61  ;;  %v830_v39 = vld [vmem:[%s8209_s3 + $0x1f8] sm:$0xff] }
 0x149   : > { %4041 = vmatpush1.bf16.msra.mxu0 %v6172_v9  ;;  %4105 = vmatpush1.bf16.msra.mxu1 %v6174_v40  ;;  %v6222_v9 = vpack.c.bf16 %v822_v44, %v818_v53  ;;  %v6244_v53 = vpack.c.bf16 %v819_v31, %v815_v27  ;;  %v6246_v44 = vpack.c.bf16 %v821_v7, %v817_v54  ;;  %v825_v31 = vld [vmem:[%s8209_s3 + $0x1d0] sm:$0xff]  ;;  %v832_v54 = vld [vmem:[%s8209_s3 + $0x208] sm:$0xff] }
 0x14a   : > { %4043 = vmatprep.subr.bf16.mxu0 %v6184_v56  ;;  %4107 = vmatprep.subr.bf16.mxu1 %v6186_v52  ;;  %v823_v52 = vld [vmem:[%s8209_s3 + $0x1c0] sm:$0xff]  ;;  %v6256_v40 = vpack.c.bf16 %v828_v24, %v824_v47  ;;  %v829_v27 = vld [vmem:[%s8209_s3 + $0x1f0] sm:$0xff]  ;;  %v836_v7 = vld [vmem:[%s8209_s3 + $0x228] sm:$0xff] }
 0x14b   : > { %8419 = vst [vmem:[#allocation55_spill] sm:$0xff] %v6222_v9  ;;  %8420 = vst [vmem:[#allocation56_spill] sm:$0xff] %v6244_v53  ;;  %v827_v56 = vld [vmem:[%s8209_s3 + $0x1e0] sm:$0xff]  ;;  %v834_v47 = vld [vmem:[%s8209_s3 + $0x218] sm:$0xff] }
 0x14c   : > { %8421 = vst [vmem:[#allocation57_spill] sm:$0xff] %v6246_v44  ;;  %8422 = vst [vmem:[#allocation58_spill] sm:$0xff] %v6256_v40  ;;  %v838_v24 = vld [vmem:[%s8209_s3 + $0x238] sm:$0xff] }
 0x14d   : > { %4045 = vmatpush1.bf16.msra.mxu0 %v6208_v19  ;;  %4109 = vmatpush1.bf16.msra.mxu1 %v6210_v28  ;;  %v6258_v19 = vpack.c.bf16 %v830_v39, %v826_v10  ;;  %v6280_v10 = vpack.c.bf16 %v827_v56, %v823_v52  ;;  %v6282_v39 = vpack.c.bf16 %v829_v27, %v825_v31  ;;  %v833_v56 = vld [vmem:[%s8209_s3 + $0x210] sm:$0xff]  ;;  %v840_v31 = vld [vmem:[%s8209_s3 + $0x248] sm:$0xff] }
 0x14e   : > { %4047 = vmatprep.subr.bf16.mxu0 %v6220_v61  ;;  %4111 = vmatprep.subr.bf16.mxu1 %v6222_v9  ;;  %v831_v9 = vld [vmem:[%s8209_s3 + $0x200] sm:$0xff]  ;;  %v6292_v28 = vpack.c.bf16 %v836_v7, %v832_v54  ;;  %v837_v52 = vld [vmem:[%s8209_s3 + $0x230] sm:$0xff]  ;;  %v844_v27 = vld [vmem:[%s8209_s3 + $0x268] sm:$0xff] }
 0x14f   : > { %8423 = vst [vmem:[#allocation59_spill] sm:$0xff] %v6258_v19  ;;  %8424 = vst [vmem:[#allocation60_spill] sm:$0xff] %v6280_v10  ;;  %v835_v61 = vld [vmem:[%s8209_s3 + $0x220] sm:$0xff]  ;;  %v842_v54 = vld [vmem:[%s8209_s3 + $0x258] sm:$0xff] }
 0x150   : > { %8425 = vst [vmem:[#allocation61_spill] sm:$0xff] %v6282_v39  ;;  %8426 = vst [vmem:[#allocation62_spill] sm:$0xff] %v6292_v28  ;;  %v846_v7 = vld [vmem:[%s8209_s3 + $0x278] sm:$0xff] }
 0x151   : > { %4049 = vmatpush1.bf16.msra.mxu0 %v6244_v53  ;;  %4113 = vmatpush1.bf16.msra.mxu1 %v6246_v44  ;;  %v6294_v53 = vpack.c.bf16 %v838_v24, %v834_v47  ;;  %v6316_v47 = vpack.c.bf16 %v835_v61, %v831_v9  ;;  %v6318_v24 = vpack.c.bf16 %v837_v52, %v833_v56  ;;  %v841_v61 = vld [vmem:[%s8209_s3 + $0x250] sm:$0xff]  ;;  %v848_v56 = vld [vmem:[%s8209_s3 + $0x288] sm:$0xff] }
 0x152   : > { %4051 = vmatprep.subr.bf16.mxu0 %v6256_v40  ;;  %4115 = vmatprep.subr.bf16.mxu1 %v6258_v19  ;;  %v839_v19 = vld [vmem:[%s8209_s3 + $0x240] sm:$0xff]  ;;  %v6328_v44 = vpack.c.bf16 %v844_v27, %v840_v31  ;;  %v845_v9 = vld [vmem:[%s8209_s3 + $0x270] sm:$0xff]  ;;  %v852_v52 = vld [vmem:[%s8209_s3 + $0x2a8] sm:$0xff] }
 0x153   : > { %8427 = vst [vmem:[#allocation63_spill] sm:$0xff] %v6294_v53  ;;  %8428 = vst [vmem:[#allocation64_spill] sm:$0xff] %v6316_v47  ;;  %v843_v40 = vld [vmem:[%s8209_s3 + $0x260] sm:$0xff]  ;;  %v850_v31 = vld [vmem:[%s8209_s3 + $0x298] sm:$0xff] }
 0x154   : > { %8429 = vst [vmem:[#allocation65_spill] sm:$0xff] %v6318_v24  ;;  %8430 = vst [vmem:[#allocation66_spill] sm:$0xff] %v6328_v44  ;;  %v854_v27 = vld [vmem:[%s8209_s3 + $0x2b8] sm:$0xff] }
 0x155   : > { %4053 = vmatpush1.bf16.msra.mxu0 %v6280_v10  ;;  %4117 = vmatpush1.bf16.msra.mxu1 %v6282_v39  ;;  %v6330_v10 = vpack.c.bf16 %v846_v7, %v842_v54  ;;  %v6352_v54 = vpack.c.bf16 %v843_v40, %v839_v19  ;;  %v6354_v7 = vpack.c.bf16 %v845_v9, %v841_v61  ;;  %v849_v40 = vld [vmem:[%s8209_s3 + $0x290] sm:$0xff]  ;;  %v856_v61 = vld [vmem:[%s8209_s3 + $0x2c8] sm:$0xff] }
 0x156   : > { %4055 = vmatprep.subr.bf16.mxu0 %v6292_v28  ;;  %4119 = vmatprep.subr.bf16.mxu1 %v6294_v53  ;;  %v847_v53 = vld [vmem:[%s8209_s3 + $0x280] sm:$0xff]  ;;  %v6364_v39 = vpack.c.bf16 %v852_v52, %v848_v56  ;;  %v853_v19 = vld [vmem:[%s8209_s3 + $0x2b0] sm:$0xff]  ;;  %v860_v9 = vld [vmem:[%s8209_s3 + $0x2e8] sm:$0xff] }
 0x157   : > { %8431 = vst [vmem:[#allocation67_spill] sm:$0xff] %v6330_v10  ;;  %8432 = vst [vmem:[#allocation68_spill] sm:$0xff] %v6352_v54  ;;  %v851_v28 = vld [vmem:[%s8209_s3 + $0x2a0] sm:$0xff]  ;;  %v858_v56 = vld [vmem:[%s8209_s3 + $0x2d8] sm:$0xff] }
 0x158   : > { %8433 = vst [vmem:[#allocation69_spill] sm:$0xff] %v6354_v7  ;;  %8434 = vst [vmem:[#allocation70_spill] sm:$0xff] %v6364_v39  ;;  %v862_v52 = vld [vmem:[%s8209_s3 + $0x2f8] sm:$0xff] }
 0x159   : > { %4057 = vmatpush1.bf16.msra.mxu0 %v6316_v47  ;;  %4121 = vmatpush1.bf16.msra.mxu1 %v6318_v24  ;;  %v6366_v47 = vpack.c.bf16 %v854_v27, %v850_v31  ;;  %v6388_v31 = vpack.c.bf16 %v851_v28, %v847_v53  ;;  %v6390_v27 = vpack.c.bf16 %v853_v19, %v849_v40  ;;  %v857_v28 = vld [vmem:[%s8209_s3 + $0x2d0] sm:$0xff]  ;;  %v864_v40 = vld [vmem:[%s8209_s3 + $0x308] sm:$0xff] }
 0x15a   : > { %4059 = vmatprep.subr.bf16.mxu0 %v6328_v44  ;;  %4123 = vmatprep.subr.bf16.mxu1 %v6330_v10  ;;  %v855_v10 = vld [vmem:[%s8209_s3 + $0x2c0] sm:$0xff]  ;;  %v6400_v24 = vpack.c.bf16 %v860_v9, %v856_v61  ;;  %v861_v53 = vld [vmem:[%s8209_s3 + $0x2f0] sm:$0xff]  ;;  %v868_v19 = vld [vmem:[%s8209_s3 + $0x328] sm:$0xff] }
 0x15b   : > { %8435 = vst [vmem:[#allocation71_spill] sm:$0xff] %v6366_v47  ;;  %8436 = vst [vmem:[#allocation72_spill] sm:$0xff] %v6388_v31  ;;  %v859_v44 = vld [vmem:[%s8209_s3 + $0x2e0] sm:$0xff]  ;;  %v866_v61 = vld [vmem:[%s8209_s3 + $0x318] sm:$0xff] }
 0x15c   : > { %8437 = vst [vmem:[#allocation73_spill] sm:$0xff] %v6390_v27  ;;  %8438 = vst [vmem:[#allocation74_spill] sm:$0xff] %v6400_v24  ;;  %v870_v9 = vld [vmem:[%s8209_s3 + $0x338] sm:$0xff] }
 0x15d   : > { %4061 = vmatpush1.bf16.msra.mxu0 %v6352_v54  ;;  %4125 = vmatpush1.bf16.msra.mxu1 %v6354_v7  ;;  %v6402_v54 = vpack.c.bf16 %v862_v52, %v858_v56  ;;  %v6424_v56 = vpack.c.bf16 %v859_v44, %v855_v10  ;;  %v6426_v52 = vpack.c.bf16 %v861_v53, %v857_v28  ;;  %v865_v44 = vld [vmem:[%s8209_s3 + $0x310] sm:$0xff]  ;;  %v872_v28 = vld [vmem:[%s8209_s3 + $0x348] sm:$0xff] }
 0x15e   : > { %4063 = vmatprep.subr.bf16.mxu0 %v6364_v39  ;;  %4127 = vmatprep.subr.bf16.mxu1 %v6366_v47  ;;  %v863_v47 = vld [vmem:[%s8209_s3 + $0x300] sm:$0xff]  ;;  %v6436_v7 = vpack.c.bf16 %v868_v19, %v864_v40  ;;  %v869_v10 = vld [vmem:[%s8209_s3 + $0x330] sm:$0xff]  ;;  %v876_v53 = vld [vmem:[%s8209_s3 + $0x368] sm:$0xff] }
 0x15f   : > { %8439 = vst [vmem:[#allocation75_spill] sm:$0xff] %v6402_v54  ;;  %8440 = vst [vmem:[#allocation76_spill] sm:$0xff] %v6424_v56  ;;  %v867_v39 = vld [vmem:[%s8209_s3 + $0x320] sm:$0xff]  ;;  %v874_v40 = vld [vmem:[%s8209_s3 + $0x358] sm:$0xff] }
 0x160   : > { %8441 = vst [vmem:[#allocation77_spill] sm:$0xff] %v6426_v52  ;;  %8442 = vst [vmem:[#allocation78_spill] sm:$0xff] %v6436_v7  ;;  %v878_v19 = vld [vmem:[%s8209_s3 + $0x378] sm:$0xff] }
 0x161   : > { %4065 = vmatpush1.bf16.msra.mxu0 %v6388_v31  ;;  %4129 = vmatpush1.bf16.msra.mxu1 %v6390_v27  ;;  %v6438_v31 = vpack.c.bf16 %v870_v9, %v866_v61  ;;  %v6460_v61 = vpack.c.bf16 %v867_v39, %v863_v47  ;;  %v6462_v9 = vpack.c.bf16 %v869_v10, %v865_v44  ;;  %v873_v39 = vld [vmem:[%s8209_s3 + $0x350] sm:$0xff]  ;;  %v880_v44 = vld [vmem:[%s8209_s3 + $0x388] sm:$0xff] }
 0x162   : > { %4067 = vmatprep.subr.bf16.mxu0 %v6400_v24  ;;  %4131 = vmatprep.subr.bf16.mxu1 %v6402_v54  ;;  %v871_v54 = vld [vmem:[%s8209_s3 + $0x340] sm:$0xff]  ;;  %v6472_v27 = vpack.c.bf16 %v876_v53, %v872_v28  ;;  %v877_v47 = vld [vmem:[%s8209_s3 + $0x370] sm:$0xff]  ;;  %v884_v10 = vld [vmem:[%s8209_s3 + $0x3a8] sm:$0xff] }
 0x163   : > { %8443 = vst [vmem:[#allocation79_spill] sm:$0xff] %v6438_v31  ;;  %8444 = vst [vmem:[#allocation80_spill] sm:$0xff] %v6460_v61  ;;  %v875_v24 = vld [vmem:[%s8209_s3 + $0x360] sm:$0xff]  ;;  %v882_v28 = vld [vmem:[%s8209_s3 + $0x398] sm:$0xff] }
 0x164   : > { %8445 = vst [vmem:[#allocation81_spill] sm:$0xff] %v6472_v27  ;;  %v886_v53 = vld [vmem:[%s8209_s3 + $0x3b8] sm:$0xff] }
 0x165   : > { %4069 = vmatpush1.bf16.msra.mxu0 %v6424_v56  ;;  %4133 = vmatpush1.bf16.msra.mxu1 %v6426_v52  ;;  %v6474_v56 = vpack.c.bf16 %v878_v19, %v874_v40  ;;  %v6496_v40 = vpack.c.bf16 %v875_v24, %v871_v54  ;;  %v6498_v19 = vpack.c.bf16 %v877_v47, %v873_v39  ;;  %v881_v24 = vld [vmem:[%s8209_s3 + $0x390] sm:$0xff]  ;;  %v888_v39 = vld [vmem:[%s8209_s3 + $0x3c8] sm:$0xff] }
 0x166   : > { %4071 = vmatprep.subr.bf16.mxu0 %v6436_v7  ;;  %4135 = vmatprep.subr.bf16.mxu1 %v6438_v31  ;;  %v879_v31 = vld [vmem:[%s8209_s3 + $0x380] sm:$0xff]  ;;  %v6508_v52 = vpack.c.bf16 %v884_v10, %v880_v44  ;;  %v885_v54 = vld [vmem:[%s8209_s3 + $0x3b0] sm:$0xff]  ;;  %v8451_v47 = vmax.f32 %v5984_v5, %v5975_v0  ;;  %v892_v10 = vld [vmem:[%s8209_s3 + $0x3e8] sm:$0xff] }
 0x167   : > { %8446 = vst [vmem:[#allocation82_spill] sm:$0xff] %v6474_v56  ;;  %8447 = vst [vmem:[#allocation83_spill] sm:$0xff] %v6496_v40  ;;  %v883_v7 = vld [vmem:[%s8209_s3 + $0x3a0] sm:$0xff]  ;;  %v6540_v5 = vpack.c.bf16 %v885_v54, %v881_v24  ;;  %v3134_v24 = vld [vmem:[%s8209_s3 + $0x808] sm:$0xff] }
 0x168   : > { %8448 = vst [vmem:[#allocation84_spill] sm:$0xff] %v6498_v19  ;;  %8449 = vst [vmem:[#allocation85_spill] sm:$0xff] %v6508_v52  ;;  %v6525_v44 = vadd.f32 %v5971_v16, %v8451_v47  ;;  %v6538_v0 = vpack.c.bf16 %v883_v7, %v879_v31  ;;  %v887_v16 = vld [vmem:[%s8209_s3 + $0x3c0] sm:$0xff]  ;;  %v889_v7 = vld [vmem:[%s8209_s3 + $0x3d0] sm:$0xff] }
 0x169   : > { %4073 = vmatpush1.bf16.msra.mxu0 %v6460_v61  ;;  %4137 = vmatpush1.bf16.msra.mxu1 %v6462_v9  ;;  %v6510_v61 = vpack.c.bf16 %v886_v53, %v882_v28  ;;  %v890_v28 = vld [vmem:[%s8209_s3 + $0x3d8] sm:$0xff]  ;;  %8453 = vst [vmem:[#allocation88_spill] sm:$0xff] %v6540_v5  ;;  %v891_v47 = vld [vmem:[%s8209_s3 + $0x3e0] sm:$0xff]  ;;  %v893_v31 = vld [vmem:[%s8209_s3 + $0x3f0] sm:$0xff] }
 0x16a   : > { %4075 = vmatprep.subr.bf16.mxu0 %v6472_v27  ;;  %4139 = vmatprep.subr.bf16.mxu1 %v6474_v56  ;;  %v894_v53 = vld [vmem:[%s8209_s3 + $0x3f8] sm:$0xff]  ;;  %8452 = vst [vmem:[#allocation87_spill] sm:$0xff] %v6538_v0  ;;  %v6550_v56 = vpack.c.bf16 %v892_v10, %v888_v39  ;;  %v3138_v39 = vld [vmem:[%s8209_s3 + $0x828] sm:$0xff]  ;;  %v3141_v27 = vld [vmem:[%s8209_s3 + $0x840] sm:$0xff] }
 0x16b   : > { %8450 = vst [vmem:[#allocation86_spill] sm:$0xff] %v6510_v61  ;;  %v3136_v10 = vld [vmem:[%s8209_s3 + $0x818] sm:$0xff]  ;;  %v6581_v54 = vpack.c.bf16 %v3138_v39, %v3134_v24  ;;  %v3142_v24 = vld [vmem:[%s8209_s3 + $0x848] sm:$0xff]  ;;  %v8461_v39 = vmax.f32 %v6030_v41, 0.0 }
 0x16c   : > { %8454 = vst [vmem:[#allocation89_spill] sm:$0xff] %v6550_v56 }
 0x16d   : > { %4077 = vmatpush1.bf16.msra.mxu0 %v6496_v40  ;;  %4141 = vmatpush1.bf16.msra.mxu1 %v6498_v19  ;;  %v6552_v40 = vpack.c.bf16 %v894_v53, %v890_v28  ;;  %v3140_v28 = vld [vmem:[%s8209_s3 + $0x838] sm:$0xff]  ;;  %v6575_v53 = vpack.c.bf16 %v891_v47, %v887_v16  ;;  %8458 = vst [vmem:[#allocation93_spill] sm:$0xff] %v6581_v54  ;;  %v3133_v19 = vld [vmem:[%s8209_s3 + $0x800] sm:$0xff]  ;;  %v8460_v16 = vmax.f32 %v6525_v44, 0.0 }
 0x16e   : > { %4079 = vmatprep.subr.bf16.mxu0 %v6508_v52  ;;  %4143 = vmatprep.subr.bf16.mxu1 %v6510_v61  ;;  %v6577_v61 = vpack.c.bf16 %v893_v31, %v889_v7  ;;  %v6583_v52 = vpack.c.bf16 %v3140_v28, %v3136_v10  ;;  %v3135_v7 = vld [vmem:[%s8209_s3 + $0x810] sm:$0xff]  ;;  %v1441_v10 = vrot.slane %v8461_v39, 7  ;;  %v3146_v28 = vld [vmem:[%s8209_s3 + $0x868] sm:$0xff]  ;;  %v1440_v39 = vrot.slane %v6006_v30, 7 }
 0x16f   : > { %8455 = vst [vmem:[#allocation90_spill] sm:$0xff] %v6552_v40  ;;  %8456 = vst [vmem:[#allocation91_spill] sm:$0xff] %v6575_v53  ;;  %v751_v47 = vrot.slane %v8460_v16, 6  ;;  %v3139_v31 = vld [vmem:[%s8209_s3 + $0x830] sm:$0xff]  ;;  %v3144_v16 = vld [vmem:[%s8209_s3 + $0x858] sm:$0xff] }
 0x170   : > { %8457 = vst [vmem:[#allocation92_spill] sm:$0xff] %v6577_v61  ;;  %8459 = vst [vmem:[#allocation94_spill] sm:$0xff] %v6583_v52 }
 0x171   : > { %4081 = vmatpush1.bf16.msra.mxu0 %v6538_v0  ;;  %4145 = vmatpush1.bf16.msra.mxu1 %v6540_v5  ;;  %v3137_v5 = vld [vmem:[%s8209_s3 + $0x820] sm:$0xff]  ;;  %v6621_v0 = vpack.c.bf16 %v3139_v31, %v3135_v7  ;;  %v3147_v7 = vld [vmem:[%s8209_s3 + $0x870] sm:$0xff]  ;;  %v3150_v31 = vld [vmem:[%s8209_s3 + $0x888] sm:$0xff] }
 0x172   : > { %4083 = vmatprep.subr.bf16.mxu0 %v6550_v56  ;;  %4147 = vmatprep.subr.bf16.mxu1 %v6552_v40  ;;  %v3148_v40 = vld [vmem:[%s8209_s3 + $0x878] sm:$0xff]  ;;  %v750_v56 = vrot.slane %v6015_v43, 6  ;;  %v6616_v41 = vpack.c.bf16 %v3137_v5, %v3133_v19  ;;  %v3143_v19 = vld [vmem:[%s8209_s3 + $0x850] sm:$0xff] }
 0x173   : > { %v6665_v15 = vpack.c.bf16 %v3147_v7, %v3143_v19  ;;  %v3162_v19 = vld [vmem:[%s8209_s3 + $0x8e8] sm:$0xff]  ;;  %v3164_v7 = vld [vmem:[%s8209_s3 + $0x8f8] sm:$0xff] }
 0x174   : > { %v752_v5 = vsel %vm749_vm6, %v750_v56, %v751_v47  ;;  %v6651_v56 = vsel %vm758_vm4, %v1440_v39, %v1441_v10  ;;  %v3156_v47 = vld [vmem:[%s8209_s3 + $0x8b8] sm:$0xff]  ;;  %v3158_v39 = vld [vmem:[%s8209_s3 + $0x8c8] sm:$0xff] }
 0x175   : > { %4085 = vmatpush1.bf16.msra.mxu0 %v6575_v53  ;;  %4149 = vmatpush1.bf16.msra.mxu1 %v6577_v61  ;;  %v3145_v61 = vld [vmem:[%s8209_s3 + $0x860] sm:$0xff]  ;;  %v3154_v53 = vld [vmem:[%s8209_s3 + $0x8a8] sm:$0xff]  ;;  %8465 = vst [vmem:[#allocation98_spill] sm:$0xff] %v6665_v15 }
 0x176   : > { %4151 = vmatprep.subr.bf16.mxu0 %v6581_v54  ;;  %4215 = vmatprep.subr.bf16.mxu1 %v6583_v52  ;;  %v6633_v54 = vpack.c.bf16 %v3146_v28, %v3142_v24  ;;  %v6635_v52 = vpack.c.bf16 %v3148_v40, %v3144_v16  ;;  %v3152_v40 = vld [vmem:[%s8209_s3 + $0x898] sm:$0xff]  ;;  %v6661_v24 = vpack.c.bf16 %v3145_v61, %v3141_v27  ;;  %v3149_v28 = vld [vmem:[%s8209_s3 + $0x880] sm:$0xff]  ;;  %v3151_v27 = vld [vmem:[%s8209_s3 + $0x890] sm:$0xff] }
 0x177   : > { %v6667_v10 = vpack.c.bf16 %v3154_v53, %v3150_v31  ;;  %v3153_v16 = vld [vmem:[%s8209_s3 + $0x8a0] sm:$0xff]  ;;  %v6680_v61 = vpack.c.bf16 %v3156_v47, %v3152_v40  ;;  %v3155_v53 = vld [vmem:[%s8209_s3 + $0x8b0] sm:$0xff]  ;;  %v6704_v47 = vpack.c.bf16 %v3162_v19, %v3158_v39  ;;  %v3170_v39 = vld [vmem:[%s8209_s3 + $0x928] sm:$0xff] }
 0x178   : > { %8462 = vst [vmem:[#allocation95_spill] sm:$0xff] %v6633_v54  ;;  %8463 = vst [vmem:[#allocation96_spill] sm:$0xff] %v6635_v52  ;;  %3128 = vmatmul.mubr.msk.f32.vlgmr.msra.gmra.mrb[8].mxu0 %vm6056_vm5, %v752_v5  ;;  %3132 = vmatmul.mubr.msk.f32.vlgmr.msra.gmra.mrb[8].mxu1 %vm6056_vm5, %v752_v5  ;;  %v3160_v5 = vld [vmem:[%s8209_s3 + $0x8d8] sm:$0xff]  ;;  %v6698_v31 = vpack.c.bf16 %v3153_v16, %v3149_v28  ;;  %v6702_v40 = vpack.c.bf16 %v3155_v53, %v3151_v27  ;;  %v3159_v28 = vld [vmem:[%s8209_s3 + $0x8d0] sm:$0xff] }
 0x179   : > { %4153 = vmatpush1.bf16.msra.mxu0 %v6616_v41  ;;  %1509 = vmatprep.mubr.f32.mxu0 %v6651_v56  ;;  %8464 = vst [vmem:[#allocation97_spill] sm:$0xff] %v6661_v24  ;;  %8466 = vst [vmem:[#allocation99_spill] sm:$0xff] %v6667_v10  ;;  %v6716_v16 = vpack.c.bf16 %v3164_v7, %v3160_v5  ;;  %v3163_v27 = vld [vmem:[%s8209_s3 + $0x8f0] sm:$0xff]  ;;  %v3166_v53 = vld [vmem:[%s8209_s3 + $0x908] sm:$0xff] }
 0x17a   : > { %4217 = vmatpush1.bf16.msra.mxu1 %v6621_v0  ;;  %1580 = vmatprep.mubr.f32.mxu1 %v6651_v56  ;;  %8467 = vst [vmem:[#allocation100_spill] sm:$0xff] %v6680_v61  ;;  %8468 = vst [vmem:[#allocation101_spill] sm:$0xff] %v6698_v31  ;;  %v3168_v19 = vld [vmem:[%s8209_s3 + $0x918] sm:$0xff] }
 0x17b   : > { %4155 = vmatprep.subr.bf16.mxu0 %v6633_v54  ;;  %4219 = vmatprep.subr.bf16.mxu1 %v6635_v52  ;;  %8469 = vst [vmem:[#allocation102_spill] sm:$0xff] %v6702_v40  ;;  %8470 = vst [vmem:[#allocation103_spill] sm:$0xff] %v6704_v47  ;;  %v3157_v52 = vld [vmem:[%s8209_s3 + $0x8c0] sm:$0xff]  ;;  %v3172_v5 = vld [vmem:[%s8209_s3 + $0x938] sm:$0xff] }
 0x17c   : > { %v3161_v54 = vld [vmem:[%s8209_s3 + $0x8e0] sm:$0xff]  ;;  %8471 = vst [vmem:[#allocation104_spill] sm:$0xff] %v6716_v16 }
 0x17d   : > { %4157 = vmatpush1.bf16.msra.mxu0 %v6661_v24  ;;  %v6734_v7 = vpack.c.bf16 %v3161_v54, %v3157_v52  ;;  %v3169_v24 = vld [vmem:[%s8209_s3 + $0x920] sm:$0xff]  ;;  %v3167_v52 = vld [vmem:[%s8209_s3 + $0x910] sm:$0xff]  ;;  %v6752_v54 = vpack.c.bf16 %v3172_v5, %v3168_v19  ;;  %v3180_v19 = vld [vmem:[%s8209_s3 + $0x978] sm:$0xff] }
 0x17e   : > { %4221 = vmatpush1.bf16.msra.mxu1 %v6665_v15  ;;  %4159 = vmatprep.subr.bf16.mxu0 %v6667_v10  ;;  %v6740_v10 = vpack.c.bf16 %v3170_v39, %v3166_v53  ;;  %v3165_v15 = vld [vmem:[%s8209_s3 + $0x900] sm:$0xff]  ;;  %v3178_v53 = vld [vmem:[%s8209_s3 + $0x968] sm:$0xff]  ;;  %v3176_v39 = vld [vmem:[%s8209_s3 + $0x958] sm:$0xff] }
 0x17f   : > { %4223 = vmatprep.subr.bf16.mxu1 %v6680_v61  ;;  %8472 = vst [vmem:[#allocation105_spill] sm:$0xff] %v6734_v7  ;;  %v6738_v61 = vpack.c.bf16 %v3163_v27, %v3159_v28  ;;  %8475 = vst [vmem:[#allocation108_spill] sm:$0xff] %v6752_v54  ;;  %v3171_v28 = vld [vmem:[%s8209_s3 + $0x930] sm:$0xff]  ;;  %v3174_v27 = vld [vmem:[%s8209_s3 + $0x948] sm:$0xff]  ;;  %v6770_v5 = vpack.c.bf16 %v3169_v24, %v3165_v15  ;;  %v6788_v15 = vpack.c.bf16 %v3180_v19, %v3176_v39 }
 0x180   : > { %8474 = vst [vmem:[#allocation107_spill] sm:$0xff] %v6740_v10  ;;  %v3175_v24 = vld [vmem:[%s8209_s3 + $0x950] sm:$0xff]  ;;  %v3188_v39 = vld [vmem:[%s8209_s3 + $0x9b8] sm:$0xff] }
 0x181   : > { %4161 = vmatpush1.bf16.msra.mxu0 %v6698_v31  ;;  %8473 = vst [vmem:[#allocation106_spill] sm:$0xff] %v6738_v61  ;;  %8476 = vst [vmem:[#allocation109_spill] sm:$0xff] %v6770_v5  ;;  %v3177_v31 = vld [vmem:[%s8209_s3 + $0x960] sm:$0xff] }
 0x182   : > { %4225 = vmatpush1.bf16.msra.mxu1 %v6702_v40  ;;  %4163 = vmatprep.subr.bf16.mxu0 %v6704_v47  ;;  %v6776_v47 = vpack.c.bf16 %v3178_v53, %v3174_v27  ;;  %v3173_v40 = vld [vmem:[%s8209_s3 + $0x940] sm:$0xff]  ;;  %8479 = vst [vmem:[#allocation112_spill] sm:$0xff] %v6788_v15  ;;  %v3186_v27 = vld [vmem:[%s8209_s3 + $0x9a8] sm:$0xff]  ;;  %v3184_v53 = vld [vmem:[%s8209_s3 + $0x998] sm:$0xff] }
 0x183   : > { %4227 = vmatprep.subr.bf16.mxu1 %v6716_v16  ;;  %v6774_v16 = vpack.c.bf16 %v3171_v28, %v3167_v52  ;;  %v3179_v52 = vld [vmem:[%s8209_s3 + $0x970] sm:$0xff]  ;;  %v3182_v28 = vld [vmem:[%s8209_s3 + $0x988] sm:$0xff]  ;;  %v6806_v19 = vpack.c.bf16 %v3177_v31, %v3173_v40  ;;  %v6824_v40 = vpack.c.bf16 %v3188_v39, %v3184_v53  ;;  %v3196_v53 = vld [vmem:[%s8209_s3 + $0x9f8] sm:$0xff] }
 0x184   : > { %8478 = vst [vmem:[#allocation111_spill] sm:$0xff] %v6776_v47  ;;  %v3183_v31 = vld [vmem:[%s8209_s3 + $0x990] sm:$0xff] }
 0x185   : > { %4165 = vmatpush1.bf16.msra.mxu0 %v6734_v7  ;;  %8477 = vst [vmem:[#allocation110_spill] sm:$0xff] %v6774_v16  ;;  %8480 = vst [vmem:[#allocation113_spill] sm:$0xff] %v6806_v19  ;;  %v3185_v7 = vld [vmem:[%s8209_s3 + $0x9a0] sm:$0xff] }
 0x186   : > { %4229 = vmatpush1.bf16.msra.mxu1 %v6738_v61  ;;  %4167 = vmatprep.subr.bf16.mxu0 %v6740_v10  ;;  %v6812_v10 = vpack.c.bf16 %v3186_v27, %v3182_v28  ;;  %v3181_v61 = vld [vmem:[%s8209_s3 + $0x980] sm:$0xff]  ;;  %8483 = vst [vmem:[#allocation116_spill] sm:$0xff] %v6824_v40  ;;  %v3194_v28 = vld [vmem:[%s8209_s3 + $0x9e8] sm:$0xff]  ;;  %v3192_v27 = vld [vmem:[%s8209_s3 + $0x9d8] sm:$0xff] }
 0x187   : > { %4231 = vmatprep.subr.bf16.mxu1 %v6752_v54  ;;  %v6810_v54 = vpack.c.bf16 %v3179_v52, %v3175_v24  ;;  %v3187_v24 = vld [vmem:[%s8209_s3 + $0x9b0] sm:$0xff]  ;;  %v3190_v52 = vld [vmem:[%s8209_s3 + $0x9c8] sm:$0xff]  ;;  %v6842_v39 = vpack.c.bf16 %v3185_v7, %v3181_v61  ;;  %v6860_v7 = vpack.c.bf16 %v3196_v53, %v3192_v27  ;;  %v3204_v27 = vld [vmem:[%s8209_s3 + $0xa38] sm:$0xff] }
 0x188   : > { %8482 = vst [vmem:[#allocation115_spill] sm:$0xff] %v6812_v10  ;;  %v3191_v61 = vld [vmem:[%s8209_s3 + $0x9d0] sm:$0xff] }
 0x189   : > { %4169 = vmatpush1.bf16.msra.mxu0 %v6770_v5  ;;  %8481 = vst [vmem:[#allocation114_spill] sm:$0xff] %v6810_v54  ;;  %8484 = vst [vmem:[#allocation117_spill] sm:$0xff] %v6842_v39  ;;  %v3193_v5 = vld [vmem:[%s8209_s3 + $0x9e0] sm:$0xff] }
 0x18a   : > { %4233 = vmatpush1.bf16.msra.mxu1 %v6774_v16  ;;  %4171 = vmatprep.subr.bf16.mxu0 %v6776_v47  ;;  %v6848_v47 = vpack.c.bf16 %v3194_v28, %v3190_v52  ;;  %v3189_v16 = vld [vmem:[%s8209_s3 + $0x9c0] sm:$0xff]  ;;  %8487 = vst [vmem:[#allocation120_spill] sm:$0xff] %v6860_v7  ;;  %v3202_v52 = vld [vmem:[%s8209_s3 + $0xa28] sm:$0xff]  ;;  %v3200_v28 = vld [vmem:[%s8209_s3 + $0xa18] sm:$0xff] }
 0x18b   : > { %4235 = vmatprep.subr.bf16.mxu1 %v6788_v15  ;;  %v6846_v15 = vpack.c.bf16 %v3187_v24, %v3183_v31  ;;  %v3195_v31 = vld [vmem:[%s8209_s3 + $0x9f0] sm:$0xff]  ;;  %v3198_v24 = vld [vmem:[%s8209_s3 + $0xa08] sm:$0xff]  ;;  %v6878_v53 = vpack.c.bf16 %v3193_v5, %v3189_v16  ;;  %v6896_v5 = vpack.c.bf16 %v3204_v27, %v3200_v28  ;;  %v3212_v28 = vld [vmem:[%s8209_s3 + $0xa78] sm:$0xff] }
 0x18c   : > { %8486 = vst [vmem:[#allocation119_spill] sm:$0xff] %v6848_v47  ;;  %v3199_v16 = vld [vmem:[%s8209_s3 + $0xa10] sm:$0xff] }
 0x18d   : > { %4173 = vmatpush1.bf16.msra.mxu0 %v6806_v19  ;;  %8485 = vst [vmem:[#allocation118_spill] sm:$0xff] %v6846_v15  ;;  %8488 = vst [vmem:[#allocation121_spill] sm:$0xff] %v6878_v53  ;;  %v3201_v19 = vld [vmem:[%s8209_s3 + $0xa20] sm:$0xff] }
 0x18e   : > { %4237 = vmatpush1.bf16.msra.mxu1 %v6810_v54  ;;  %4175 = vmatprep.subr.bf16.mxu0 %v6812_v10  ;;  %v6884_v10 = vpack.c.bf16 %v3202_v52, %v3198_v24  ;;  %v3197_v54 = vld [vmem:[%s8209_s3 + $0xa00] sm:$0xff]  ;;  %8491 = vst [vmem:[#allocation124_spill] sm:$0xff] %v6896_v5  ;;  %v3210_v24 = vld [vmem:[%s8209_s3 + $0xa68] sm:$0xff]  ;;  %v3208_v52 = vld [vmem:[%s8209_s3 + $0xa58] sm:$0xff] }
 0x18f   : > { %4239 = vmatprep.subr.bf16.mxu1 %v6824_v40  ;;  %v6882_v40 = vpack.c.bf16 %v3195_v31, %v3191_v61  ;;  %v3203_v61 = vld [vmem:[%s8209_s3 + $0xa30] sm:$0xff]  ;;  %v3206_v31 = vld [vmem:[%s8209_s3 + $0xa48] sm:$0xff]  ;;  %v6914_v27 = vpack.c.bf16 %v3201_v19, %v3197_v54  ;;  %v6932_v19 = vpack.c.bf16 %v3212_v28, %v3208_v52  ;;  %v3220_v52 = vld [vmem:[%s8209_s3 + $0xab8] sm:$0xff] }
 0x190   : > { %8490 = vst [vmem:[#allocation123_spill] sm:$0xff] %v6884_v10  ;;  %v3207_v54 = vld [vmem:[%s8209_s3 + $0xa50] sm:$0xff] }
 0x191   : > { %4177 = vmatpush1.bf16.msra.mxu0 %v6842_v39  ;;  %8489 = vst [vmem:[#allocation122_spill] sm:$0xff] %v6882_v40  ;;  %8492 = vst [vmem:[#allocation125_spill] sm:$0xff] %v6914_v27  ;;  %v3209_v39 = vld [vmem:[%s8209_s3 + $0xa60] sm:$0xff] }
 0x192   : > { %4241 = vmatpush1.bf16.msra.mxu1 %v6846_v15  ;;  %4179 = vmatprep.subr.bf16.mxu0 %v6848_v47  ;;  %v6920_v47 = vpack.c.bf16 %v3210_v24, %v3206_v31  ;;  %v3205_v15 = vld [vmem:[%s8209_s3 + $0xa40] sm:$0xff]  ;;  %8495 = vst [vmem:[#allocation128_spill] sm:$0xff] %v6932_v19  ;;  %v3218_v31 = vld [vmem:[%s8209_s3 + $0xaa8] sm:$0xff]  ;;  %v3216_v24 = vld [vmem:[%s8209_s3 + $0xa98] sm:$0xff] }
 0x193   : > { %4243 = vmatprep.subr.bf16.mxu1 %v6860_v7  ;;  %v6918_v7 = vpack.c.bf16 %v3203_v61, %v3199_v16  ;;  %v3211_v16 = vld [vmem:[%s8209_s3 + $0xa70] sm:$0xff]  ;;  %v3214_v61 = vld [vmem:[%s8209_s3 + $0xa88] sm:$0xff]  ;;  %v6950_v28 = vpack.c.bf16 %v3209_v39, %v3205_v15  ;;  %v6968_v39 = vpack.c.bf16 %v3220_v52, %v3216_v24  ;;  %v3228_v24 = vld [vmem:[%s8209_s3 + $0xaf8] sm:$0xff] }
 0x194   : > { %8494 = vst [vmem:[#allocation127_spill] sm:$0xff] %v6920_v47  ;;  %v3215_v15 = vld [vmem:[%s8209_s3 + $0xa90] sm:$0xff] }
 0x195   : > { %4181 = vmatpush1.bf16.msra.mxu0 %v6878_v53  ;;  %8493 = vst [vmem:[#allocation126_spill] sm:$0xff] %v6918_v7  ;;  %8496 = vst [vmem:[#allocation129_spill] sm:$0xff] %v6950_v28  ;;  %v3217_v53 = vld [vmem:[%s8209_s3 + $0xaa0] sm:$0xff] }
 0x196   : > { %4245 = vmatpush1.bf16.msra.mxu1 %v6882_v40  ;;  %4183 = vmatprep.subr.bf16.mxu0 %v6884_v10  ;;  %v6956_v10 = vpack.c.bf16 %v3218_v31, %v3214_v61  ;;  %v3213_v40 = vld [vmem:[%s8209_s3 + $0xa80] sm:$0xff]  ;;  %8499 = vst [vmem:[#allocation132_spill] sm:$0xff] %v6968_v39  ;;  %v3226_v61 = vld [vmem:[%s8209_s3 + $0xae8] sm:$0xff]  ;;  %v3224_v31 = vld [vmem:[%s8209_s3 + $0xad8] sm:$0xff] }
 0x197   : > { %4247 = vmatprep.subr.bf16.mxu1 %v6896_v5  ;;  %v6954_v5 = vpack.c.bf16 %v3211_v16, %v3207_v54  ;;  %v3219_v54 = vld [vmem:[%s8209_s3 + $0xab0] sm:$0xff]  ;;  %v3222_v16 = vld [vmem:[%s8209_s3 + $0xac8] sm:$0xff]  ;;  %v6986_v52 = vpack.c.bf16 %v3217_v53, %v3213_v40  ;;  %v7004_v53 = vpack.c.bf16 %v3228_v24, %v3224_v31  ;;  %v3236_v31 = vld [vmem:[%s8209_s3 + $0xb38] sm:$0xff] }
 0x198   : > { %8498 = vst [vmem:[#allocation131_spill] sm:$0xff] %v6956_v10  ;;  %v3223_v40 = vld [vmem:[%s8209_s3 + $0xad0] sm:$0xff] }
 0x199   : > { %4185 = vmatpush1.bf16.msra.mxu0 %v6914_v27  ;;  %8497 = vst [vmem:[#allocation130_spill] sm:$0xff] %v6954_v5  ;;  %8500 = vst [vmem:[#allocation133_spill] sm:$0xff] %v6986_v52  ;;  %v3225_v27 = vld [vmem:[%s8209_s3 + $0xae0] sm:$0xff] }
 0x19a   : > { %4249 = vmatpush1.bf16.msra.mxu1 %v6918_v7  ;;  %4187 = vmatprep.subr.bf16.mxu0 %v6920_v47  ;;  %v6992_v47 = vpack.c.bf16 %v3226_v61, %v3222_v16  ;;  %v3221_v7 = vld [vmem:[%s8209_s3 + $0xac0] sm:$0xff]  ;;  %8503 = vst [vmem:[#allocation136_spill] sm:$0xff] %v7004_v53  ;;  %v3234_v16 = vld [vmem:[%s8209_s3 + $0xb28] sm:$0xff]  ;;  %v3232_v61 = vld [vmem:[%s8209_s3 + $0xb18] sm:$0xff] }
 0x19b   : > { %4251 = vmatprep.subr.bf16.mxu1 %v6932_v19  ;;  %v6990_v19 = vpack.c.bf16 %v3219_v54, %v3215_v15  ;;  %v3227_v15 = vld [vmem:[%s8209_s3 + $0xaf0] sm:$0xff]  ;;  %v3230_v54 = vld [vmem:[%s8209_s3 + $0xb08] sm:$0xff]  ;;  %v7022_v24 = vpack.c.bf16 %v3225_v27, %v3221_v7  ;;  %v7040_v27 = vpack.c.bf16 %v3236_v31, %v3232_v61  ;;  %v3244_v61 = vld [vmem:[%s8209_s3 + $0xb78] sm:$0xff] }
 0x19c   : > { %8502 = vst [vmem:[#allocation135_spill] sm:$0xff] %v6992_v47  ;;  %v3231_v7 = vld [vmem:[%s8209_s3 + $0xb10] sm:$0xff] }
 0x19d   : > { %4189 = vmatpush1.bf16.msra.mxu0 %v6950_v28  ;;  %8501 = vst [vmem:[#allocation134_spill] sm:$0xff] %v6990_v19  ;;  %8504 = vst [vmem:[#allocation137_spill] sm:$0xff] %v7022_v24  ;;  %v3233_v28 = vld [vmem:[%s8209_s3 + $0xb20] sm:$0xff] }
 0x19e   : > { %4253 = vmatpush1.bf16.msra.mxu1 %v6954_v5  ;;  %4191 = vmatprep.subr.bf16.mxu0 %v6956_v10  ;;  %v7028_v10 = vpack.c.bf16 %v3234_v16, %v3230_v54  ;;  %v3229_v5 = vld [vmem:[%s8209_s3 + $0xb00] sm:$0xff]  ;;  %8507 = vst [vmem:[#allocation140_spill] sm:$0xff] %v7040_v27  ;;  %v3242_v54 = vld [vmem:[%s8209_s3 + $0xb68] sm:$0xff]  ;;  %v3240_v16 = vld [vmem:[%s8209_s3 + $0xb58] sm:$0xff] }
 0x19f   : > { %4255 = vmatprep.subr.bf16.mxu1 %v6968_v39  ;;  %v7026_v39 = vpack.c.bf16 %v3227_v15, %v3223_v40  ;;  %v3235_v40 = vld [vmem:[%s8209_s3 + $0xb30] sm:$0xff]  ;;  %v3238_v15 = vld [vmem:[%s8209_s3 + $0xb48] sm:$0xff]  ;;  %v7058_v31 = vpack.c.bf16 %v3233_v28, %v3229_v5  ;;  %v7076_v28 = vpack.c.bf16 %v3244_v61, %v3240_v16  ;;  %v3252_v16 = vld [vmem:[%s8209_s3 + $0xbb8] sm:$0xff] }
 0x1a0   : > { %8506 = vst [vmem:[#allocation139_spill] sm:$0xff] %v7028_v10  ;;  %v3239_v5 = vld [vmem:[%s8209_s3 + $0xb50] sm:$0xff] }
 0x1a1   : > { %4193 = vmatpush1.bf16.msra.mxu0 %v6986_v52  ;;  %8505 = vst [vmem:[#allocation138_spill] sm:$0xff] %v7026_v39  ;;  %8508 = vst [vmem:[#allocation141_spill] sm:$0xff] %v7058_v31  ;;  %v3241_v52 = vld [vmem:[%s8209_s3 + $0xb60] sm:$0xff] }
 0x1a2   : > { %4257 = vmatpush1.bf16.msra.mxu1 %v6990_v19  ;;  %4195 = vmatprep.subr.bf16.mxu0 %v6992_v47  ;;  %v7064_v47 = vpack.c.bf16 %v3242_v54, %v3238_v15  ;;  %v3237_v19 = vld [vmem:[%s8209_s3 + $0xb40] sm:$0xff]  ;;  %8511 = vst [vmem:[#allocation144_spill] sm:$0xff] %v7076_v28  ;;  %v3250_v15 = vld [vmem:[%s8209_s3 + $0xba8] sm:$0xff]  ;;  %v3248_v54 = vld [vmem:[%s8209_s3 + $0xb98] sm:$0xff] }
 0x1a3   : > { %4259 = vmatprep.subr.bf16.mxu1 %v7004_v53  ;;  %v7062_v53 = vpack.c.bf16 %v3235_v40, %v3231_v7  ;;  %v3243_v7 = vld [vmem:[%s8209_s3 + $0xb70] sm:$0xff]  ;;  %v3246_v40 = vld [vmem:[%s8209_s3 + $0xb88] sm:$0xff]  ;;  %v7094_v61 = vpack.c.bf16 %v3241_v52, %v3237_v19  ;;  %v7112_v52 = vpack.c.bf16 %v3252_v16, %v3248_v54  ;;  %v3260_v54 = vld [vmem:[%s8209_s3 + $0xbf8] sm:$0xff] }
 0x1a4   : > { %8510 = vst [vmem:[#allocation143_spill] sm:$0xff] %v7064_v47  ;;  %v3247_v19 = vld [vmem:[%s8209_s3 + $0xb90] sm:$0xff] }
 0x1a5   : > { %4197 = vmatpush1.bf16.msra.mxu0 %v7022_v24  ;;  %8509 = vst [vmem:[#allocation142_spill] sm:$0xff] %v7062_v53  ;;  %v3249_v24 = vld [vmem:[%s8209_s3 + $0xba0] sm:$0xff] }
 0x1a6   : > { %4261 = vmatpush1.bf16.msra.mxu1 %v7026_v39  ;;  %4199 = vmatprep.subr.bf16.mxu0 %v7028_v10  ;;  %v7100_v10 = vpack.c.bf16 %v3250_v15, %v3246_v40  ;;  %v3245_v39 = vld [vmem:[%s8209_s3 + $0xb80] sm:$0xff]  ;;  %v3258_v40 = vld [vmem:[%s8209_s3 + $0xbe8] sm:$0xff]  ;;  %v3256_v15 = vld [vmem:[%s8209_s3 + $0xbd8] sm:$0xff] }
 0x1a7   : > { %4263 = vmatprep.subr.bf16.mxu1 %v7040_v27  ;;  %v7098_v27 = vpack.c.bf16 %v3243_v7, %v3239_v5  ;;  %v3251_v5 = vld [vmem:[%s8209_s3 + $0xbb0] sm:$0xff]  ;;  %v3254_v7 = vld [vmem:[%s8209_s3 + $0xbc8] sm:$0xff]  ;;  %v7130_v16 = vpack.c.bf16 %v3249_v24, %v3245_v39  ;;  %v7145_v39 = vpack.c.bf16 %v3260_v54, %v3256_v15  ;;  %v1437_v54 = vrot.slane %v6015_v43, 7 }
 0x1a8   : > { %v3255_v24 = vld [vmem:[%s8209_s3 + $0xbd0] sm:$0xff] }
 0x1a9   : > { %4201 = vmatpush1.bf16.msra.mxu0 %v7058_v31  ;;  %v3257_v31 = vld [vmem:[%s8209_s3 + $0xbe0] sm:$0xff] }
 0x1aa   : > { %4265 = vmatpush1.bf16.msra.mxu1 %v7062_v53  ;;  %4203 = vmatprep.subr.bf16.mxu0 %v7064_v47  ;;  %v7136_v47 = vpack.c.bf16 %v3258_v40, %v3254_v7  ;;  %v3253_v53 = vld [vmem:[%s8209_s3 + $0xbc0] sm:$0xff]  ;;  %v8512_v40 = vmax.f32 %v6525_v44, 0.0 }
 0x1ab   : > { %4267 = vmatprep.subr.bf16.mxu1 %v7076_v28  ;;  %v7134_v28 = vpack.c.bf16 %v3251_v5, %v3247_v19  ;;  %v3259_v19 = vld [vmem:[%s8209_s3 + $0xbf0] sm:$0xff]  ;;  %v7154_v5 = vpack.c.bf16 %v3257_v31, %v3253_v53  ;;  %v8551_v44 = vld [vmem:[#allocation44_spill] sm:$0xff] }
 0x1ac   : > { %v7158_v7 = vpack.c.bf16 %v3259_v19, %v3255_v24  ;;  %v1438_v15 = vrot.slane %v8512_v40, 7  ;;  %v8553_v31 = vld [vmem:[#allocation46_spill] sm:$0xff]  ;;  %v8555_v24 = vld [vmem:[#allocation48_spill] sm:$0xff]  ;;  %v8558_v40 = vld [vmem:[#allocation51_spill] sm:$0xff] }
 0x1ad   : > { %4205 = vmatpush1.bf16.msra.mxu0 %v7094_v61  ;;  %v8557_v19 = vld [vmem:[#allocation50_spill] sm:$0xff] }
 0x1ae   : > { %4269 = vmatpush1.bf16.msra.mxu1 %v7098_v27  ;;  %4207 = vmatprep.subr.bf16.mxu0 %v7100_v10  ;;  %v7168_v53 = vsel %vm758_vm4, %v1437_v54, %v1438_v15  ;;  %v8559_v15 = vld [vmem:[#allocation52_spill] sm:$0xff]  ;;  %v8560_v54 = vld [vmem:[#allocation53_spill] sm:$0xff] }
 0x1af   : > { %4271 = vmatprep.subr.bf16.mxu1 %v7112_v52 }
 0x1b1   : > { %4209 = vmatpush1.bf16.msra.mxu0 %v7130_v16 }
 0x1b2   : > { %4273 = vmatpush1.bf16.msra.mxu1 %v7134_v28  ;;  %4211 = vmatprep.subr.bf16.mxu0 %v7136_v47 }
 0x1b3   : > { %4275 = vmatprep.subr.bf16.mxu1 %v7145_v39 }
 0x1b5   : > { %4213 = vmatpush1.bf16.msra.mxu0 %v7154_v5 }
 0x1b6   : > { %4277 = vmatpush1.bf16.msra.mxu1 %v7158_v7  ;;  %4279 = vmatprep.subr.bf16.mxu0 %v5364_v58  ;;  %v8513_v58 = vld [vmem:[#allocation5_spill] sm:$0xff] }
 0x1b7   : > { %4343 = vmatprep.subr.bf16.mxu1 %v5366_v59  ;;  %v8514_v59 = vld [vmem:[#allocation6_spill] sm:$0xff] }
 0x1b8   : > { %1510 = vmatmul.mubr.f32.vlgmr.msra.gmra.mrb[8].mxu0 %v7168_v53 }
 0x1b9   : > { %1581 = vmatmul.mubr.f32.vlgmr.msra.gmra.mrb[8].mxu1 %v7168_v53  ;;  %4281 = vmatpush1.bf16.msra.mxu0 %v5402_v6  ;;  %v8515_v6 = vld [vmem:[#allocation7_spill] sm:$0xff] }
 0x1ba   : > { %1655 = vmatprep.mubr.f32.mxu0 %v6651_v56  ;;  %4345 = vmatpush1.bf16.msra.mxu1 %v5404_v8  ;;  %v8516_v8 = vld [vmem:[#allocation8_spill] sm:$0xff] }
 0x1bb   : > { %1726 = vmatprep.mubr.f32.mxu1 %v6651_v56  ;;  %4283 = vmatprep.subr.bf16.mxu0 %v5412_v11  ;;  %v8517_v11 = vld [vmem:[#allocation9_spill] sm:$0xff] }
 0x1bc   : > { %4347 = vmatprep.subr.bf16.mxu1 %v5414_v12  ;;  %v8518_v12 = vld [vmem:[#allocation10_spill] sm:$0xff]  ;;  %v8552_v56 = vld [vmem:[#allocation45_spill] sm:$0xff] }
 0x1bd   : > { %4285 = vmatpush1.bf16.msra.mxu0 %v5442_v21  ;;  %v8519_v21 = vld [vmem:[#allocation11_spill] sm:$0xff] }
 0x1be   : > { %4349 = vmatpush1.bf16.msra.mxu1 %v5444_v22  ;;  %4287 = vmatprep.subr.bf16.mxu0 %v5454_v25  ;;  %v8520_v22 = vld [vmem:[#allocation12_spill] sm:$0xff]  ;;  %v8521_v25 = vld [vmem:[#allocation13_spill] sm:$0xff] }
 0x1bf   : > { %4351 = vmatprep.subr.bf16.mxu1 %v5456_v26  ;;  %v8522_v26 = vld [vmem:[#allocation14_spill] sm:$0xff] }
 0x1c1   : > { %4289 = vmatpush1.bf16.msra.mxu0 %v5480_v33  ;;  %v8523_v33 = vld [vmem:[#allocation15_spill] sm:$0xff] }
 0x1c2   : > { %4353 = vmatpush1.bf16.msra.mxu1 %v5482_v34  ;;  %4291 = vmatprep.subr.bf16.mxu0 %v5492_v37  ;;  %v8524_v34 = vld [vmem:[#allocation16_spill] sm:$0xff]  ;;  %v8525_v37 = vld [vmem:[#allocation17_spill] sm:$0xff] }
 0x1c3   : > { %4355 = vmatprep.subr.bf16.mxu1 %v5494_v38  ;;  %v8526_v38 = vld [vmem:[#allocation18_spill] sm:$0xff] }
 0x1c5   : > { %4293 = vmatpush1.bf16.msra.mxu0 %v5516_v45  ;;  %v8527_v45 = vld [vmem:[#allocation19_spill] sm:$0xff] }
 0x1c6   : > { %4357 = vmatpush1.bf16.msra.mxu1 %v5518_v46  ;;  %4295 = vmatprep.subr.bf16.mxu0 %v5528_v49  ;;  %v8528_v46 = vld [vmem:[#allocation20_spill] sm:$0xff]  ;;  %v8529_v49 = vld [vmem:[#allocation21_spill] sm:$0xff] }
 0x1c7   : > { %4359 = vmatprep.subr.bf16.mxu1 %v5530_v50  ;;  %v8530_v50 = vld [vmem:[#allocation22_spill] sm:$0xff] }
 0x1c9   : > { %4297 = vmatpush1.bf16.msra.mxu0 %v5552_v57  ;;  %v8531_v57 = vld [vmem:[#allocation23_spill] sm:$0xff] }
 0x1ca   : > { %4361 = vmatpush1.bf16.msra.mxu1 %v5554_v60  ;;  %4299 = vmatprep.subr.bf16.mxu0 %v5561_v62  ;;  %v8532_v60 = vld [vmem:[#allocation24_spill] sm:$0xff]  ;;  %v8533_v62 = vld [vmem:[#allocation25_spill] sm:$0xff] }
 0x1cb   : > { %4363 = vmatprep.subr.bf16.mxu1 %v5563_v63  ;;  %v8534_v63 = vld [vmem:[#allocation26_spill] sm:$0xff] }
 0x1cd   : > { %4301 = vmatpush1.bf16.msra.mxu0 %v5576_v3  ;;  %v8535_v3 = vld [vmem:[#allocation27_spill] sm:$0xff] }
 0x1ce   : > { %4365 = vmatpush1.bf16.msra.mxu1 %v5578_v4  ;;  %4303 = vmatprep.subr.bf16.mxu0 %v5593_v13  ;;  %v8536_v4 = vld [vmem:[#allocation28_spill] sm:$0xff]  ;;  %v8537_v13 = vld [vmem:[#allocation29_spill] sm:$0xff] }
 0x1cf   : > { %4367 = vmatprep.subr.bf16.mxu1 %v5604_v17  ;;  %v8538_v17 = vld [vmem:[#allocation30_spill] sm:$0xff] }
 0x1d1   : > { %4305 = vmatpush1.bf16.msra.mxu0 %v5606_v18  ;;  %v8539_v18 = vld [vmem:[#allocation31_spill] sm:$0xff] }
 0x1d2   : > { %4369 = vmatpush1.bf16.msra.mxu1 %v5615_v23  ;;  %4307 = vmatprep.subr.bf16.mxu0 %v5628_v29  ;;  %v8540_v23 = vld [vmem:[#allocation32_spill] sm:$0xff]  ;;  %v8541_v29 = vld [vmem:[#allocation34_spill] sm:$0xff] }
 0x1d3   : > { %4371 = vmatprep.subr.bf16.mxu1 %v5640_v35  ;;  %v8542_v35 = vld [vmem:[#allocation35_spill] sm:$0xff] }
 0x1d5   : > { %4309 = vmatpush1.bf16.msra.mxu0 %v5642_v36  ;;  %v8543_v36 = vld [vmem:[#allocation36_spill] sm:$0xff] }
 0x1d6   : > { %4373 = vmatpush1.bf16.msra.mxu1 %v5654_v42  ;;  %4311 = vmatprep.subr.bf16.mxu0 %v5666_v48  ;;  %v8544_v42 = vld [vmem:[#allocation37_spill] sm:$0xff]  ;;  %v8545_v48 = vld [vmem:[#allocation38_spill] sm:$0xff] }
 0x1d7   : > { %4375 = vmatprep.subr.bf16.mxu1 %v5668_v51  ;;  %v8546_v51 = vld [vmem:[#allocation39_spill] sm:$0xff] }
 0x1d9   : > { %4313 = vmatpush1.bf16.msra.mxu0 %v5680_v55  ;;  %v8547_v55 = vld [vmem:[#allocation40_spill] sm:$0xff] }
 0x1da   : > { %4377 = vmatpush1.bf16.msra.mxu1 %v5693_v1  ;;  %4315 = vmatprep.subr.bf16.mxu0 %v5695_v2  ;;  %v8548_v1 = vld [vmem:[#allocation41_spill] sm:$0xff]  ;;  %v8549_v2 = vld [vmem:[#allocation42_spill] sm:$0xff] }
 0x1db   : > { %4379 = vmatprep.subr.bf16.mxu1 %v5707_v14  ;;  %v8550_v14 = vld [vmem:[#allocation43_spill] sm:$0xff] }
 0x1dd   : > { %4317 = vmatpush1.bf16.msra.mxu0 %v8513_v58  ;;  %v8562_v58 = vld [vmem:[#allocation55_spill] sm:$0xff] }
 0x1de   : > { %4381 = vmatpush1.bf16.msra.mxu1 %v8514_v59  ;;  %4319 = vmatprep.subr.bf16.mxu0 %v8515_v6  ;;  %v8563_v59 = vld [vmem:[#allocation56_spill] sm:$0xff]  ;;  %v8564_v6 = vld [vmem:[#allocation57_spill] sm:$0xff] }
 0x1df   : > { %4383 = vmatprep.subr.bf16.mxu1 %v8516_v8  ;;  %v8565_v8 = vld [vmem:[#allocation58_spill] sm:$0xff] }
 0x1e1   : > { %4321 = vmatpush1.bf16.msra.mxu0 %v8517_v11  ;;  %v8566_v11 = vld [vmem:[#allocation59_spill] sm:$0xff] }
 0x1e2   : > { %4385 = vmatpush1.bf16.msra.mxu1 %v8518_v12  ;;  %4323 = vmatprep.subr.bf16.mxu0 %v8519_v21  ;;  %v8567_v12 = vld [vmem:[#allocation60_spill] sm:$0xff]  ;;  %v8568_v21 = vld [vmem:[#allocation61_spill] sm:$0xff] }
 0x1e3   : > { %4387 = vmatprep.subr.bf16.mxu1 %v8520_v22  ;;  %v8569_v22 = vld [vmem:[#allocation62_spill] sm:$0xff] }
 0x1e5   : > { %4325 = vmatpush1.bf16.msra.mxu0 %v8521_v25  ;;  %v8570_v25 = vld [vmem:[#allocation63_spill] sm:$0xff] }
 0x1e6   : > { %4389 = vmatpush1.bf16.msra.mxu1 %v8522_v26  ;;  %4327 = vmatprep.subr.bf16.mxu0 %v8523_v33  ;;  %v8571_v26 = vld [vmem:[#allocation64_spill] sm:$0xff]  ;;  %v8572_v33 = vld [vmem:[#allocation65_spill] sm:$0xff] }
 0x1e7   : > { %4391 = vmatprep.subr.bf16.mxu1 %v8524_v34  ;;  %v8573_v34 = vld [vmem:[#allocation66_spill] sm:$0xff] }
 0x1e9   : > { %4329 = vmatpush1.bf16.msra.mxu0 %v8525_v37  ;;  %v8574_v37 = vld [vmem:[#allocation67_spill] sm:$0xff] }
 0x1ea   : > { %4393 = vmatpush1.bf16.msra.mxu1 %v8526_v38  ;;  %4331 = vmatprep.subr.bf16.mxu0 %v8527_v45  ;;  %v8575_v38 = vld [vmem:[#allocation68_spill] sm:$0xff]  ;;  %v8576_v45 = vld [vmem:[#allocation69_spill] sm:$0xff] }
 0x1eb   : > { %4395 = vmatprep.subr.bf16.mxu1 %v8528_v46  ;;  %v8577_v46 = vld [vmem:[#allocation70_spill] sm:$0xff] }
 0x1ed   : > { %4333 = vmatpush1.bf16.msra.mxu0 %v8529_v49  ;;  %v8578_v49 = vld [vmem:[#allocation71_spill] sm:$0xff] }
 0x1ee   : > { %4397 = vmatpush1.bf16.msra.mxu1 %v8530_v50  ;;  %4335 = vmatprep.subr.bf16.mxu0 %v8531_v57  ;;  %v8579_v50 = vld [vmem:[#allocation72_spill] sm:$0xff]  ;;  %v8580_v57 = vld [vmem:[#allocation73_spill] sm:$0xff] }
 0x1ef   : > { %4399 = vmatprep.subr.bf16.mxu1 %v8532_v60  ;;  %v8581_v60 = vld [vmem:[#allocation74_spill] sm:$0xff] }
 0x1f1   : > { %4337 = vmatpush1.bf16.msra.mxu0 %v8533_v62  ;;  %v8582_v62 = vld [vmem:[#allocation75_spill] sm:$0xff] }
 0x1f2   : > { %4401 = vmatpush1.bf16.msra.mxu1 %v8534_v63  ;;  %4339 = vmatprep.subr.bf16.mxu0 %v8535_v3  ;;  %v8583_v63 = vld [vmem:[#allocation76_spill] sm:$0xff]  ;;  %v8584_v3 = vld [vmem:[#allocation77_spill] sm:$0xff] }
 0x1f3   : > { %4403 = vmatprep.subr.bf16.mxu1 %v8536_v4  ;;  %v8585_v4 = vld [vmem:[#allocation78_spill] sm:$0xff] }
 0x1f5   : > { %4341 = vmatpush1.bf16.msra.mxu0 %v8537_v13  ;;  %v8586_v13 = vld [vmem:[#allocation79_spill] sm:$0xff] }
 0x1f6   : > { %4405 = vmatpush1.bf16.msra.mxu1 %v8538_v17  ;;  %4407 = vmatprep.subr.bf16.mxu0 %v8539_v18  ;;  %v8587_v17 = vld [vmem:[#allocation80_spill] sm:$0xff]  ;;  %v8588_v18 = vld [vmem:[#allocation81_spill] sm:$0xff] }
 0x1f7   : > { %4471 = vmatprep.subr.bf16.mxu1 %v8540_v23  ;;  %v8589_v23 = vld [vmem:[#allocation82_spill] sm:$0xff] }
 0x1f8   : > { %1656 = vmatmul.mubr.f32.vlgmr.msra.gmra.mrb[10].mxu0 %v7168_v53 }
 0x1f9   : > { %1727 = vmatmul.mubr.f32.vlgmr.msra.gmra.mrb[10].mxu1 %v7168_v53  ;;  %4409 = vmatpush1.bf16.msra.mxu0 %v8541_v29  ;;  %v8561_v53 = vld [vmem:[#allocation54_spill] sm:$0xff]  ;;  %v8590_v29 = vld [vmem:[#allocation83_spill] sm:$0xff] }
 0x1fa   : > { %1797 = vmatprep.mubr.f32.mxu0 %v6006_v30  ;;  %4473 = vmatpush1.bf16.msra.mxu1 %v8542_v35  ;;  %v8591_v35 = vld [vmem:[#allocation84_spill] sm:$0xff] }
 0x1fb   : > { %1868 = vmatprep.mubr.f32.mxu1 %v6006_v30  ;;  %4411 = vmatprep.subr.bf16.mxu0 %v8543_v36  ;;  %v8592_v36 = vld [vmem:[#allocation85_spill] sm:$0xff] }
 0x1fc   : > { %4475 = vmatprep.subr.bf16.mxu1 %v8544_v42  ;;  %v8593_v42 = vld [vmem:[#allocation86_spill] sm:$0xff] }
 0x1fd   : > { %4413 = vmatpush1.bf16.msra.mxu0 %v6051_v20  ;;  %v8554_v20 = vld [vmem:[#allocation47_spill] sm:$0xff] }
 0x1fe   : > { %4477 = vmatpush1.bf16.msra.mxu1 %v8545_v48  ;;  %4415 = vmatprep.subr.bf16.mxu0 %v6080_v32  ;;  %v8556_v32 = vld [vmem:[#allocation49_spill] sm:$0xff]  ;;  %v8594_v48 = vld [vmem:[#allocation87_spill] sm:$0xff] }
 0x1ff   : > { %4479 = vmatprep.subr.bf16.mxu1 %v8546_v51  ;;  %v8595_v51 = vld [vmem:[#allocation88_spill] sm:$0xff] }
 0x201   : > { %4417 = vmatpush1.bf16.msra.mxu0 %v8547_v55  ;;  %v8596_v55 = vld [vmem:[#allocation89_spill] sm:$0xff] }
 0x202   : > { %4481 = vmatpush1.bf16.msra.mxu1 %v8548_v1  ;;  %4419 = vmatprep.subr.bf16.mxu0 %v8549_v2  ;;  %v8597_v1 = vld [vmem:[#allocation90_spill] sm:$0xff]  ;;  %v8599_v2 = vld [vmem:[#allocation92_spill] sm:$0xff] }
 0x203   : > { %4483 = vmatprep.subr.bf16.mxu1 %v8550_v14  ;;  %v8600_v14 = vld [vmem:[#allocation93_spill] sm:$0xff] }
 0x205   : > { %4421 = vmatpush1.bf16.msra.mxu0 %v8551_v44  ;;  %v8601_v44 = vld [vmem:[#allocation94_spill] sm:$0xff] }
 0x206   : > { %4485 = vmatpush1.bf16.msra.mxu1 %v8552_v56  ;;  %4423 = vmatprep.subr.bf16.mxu0 %v8553_v31  ;;  %v762_v56 = vrot.slane %v6006_v30, 1  ;;  %v8602_v31 = vld [vmem:[#allocation95_spill] sm:$0xff]  ;;  %v8607_v30 = vld [vmem:[#allocation100_spill] sm:$0xff] }
 0x207   : > { %4487 = vmatprep.subr.bf16.mxu1 %v8554_v20  ;;  %v8603_v20 = vld [vmem:[#allocation96_spill] sm:$0xff] }
 0x209   : > { %4425 = vmatpush1.bf16.msra.mxu0 %v8555_v24  ;;  %v8604_v24 = vld [vmem:[#allocation97_spill] sm:$0xff] }
 0x20a   : > { %4489 = vmatpush1.bf16.msra.mxu1 %v8556_v32  ;;  %4427 = vmatprep.subr.bf16.mxu0 %v8557_v19  ;;  %v8605_v32 = vld [vmem:[#allocation98_spill] sm:$0xff]  ;;  %v8606_v19 = vld [vmem:[#allocation99_spill] sm:$0xff] }
 0x20b   : > { %4491 = vmatprep.subr.bf16.mxu1 %v8558_v40  ;;  %v8608_v40 = vld [vmem:[#allocation101_spill] sm:$0xff] }
 0x20d   : > { %4429 = vmatpush1.bf16.msra.mxu0 %v8559_v15  ;;  %v8610_v15 = vld [vmem:[#allocation103_spill] sm:$0xff] }
 0x20e   : > { %4493 = vmatpush1.bf16.msra.mxu1 %v8560_v54  ;;  %4431 = vmatprep.subr.bf16.mxu0 %v8561_v53  ;;  %v8612_v54 = vld [vmem:[#allocation105_spill] sm:$0xff]  ;;  %v8613_v53 = vld [vmem:[#allocation106_spill] sm:$0xff] }
 0x20f   : > { %4495 = vmatprep.subr.bf16.mxu1 %v8562_v58  ;;  %v8614_v58 = vld [vmem:[#allocation107_spill] sm:$0xff] }
 0x211   : > { %4433 = vmatpush1.bf16.msra.mxu0 %v8563_v59  ;;  %v8615_v59 = vld [vmem:[#allocation108_spill] sm:$0xff] }
 0x212   : > { %4497 = vmatpush1.bf16.msra.mxu1 %v8564_v6  ;;  %4435 = vmatprep.subr.bf16.mxu0 %v8565_v8  ;;  %v8616_v6 = vld [vmem:[#allocation109_spill] sm:$0xff]  ;;  %v8617_v8 = vld [vmem:[#allocation110_spill] sm:$0xff] }
 0x213   : > { %4499 = vmatprep.subr.bf16.mxu1 %v8566_v11  ;;  %v8618_v11 = vld [vmem:[#allocation111_spill] sm:$0xff] }
 0x215   : > { %4437 = vmatpush1.bf16.msra.mxu0 %v8567_v12  ;;  %v8619_v12 = vld [vmem:[#allocation112_spill] sm:$0xff] }
 0x216   : > { %4501 = vmatpush1.bf16.msra.mxu1 %v8568_v21  ;;  %4439 = vmatprep.subr.bf16.mxu0 %v8569_v22  ;;  %v8620_v21 = vld [vmem:[#allocation113_spill] sm:$0xff]  ;;  %v8621_v22 = vld [vmem:[#allocation114_spill] sm:$0xff] }
 0x217   : > { %4503 = vmatprep.subr.bf16.mxu1 %v8570_v25  ;;  %v8622_v25 = vld [vmem:[#allocation115_spill] sm:$0xff] }
 0x219   : > { %4441 = vmatpush1.bf16.msra.mxu0 %v8571_v26  ;;  %v8623_v26 = vld [vmem:[#allocation116_spill] sm:$0xff] }
 0x21a   : > { %4505 = vmatpush1.bf16.msra.mxu1 %v8572_v33  ;;  %4443 = vmatprep.subr.bf16.mxu0 %v8573_v34  ;;  %v8624_v33 = vld [vmem:[#allocation117_spill] sm:$0xff]  ;;  %v8625_v34 = vld [vmem:[#allocation118_spill] sm:$0xff] }
 0x21b   : > { %4507 = vmatprep.subr.bf16.mxu1 %v8574_v37  ;;  %v8626_v37 = vld [vmem:[#allocation119_spill] sm:$0xff] }
 0x21d   : > { %4445 = vmatpush1.bf16.msra.mxu0 %v8575_v38  ;;  %v8627_v38 = vld [vmem:[#allocation120_spill] sm:$0xff] }
 0x21e   : > { %4509 = vmatpush1.bf16.msra.mxu1 %v8576_v45  ;;  %4447 = vmatprep.subr.bf16.mxu0 %v8577_v46  ;;  %v8628_v45 = vld [vmem:[#allocation121_spill] sm:$0xff]  ;;  %v8629_v46 = vld [vmem:[#allocation122_spill] sm:$0xff] }
 0x21f   : > { %4511 = vmatprep.subr.bf16.mxu1 %v8578_v49  ;;  %v8630_v49 = vld [vmem:[#allocation123_spill] sm:$0xff] }
 0x221   : > { %4449 = vmatpush1.bf16.msra.mxu0 %v8579_v50  ;;  %v8631_v50 = vld [vmem:[#allocation124_spill] sm:$0xff] }
 0x222   : > { %4513 = vmatpush1.bf16.msra.mxu1 %v8580_v57  ;;  %4451 = vmatprep.subr.bf16.mxu0 %v8581_v60  ;;  %v8632_v57 = vld [vmem:[#allocation125_spill] sm:$0xff]  ;;  %v8633_v60 = vld [vmem:[#allocation126_spill] sm:$0xff] }
 0x223   : > { %4515 = vmatprep.subr.bf16.mxu1 %v8582_v62  ;;  %v8634_v62 = vld [vmem:[#allocation127_spill] sm:$0xff] }
 0x225   : > { %4453 = vmatpush1.bf16.msra.mxu0 %v8583_v63  ;;  %v8635_v63 = vld [vmem:[#allocation128_spill] sm:$0xff] }
 0x226   : > { %4517 = vmatpush1.bf16.msra.mxu1 %v8584_v3  ;;  %4455 = vmatprep.subr.bf16.mxu0 %v8585_v4  ;;  %v8636_v3 = vld [vmem:[#allocation129_spill] sm:$0xff]  ;;  %v8637_v4 = vld [vmem:[#allocation130_spill] sm:$0xff] }
 0x227   : > { %4519 = vmatprep.subr.bf16.mxu1 %v8586_v13  ;;  %v8638_v13 = vld [vmem:[#allocation131_spill] sm:$0xff] }
 0x229   : > { %4457 = vmatpush1.bf16.msra.mxu0 %v8587_v17  ;;  %v8639_v17 = vld [vmem:[#allocation132_spill] sm:$0xff] }
 0x22a   : > { %4521 = vmatpush1.bf16.msra.mxu1 %v6462_v9  ;;  %4459 = vmatprep.subr.bf16.mxu0 %v8588_v18  ;;  %v8598_v9 = vld [vmem:[#allocation91_spill] sm:$0xff]  ;;  %v8640_v18 = vld [vmem:[#allocation133_spill] sm:$0xff] }
 0x22b   : > { %4523 = vmatprep.subr.bf16.mxu1 %v8589_v23  ;;  %v8641_v23 = vld [vmem:[#allocation134_spill] sm:$0xff] }
 0x22d   : > { %4461 = vmatpush1.bf16.msra.mxu0 %v8590_v29  ;;  %v8642_v29 = vld [vmem:[#allocation135_spill] sm:$0xff] }
 0x22e   : > { %4525 = vmatpush1.bf16.msra.mxu1 %v8591_v35  ;;  %4463 = vmatprep.subr.bf16.mxu0 %v8592_v36  ;;  %v8643_v35 = vld [vmem:[#allocation136_spill] sm:$0xff]  ;;  %v8644_v36 = vld [vmem:[#allocation137_spill] sm:$0xff] }
 0x22f   : > { %4527 = vmatprep.subr.bf16.mxu1 %v8593_v42  ;;  %v8645_v42 = vld [vmem:[#allocation138_spill] sm:$0xff] }
 0x231   : > { %4465 = vmatpush1.bf16.msra.mxu0 %v8594_v48  ;;  %v8646_v48 = vld [vmem:[#allocation139_spill] sm:$0xff] }
 0x232   : > { %4529 = vmatpush1.bf16.msra.mxu1 %v8595_v51  ;;  %4467 = vmatprep.subr.bf16.mxu0 %v8596_v55  ;;  %v8647_v51 = vld [vmem:[#allocation140_spill] sm:$0xff]  ;;  %v8648_v55 = vld [vmem:[#allocation141_spill] sm:$0xff] }
 0x233   : > { %4531 = vmatprep.subr.bf16.mxu1 %v8597_v1  ;;  %v8649_v1 = vld [vmem:[#allocation142_spill] sm:$0xff] }
 0x235   : > { %4469 = vmatpush1.bf16.msra.mxu0 %v8598_v9  ;;  %v8650_v9 = vld [vmem:[#allocation143_spill] sm:$0xff] }
 0x236   : > { %4533 = vmatpush1.bf16.msra.mxu1 %v8599_v2  ;;  %4535 = vmatprep.subr.bf16.mxu0 %v8600_v14  ;;  %v8651_v2 = vld [vmem:[#allocation144_spill] sm:$0xff] }
 0x237   : > { %4599 = vmatprep.subr.bf16.mxu1 %v8601_v44  ;;  %v3281_v14 = vld [vmem:[%s8211_s5 + $0x180] sm:$0xff]  ;;  %v3282_v44 = vld [vmem:[%s8211_s5 + $0x188] sm:$0xff] }
 0x238   : > { %1798 = vmatmul.mubr.f32.vlgmr.msra.gmra.mrb[10].mxu0 %v6015_v43 }
 0x239   : > { %1869 = vmatmul.mubr.f32.vlgmr.msra.gmra.mrb[10].mxu1 %v6015_v43  ;;  %4537 = vmatpush1.bf16.msra.mxu0 %v6616_v41  ;;  %v8609_v41 = vld [vmem:[#allocation102_spill] sm:$0xff] }
 0x23a   : > { %3261 = vmatprep.mubr.msk.f32.mxu0 %vm371_vm0, %v762_v56  ;;  %4601 = vmatpush1.bf16.msra.mxu1 %v6621_v0  ;;  %v8611_v0 = vld [vmem:[#allocation104_spill] sm:$0xff] }
 0x23b   : > { %3263 = vmatprep.mubr.msk.f32.mxu1 %vm371_vm0, %v762_v56  ;;  %4539 = vmatprep.subr.bf16.mxu0 %v8602_v31  ;;  %v2075_v56 = vld [vmem:[%s8211_s5 + $0x80] sm:$0xff]  ;;  %v3266_v31 = vld [vmem:[%s8211_s5 + $0x108] sm:$0xff] }
 0x23c   : > { %4603 = vmatprep.subr.bf16.mxu1 %v8603_v20  ;;  %v3284_v20 = vld [vmem:[%s8211_s5 + $0x198] sm:$0xff] }
 0x23d   : > { %4541 = vmatpush1.bf16.msra.mxu0 %v8604_v24  ;;  %v2077_v24 = vld [vmem:[%s8211_s5 + $0x90] sm:$0xff] }
 0x23e   : > { %4605 = vmatpush1.bf16.msra.mxu1 %v8605_v32  ;;  %4543 = vmatprep.subr.bf16.mxu0 %v8606_v19  ;;  %v761_v19 = vrot.slane %v6015_v43, 1  ;;  %v2062_v43 = vld [vmem:[%s8211_s5 + $0x18] sm:$0xff] }
 0x23f   : > { %4607 = vmatprep.subr.bf16.mxu1 %v8607_v30 }
 0x241   : > { %4545 = vmatpush1.bf16.msra.mxu0 %v8608_v40  ;;  %v2061_v40 = vld [vmem:[%s8211_s5 + $0x10] sm:$0xff] }
 0x242   : > { %4609 = vmatpush1.bf16.msra.mxu1 %v8609_v41  ;;  %4547 = vmatprep.subr.bf16.mxu0 %v8610_v15  ;;  %v3267_v15 = vld [vmem:[%s8211_s5 + $0x110] sm:$0xff] }
 0x243   : > { %4611 = vmatprep.subr.bf16.mxu1 %v8611_v0 }
 0x245   : > { %4549 = vmatpush1.bf16.msra.mxu0 %v8612_v54  ;;  %v3286_v54 = vld [vmem:[%s8211_s5 + $0x1a8] sm:$0xff] }
 0x246   : > { %4613 = vmatpush1.bf16.msra.mxu1 %v8613_v53  ;;  %4551 = vmatprep.subr.bf16.mxu0 %v8614_v58  ;;  %v2079_v53 = vld [vmem:[%s8211_s5 + $0xa0] sm:$0xff]  ;;  %v2080_v58 = vld [vmem:[%s8211_s5 + $0xa8] sm:$0xff] }
 0x247   : > { %4615 = vmatprep.subr.bf16.mxu1 %v8615_v59 }
 0x249   : > { %4553 = vmatpush1.bf16.msra.mxu0 %v8616_v6  ;;  %v4700_v6 = vpack.c.bf16 %v2062_v43, %v2061_v40 }
 0x24a   : > { %4617 = vmatpush1.bf16.msra.mxu1 %v8617_v8  ;;  %4555 = vmatprep.subr.bf16.mxu0 %v8618_v11  ;;  %v2063_v8 = vld [vmem:[%s8211_s5 + $0x20] sm:$0xff] }
 0x24b   : > { %4619 = vmatprep.subr.bf16.mxu1 %v8619_v12  ;;  %v3269_v12 = vld [vmem:[%s8211_s5 + $0x120] sm:$0xff] }
 0x24d   : > { %4557 = vmatpush1.bf16.msra.mxu0 %v8620_v21  ;;  %v3270_v21 = vld [vmem:[%s8211_s5 + $0x128] sm:$0xff] }
 0x24e   : > { %4621 = vmatpush1.bf16.msra.mxu1 %v8621_v22  ;;  %4559 = vmatprep.subr.bf16.mxu0 %v8622_v25  ;;  %v4702_v22 = vpack.c.bf16 %v2080_v58, %v2079_v53  ;;  %v2064_v25 = vld [vmem:[%s8211_s5 + $0x28] sm:$0xff]  ;;  %v3275_v58 = vld [vmem:[%s8211_s5 + $0x150] sm:$0xff] }
 0x24f   : > { %4623 = vmatprep.subr.bf16.mxu1 %v8623_v26  ;;  %v3287_v26 = vld [vmem:[%s8211_s5 + $0x1b0] sm:$0xff] }
 0x251   : > { %4561 = vmatpush1.bf16.msra.mxu0 %v8624_v33  ;;  %v3288_v33 = vld [vmem:[%s8211_s5 + $0x1b8] sm:$0xff] }
 0x252   : > { %4625 = vmatpush1.bf16.msra.mxu1 %v8625_v34  ;;  %4563 = vmatprep.subr.bf16.mxu0 %v8626_v37  ;;  %v2081_v34 = vld [vmem:[%s8211_s5 + $0xb0] sm:$0xff]  ;;  %v2082_v37 = vld [vmem:[%s8211_s5 + $0xb8] sm:$0xff] }
 0x253   : > { %4627 = vmatprep.subr.bf16.mxu1 %v8627_v38  ;;  %v4672_v38 = vpack.c.bf16 %v3270_v21, %v3269_v12  ;;  %v2071_v21 = vld [vmem:[%s8211_s5 + $0x60] sm:$0xff] }
 0x255   : > { %4565 = vmatpush1.bf16.msra.mxu0 %v8628_v45  ;;  %v4704_v45 = vpack.c.bf16 %v2064_v25, %v2063_v8  ;;  %v2087_v8 = vld [vmem:[%s8211_s5 + $0xe0] sm:$0xff] }
 0x256   : > { %4629 = vmatpush1.bf16.msra.mxu1 %v8629_v46  ;;  %4567 = vmatprep.subr.bf16.mxu0 %v8630_v49  ;;  %v2065_v46 = vld [vmem:[%s8211_s5 + $0x30] sm:$0xff]  ;;  %v4674_v49 = vpack.c.bf16 %v3288_v33, %v3287_v26  ;;  %v3293_v26 = vld [vmem:[%s8211_s5 + $0x1e0] sm:$0xff]  ;;  %v3294_v33 = vld [vmem:[%s8211_s5 + $0x1e8] sm:$0xff] }
 0x257   : > { %4631 = vmatprep.subr.bf16.mxu1 %v8631_v50  ;;  %v3271_v50 = vld [vmem:[%s8211_s5 + $0x130] sm:$0xff] }
 0x259   : > { %4569 = vmatpush1.bf16.msra.mxu0 %v8632_v57  ;;  %v3272_v57 = vld [vmem:[%s8211_s5 + $0x138] sm:$0xff] }
 0x25a   : > { %4633 = vmatpush1.bf16.msra.mxu1 %v8633_v60  ;;  %4571 = vmatprep.subr.bf16.mxu0 %v8634_v62  ;;  %v4706_v60 = vpack.c.bf16 %v2082_v37, %v2081_v34  ;;  %v2066_v62 = vld [vmem:[%s8211_s5 + $0x38] sm:$0xff]  ;;  %v4686_v34 = vpack.c.bf16 %v3294_v33, %v3293_v26  ;;  %v3277_v37 = vld [vmem:[%s8211_s5 + $0x160] sm:$0xff]  ;;  %v3334_v33 = vld [vmem:[%s8211_s5 + $0x328] sm:$0xff] }
 0x25b   : > { %4635 = vmatprep.subr.bf16.mxu1 %v8635_v63  ;;  %v3289_v63 = vld [vmem:[%s8211_s5 + $0x1c0] sm:$0xff] }
 0x25c   : > { %v3333_v26 = vld [vmem:[%s8211_s5 + $0x320] sm:$0xff] }
 0x25d   : > { %4573 = vmatpush1.bf16.msra.mxu0 %v8636_v3  ;;  %v3290_v3 = vld [vmem:[%s8211_s5 + $0x1c8] sm:$0xff] }
 0x25e   : > { %4637 = vmatpush1.bf16.msra.mxu1 %v8637_v4  ;;  %4575 = vmatprep.subr.bf16.mxu0 %v8638_v13  ;;  %v2083_v4 = vld [vmem:[%s8211_s5 + $0xc0] sm:$0xff]  ;;  %v2084_v13 = vld [vmem:[%s8211_s5 + $0xc8] sm:$0xff] }
 0x25f   : > { %4639 = vmatprep.subr.bf16.mxu1 %v8639_v17  ;;  %v4676_v17 = vpack.c.bf16 %v3272_v57, %v3271_v50  ;;  %v2073_v57 = vld [vmem:[%s8211_s5 + $0x70] sm:$0xff] }
 0x261   : > { %4577 = vmatpush1.bf16.msra.mxu0 %v8640_v18  ;;  %v4708_v18 = vpack.c.bf16 %v2066_v62, %v2065_v46  ;;  %v2089_v46 = vld [vmem:[%s8211_s5 + $0xf0] sm:$0xff] }
 0x262   : > { %4641 = vmatpush1.bf16.msra.mxu1 %v8641_v23  ;;  %4579 = vmatprep.subr.bf16.mxu0 %v8642_v29  ;;  %v4678_v23 = vpack.c.bf16 %v3290_v3, %v3289_v63  ;;  %v3273_v29 = vld [vmem:[%s8211_s5 + $0x140] sm:$0xff]  ;;  %v3295_v63 = vld [vmem:[%s8211_s5 + $0x1f0] sm:$0xff]  ;;  %v3296_v3 = vld [vmem:[%s8211_s5 + $0x1f8] sm:$0xff] }
 0x263   : > { %4643 = vmatprep.subr.bf16.mxu1 %v8643_v35  ;;  %v3274_v35 = vld [vmem:[%s8211_s5 + $0x148] sm:$0xff] }
 0x265   : > { %4581 = vmatpush1.bf16.msra.mxu0 %v8644_v36  ;;  %v4710_v36 = vpack.c.bf16 %v2084_v13, %v2083_v4  ;;  %v4690_v4 = vpack.c.bf16 %v3296_v3, %v3295_v63  ;;  %v3279_v13 = vld [vmem:[%s8211_s5 + $0x170] sm:$0xff]  ;;  %v3336_v3 = vld [vmem:[%s8211_s5 + $0x338] sm:$0xff] }
 0x266   : > { %4645 = vmatpush1.bf16.msra.mxu1 %v8645_v42  ;;  %4583 = vmatprep.subr.bf16.mxu0 %v8646_v48  ;;  %v2067_v42 = vld [vmem:[%s8211_s5 + $0x40] sm:$0xff]  ;;  %v2068_v48 = vld [vmem:[%s8211_s5 + $0x48] sm:$0xff]  ;;  %v3335_v63 = vld [vmem:[%s8211_s5 + $0x330] sm:$0xff] }
 0x267   : > { %4647 = vmatprep.subr.bf16.mxu1 %v8647_v51  ;;  %v2085_v51 = vld [vmem:[%s8211_s5 + $0xd0] sm:$0xff] }
 0x269   : > { %4585 = vmatpush1.bf16.msra.mxu0 %v8648_v55  ;;  %v2086_v55 = vld [vmem:[%s8211_s5 + $0xd8] sm:$0xff] }
 0x26a   : > { %4649 = vmatpush1.bf16.msra.mxu1 %v8649_v1  ;;  %4587 = vmatprep.subr.bf16.mxu0 %v8650_v9  ;;  %v2021_v1 = vld [vmem:[%s8210_s4] sm:$0xf] }
 0x26b   : > { %4651 = vmatprep.subr.bf16.mxu1 %v8651_v2  ;;  %v8652_v9 = vld [vmem:[#allocation33_spill] sm:$0xff] }
 0x26c   : > { %v2033_v2 = vsub.s32 2, %v8652_v9 }
 0x26d   : > { %4589 = vmatpush1.bf16.msra.mxu0 %v7094_v61  ;;  %v4662_v61 = vpack.c.bf16 %v3282_v44, %v3281_v14  ;;  %v4680_v14 = vpack.c.bf16 %v3274_v35, %v3273_v29  ;;  %v2037_v44 = vsub.s32 3, %v8652_v9  ;;  %v3346_v29 = vld [vmem:[%s8211_s5 + $0x388] sm:$0xff] }
 0x26e   : > { %4653 = vmatpush1.bf16.msra.mxu1 %v7098_v27  ;;  %4591 = vmatprep.subr.bf16.mxu0 %v7100_v10  ;;  %v2076_v27 = vld [vmem:[%s8211_s5 + $0x88] sm:$0xff]  ;;  %v2059_v10 = vld [vmem:[%s8211_s5] sm:$0xff] }
 0x26f   : > { %4655 = vmatprep.subr.bf16.mxu1 %v7112_v52  ;;  %v3265_v52 = vld [vmem:[%s8211_s5 + $0x100] sm:$0xff] }
 0x270   : > { %v4664_v32 = vpack.c.bf16 %v3266_v31, %v3265_v52  ;;  %v8653_v52 = vsub.s32 0, %v8652_v9 }
 0x271   : > { %4593 = vmatpush1.bf16.msra.mxu0 %v7130_v16  ;;  %v4694_v16 = vpack.c.bf16 %v2076_v27, %v2075_v56  ;;  %v4712_v56 = vpack.c.bf16 %v2068_v48, %v2067_v42  ;;  %v4714_v27 = vpack.c.bf16 %v2086_v55, %v2085_v51  ;;  %v3314_v42 = vld [vmem:[%s8211_s5 + $0x288] sm:$0xff] }
 0x272   : > { %4657 = vmatpush1.bf16.msra.mxu1 %v7134_v28  ;;  %4595 = vmatprep.subr.bf16.mxu0 %v7136_v47  ;;  %v2060_v47 = vld [vmem:[%s8211_s5 + $0x8] sm:$0xff]  ;;  %v3283_v28 = vld [vmem:[%s8211_s5 + $0x190] sm:$0xff]  ;;  %v7516_v31 = vrot.slane %v2021_v1, %v8653_v52  ;;  %v3329_v52 = vld [vmem:[%s8211_s5 + $0x300] sm:$0xff] }
 0x273   : > { %4659 = vmatprep.subr.bf16.mxu1 %v7145_v39  ;;  %v2078_v39 = vld [vmem:[%s8211_s5 + $0x98] sm:$0xff]  ;;  %v4696_v30 = vpack.c.bf16 %v2060_v47, %v2059_v10  ;;  %v4666_v41 = vpack.c.bf16 %v3284_v20, %v3283_v28  ;;  %v2069_v10 = vld [vmem:[%s8211_s5 + $0x50] sm:$0xff]  ;;  %v8654_v47 = vsub.s32 1, %v8652_v9  ;;  %v7524_v20 = vrot.slane %v2021_v1, %v2037_v44 }
 0x274   : > { %v4698_v0 = vpack.c.bf16 %v2078_v39, %v2077_v24 }
 0x275   : > { %4597 = vmatpush1.bf16.msra.mxu0 %v7154_v5  ;;  %v3268_v5 = vld [vmem:[%s8211_s5 + $0x118] sm:$0xff]  ;;  %v7522_v28 = vrot.slane %v2021_v1, %v8654_v47 }
 0x276   : > { %4661 = vmatpush1.bf16.msra.mxu1 %v7158_v7  ;;  %4663 = vmatprep.subr.bf16.mxu0 %v4662_v61  ;;  %v3285_v7 = vld [vmem:[%s8211_s5 + $0x1a0] sm:$0xff]  ;;  %v4668_v59 = vpack.c.bf16 %v3268_v5, %v3267_v15  ;;  %v2070_v61 = vld [vmem:[%s8211_s5 + $0x58] sm:$0xff] }
 0x277   : > { %4695 = vmatprep.subr.bf16.mxu1 %v4694_v16  ;;  %v4670_v11 = vpack.c.bf16 %v3286_v54, %v3285_v7  ;;  %v7518_v16 = vrot.slane %v2021_v1, %v2033_v2  ;;  %v4716_v24 = vpack.c.bf16 %v2070_v61, %v2069_v10  ;;  %v3291_v7 = vld [vmem:[%s8211_s5 + $0x1d0] sm:$0xff]  ;;  %v3292_v54 = vld [vmem:[%s8211_s5 + $0x1d8] sm:$0xff] }
 0x278   : > { %3262 = vmatmul.mubr.msk.f32.vlgmr.msra.gmra.mrb[10].mxu0 %vm371_vm0, %v761_v19  ;;  %v4682_v53 = vpack.c.bf16 %v3292_v54, %v3291_v7  ;;  %v3349_v7 = vld [vmem:[%s8211_s5 + $0x3a0] sm:$0xff]  ;;  %v3350_v54 = vld [vmem:[%s8211_s5 + $0x3a8] sm:$0xff] }
 0x279   : > { %3264 = vmatmul.mubr.msk.f32.vlgmr.msra.gmra.mrb[10].mxu1 %vm371_vm0, %v761_v19  ;;  %4665 = vmatpush3.bf16.msra.mxu0 %v4664_v32 }
 0x27a   : > { %4697 = vmatpush3.bf16.msra.mxu1 %v4696_v30  ;;  %4667 = vmatprep.subr.bf16.mxu0 %v4666_v41 }
 0x27b   : > { %4699 = vmatprep.subr.bf16.mxu1 %v4698_v0 }
 0x27d   : > { %4669 = vmatpush3.bf16.msra.mxu0 %v4668_v59  ;;  %v3276_v59 = vld [vmem:[%s8211_s5 + $0x158] sm:$0xff] }
 0x27e   : > { %4701 = vmatpush3.bf16.msra.mxu1 %v4700_v6  ;;  %4671 = vmatprep.subr.bf16.mxu0 %v4670_v11  ;;  %v4684_v6 = vpack.c.bf16 %v3276_v59, %v3275_v58  ;;  %v2088_v11 = vld [vmem:[%s8211_s5 + $0xe8] sm:$0xff] }
 0x27f   : > { %4703 = vmatprep.subr.bf16.mxu1 %v4702_v22  ;;  %v4718_v12 = vpack.c.bf16 %v2088_v11, %v2087_v8  ;;  %v2072_v22 = vld [vmem:[%s8211_s5 + $0x68] sm:$0xff]  ;;  %v3300_v8 = vld [vmem:[%s8211_s5 + $0x218] sm:$0xff] }
 0x280   : > { %v4720_v25 = vpack.c.bf16 %v2072_v22, %v2071_v21  ;;  %v3317_v21 = vld [vmem:[%s8211_s5 + $0x2a0] sm:$0xff]  ;;  %v3318_v22 = vld [vmem:[%s8211_s5 + $0x2a8] sm:$0xff] }
 0x281   : > { %4673 = vmatpush3.bf16.msra.mxu0 %v4672_v38  ;;  %v3278_v38 = vld [vmem:[%s8211_s5 + $0x168] sm:$0xff] }
 0x282   : > { %4705 = vmatpush3.bf16.msra.mxu1 %v4704_v45  ;;  %4675 = vmatprep.subr.bf16.mxu0 %v4674_v49  ;;  %v4688_v45 = vpack.c.bf16 %v3278_v38, %v3277_v37  ;;  %v2090_v49 = vld [vmem:[%s8211_s5 + $0xf8] sm:$0xff]  ;;  %v3351_v37 = vld [vmem:[%s8211_s5 + $0x3b0] sm:$0xff] }
 0x283   : > { %4707 = vmatprep.subr.bf16.mxu1 %v4706_v60  ;;  %v4722_v50 = vpack.c.bf16 %v2090_v49, %v2089_v46  ;;  %v2074_v60 = vld [vmem:[%s8211_s5 + $0x78] sm:$0xff]  ;;  %v3301_v46 = vld [vmem:[%s8211_s5 + $0x220] sm:$0xff]  ;;  %v3302_v49 = vld [vmem:[%s8211_s5 + $0x228] sm:$0xff] }
 0x284   : > { %v4724_v62 = vpack.c.bf16 %v2074_v60, %v2073_v57  ;;  %v3352_v38 = vld [vmem:[%s8211_s5 + $0x3b8] sm:$0xff]  ;;  %v3319_v57 = vld [vmem:[%s8211_s5 + $0x2b0] sm:$0xff] }
 0x285   : > { %4677 = vmatpush3.bf16.msra.mxu0 %v4676_v17  ;;  %v3280_v17 = vld [vmem:[%s8211_s5 + $0x178] sm:$0xff] }
 0x286   : > { %4709 = vmatpush3.bf16.msra.mxu1 %v4708_v18  ;;  %4679 = vmatprep.subr.bf16.mxu0 %v4678_v23  ;;  %v4692_v18 = vpack.c.bf16 %v3280_v17, %v3279_v13  ;;  %v3345_v23 = vld [vmem:[%s8211_s5 + $0x380] sm:$0xff]  ;;  %v3320_v60 = vld [vmem:[%s8211_s5 + $0x2b8] sm:$0xff]  ;;  %v3354_v17 = vld [vmem:[%s8211_s5 + $0x3c8] sm:$0xff] }
 0x287   : > { %4711 = vmatprep.subr.bf16.mxu1 %v4710_v36  ;;  %v4758_v35 = vpack.c.bf16 %v3346_v29, %v3345_v23  ;;  %v3313_v36 = vld [vmem:[%s8211_s5 + $0x280] sm:$0xff]  ;;  %v3303_v23 = vld [vmem:[%s8211_s5 + $0x230] sm:$0xff]  ;;  %v3304_v29 = vld [vmem:[%s8211_s5 + $0x238] sm:$0xff] }
 0x288   : > { %v4726_v48 = vpack.c.bf16 %v3314_v42, %v3313_v36  ;;  %v3353_v13 = vld [vmem:[%s8211_s5 + $0x3c0] sm:$0xff]  ;;  %v3322_v42 = vld [vmem:[%s8211_s5 + $0x2c8] sm:$0xff] }
 0x289   : > { %4681 = vmatpush3.bf16.msra.mxu0 %v4680_v14  ;;  %v3321_v36 = vld [vmem:[%s8211_s5 + $0x2c0] sm:$0xff] }
 0x28a   : > { %4713 = vmatpush3.bf16.msra.mxu1 %v4712_v56  ;;  %4683 = vmatprep.subr.bf16.mxu0 %v4682_v53 }
 0x28b   : > { %v1511_v39 = vpop.f32.mrb[8].mxu0  ;;  %4715 = vmatprep.subr.bf16.mxu1 %v4714_v27 }
 0x28c   : > { %v7527_v32 = vadd.f32 %v7516_v31, %v1511_v39  ;;  %v1582_v19 = vpop.f32.mrb[8].mxu1  ;;  %v1513_v30 = vpop.f32.mrb[9].mxu0 }
 0x28d   : > { %v7530_v40 = vadd.f32 %v7518_v16, %v1582_v19  ;;  %v7533_v41 = vadd.f32 %v7522_v28, %v1513_v30  ;;  %v1584_v15 = vpop.f32.mrb[9].mxu1  ;;  %4685 = vmatpush3.bf16.msra.mxu0 %v4684_v6  ;;  %v3348_v19 = vld [vmem:[%s8211_s5 + $0x398] sm:$0xff]  ;;  %v3315_v30 = vld [vmem:[%s8211_s5 + $0x290] sm:$0xff] }
 0x28e   : > { %v7536_v5 = vadd.f32 %v7524_v20, %v1584_v15  ;;  %4717 = vmatpush3.bf16.msra.mxu1 %v4716_v24  ;;  %4687 = vmatprep.subr.bf16.mxu0 %v4686_v34  ;;  %v3332_v15 = vld [vmem:[%s8211_s5 + $0x318] sm:$0xff]  ;;  %v3299_v6 = vld [vmem:[%s8211_s5 + $0x210] sm:$0xff] }
 0x28f   : > { %v2051_v0 = vmax.f32 %v7527_v32, %v7530_v40  ;;  %4719 = vmatprep.subr.bf16.mxu1 %v4718_v12  ;;  %v3316_v40 = vld [vmem:[%s8211_s5 + $0x298] sm:$0xff]  ;;  %v4732_v34 = vpack.c.bf16 %v3300_v8, %v3299_v6  ;;  %v3310_v6 = vld [vmem:[%s8211_s5 + $0x268] sm:$0xff] }
 0x290   : > { %v2052_v43 = vmax.f32 %v7533_v41, %v7536_v5  ;;  %v3331_v41 = vld [vmem:[%s8211_s5 + $0x310] sm:$0xff]  ;;  %v4730_v59 = vpack.c.bf16 %v3316_v40, %v3315_v30  ;;  %v3308_v30 = vld [vmem:[%s8211_s5 + $0x258] sm:$0xff] }
 0x291   : > { %4689 = vmatpush3.bf16.msra.mxu0 %v4688_v45  ;;  %v4764_v12 = vpack.c.bf16 %v3332_v15, %v3331_v41  ;;  %v4734_v45 = vpack.c.bf16 %v3318_v22, %v3317_v21  ;;  %v3325_v41 = vld [vmem:[%s8211_s5 + $0x2e0] sm:$0xff]  ;;  %v3326_v15 = vld [vmem:[%s8211_s5 + $0x2e8] sm:$0xff]  ;;  %v3343_v22 = vld [vmem:[%s8211_s5 + $0x370] sm:$0xff] }
 0x292   : > { %4721 = vmatpush3.bf16.msra.mxu1 %v4720_v25  ;;  %4691 = vmatprep.subr.bf16.mxu0 %v4690_v4  ;;  %v4766_v25 = vpack.c.bf16 %v3350_v54, %v3349_v7  ;;  %v4736_v4 = vpack.c.bf16 %v3302_v49, %v3301_v46  ;;  %v3359_v54 = vld [vmem:[%s8211_s5 + $0x3f0] sm:$0xff]  ;;  %v3377_v49 = vld [vmem:[%s8211_s5 + $0x480] sm:$0xff] }
 0x293   : > { %4723 = vmatprep.subr.bf16.mxu1 %v4722_v50  ;;  %v4768_v50 = vpack.c.bf16 %v3334_v33, %v3333_v26  ;;  %v3409_v33 = vld [vmem:[%s8211_s5 + $0x580] sm:$0xff] }
 0x295   : > { %4693 = vmatpush3.bf16.msra.mxu0 %v4692_v18  ;;  %v4738_v18 = vpack.c.bf16 %v3320_v60, %v3319_v57  ;;  %v3393_v60 = vld [vmem:[%s8211_s5 + $0x500] sm:$0xff] }
 0x296   : > { %4725 = vmatpush3.bf16.msra.mxu1 %v4724_v62  ;;  %4727 = vmatprep.subr.bf16.mxu0 %v4726_v48  ;;  %v4770_v62 = vpack.c.bf16 %v3352_v38, %v3351_v37  ;;  %v4774_v48 = vpack.c.bf16 %v3354_v17, %v3353_v13  ;;  %v3311_v38 = vld [vmem:[%s8211_s5 + $0x270] sm:$0xff]  ;;  %v3361_v17 = vld [vmem:[%s8211_s5 + $0x400] sm:$0xff] }
 0x297   : > { %4759 = vmatprep.subr.bf16.mxu1 %v4758_v35  ;;  %v4772_v35 = vpack.c.bf16 %v3336_v3, %v3335_v63  ;;  %v3411_v3 = vld [vmem:[%s8211_s5 + $0x590] sm:$0xff] }
 0x34b   : > { %v1941_v51 = vpop.f32.mrb[10].mxu0 }
 0x34c   : > { %v2047_v55 = vadd.f32 %v7516_v31, %v1941_v51  ;;  %v2012_v1 = vpop.f32.mrb[10].mxu1  ;;  %v1943_v9 = vpop.f32.mrb[11].mxu0  ;;  %v3330_v31 = vld [vmem:[%s8211_s5 + $0x308] sm:$0xff]  ;;  %v3337_v51 = vld [vmem:[%s8211_s5 + $0x340] sm:$0xff] }
 0x34d   : > { %v2049_v2 = vadd.f32 %v7518_v16, %v2012_v1  ;;  %v2048_v14 = vadd.f32 %v7522_v28, %v1943_v9  ;;  %v2014_v44 = vpop.f32.mrb[11].mxu1  ;;  %v3297_v16 = vld [vmem:[%s8211_s5 + $0x200] sm:$0xff]  ;;  %v3298_v28 = vld [vmem:[%s8211_s5 + $0x208] sm:$0xff]  ;;  %v4760_v32 = vpack.c.bf16 %v3330_v31, %v3329_v52  ;;  %v4740_v1 = vpack.c.bf16 %v3304_v29, %v3303_v23  ;;  %v3355_v9 = vld [vmem:[%s8211_s5 + $0x3d0] sm:$0xff] }
 0x34e   : > { %v2050_v56 = vadd.f32 %v7524_v20, %v2014_v44  ;;  %v3347_v20 = vld [vmem:[%s8211_s5 + $0x390] sm:$0xff]  ;;  %v3305_v44 = vld [vmem:[%s8211_s5 + $0x240] sm:$0xff] }
 0x34f   : > { %v2053_v27 = vmax.f32 %v2047_v55, %v2049_v2  ;;  %v4762_v58 = vpack.c.bf16 %v3348_v19, %v3347_v20  ;;  %v3338_v55 = vld [vmem:[%s8211_s5 + $0x348] sm:$0xff]  ;;  %v3356_v2 = vld [vmem:[%s8211_s5 + $0x3d8] sm:$0xff]  ;;  %v3339_v31 = vld [vmem:[%s8211_s5 + $0x350] sm:$0xff] }
 0x350   : > { %v2054_v10 = vmax.f32 %v2048_v14, %v2050_v56  ;;  %v4742_v14 = vpack.c.bf16 %v3322_v42, %v3321_v36  ;;  %v3306_v56 = vld [vmem:[%s8211_s5 + $0x248] sm:$0xff]  ;;  %v4778_v52 = vpack.c.bf16 %v3356_v2, %v3355_v9  ;;  %v3307_v19 = vld [vmem:[%s8211_s5 + $0x250] sm:$0xff]  ;;  %v3413_v9 = vld [vmem:[%s8211_s5 + $0x5a0] sm:$0xff] }
 0x351   : > { %v2055_v61 = vmax.f32 %v2051_v0, %v2053_v27  ;;  %v4776_v27 = vpack.c.bf16 %v3338_v55, %v3337_v51  ;;  %v3358_v20 = vld [vmem:[%s8211_s5 + $0x3e8] sm:$0xff]  ;;  %v4748_v7 = vpack.c.bf16 %v3308_v30, %v3307_v19  ;;  %v3379_v29 = vld [vmem:[%s8211_s5 + $0x490] sm:$0xff]  ;;  %v3396_v51 = vld [vmem:[%s8211_s5 + $0x518] sm:$0xff] }
 0x352   : > { %v2056_v47 = vmax.f32 %v2052_v43, %v2054_v10  ;;  %v4728_v43 = vpack.c.bf16 %v3298_v28, %v3297_v16  ;;  %v3323_v10 = vld [vmem:[%s8211_s5 + $0x2d0] sm:$0xff]  ;;  %v4744_v16 = vpack.c.bf16 %v3306_v56, %v3305_v44  ;;  %v3357_v28 = vld [vmem:[%s8211_s5 + $0x3e0] sm:$0xff]  ;;  %v3414_v2 = vld [vmem:[%s8211_s5 + $0x5a8] sm:$0xff] }
 0x353   : > { %v7624_v24 = vmax.f32 %v2055_v61, 0.0  ;;  %v3324_v61 = vld [vmem:[%s8211_s5 + $0x2d8] sm:$0xff]  ;;  %v3363_v56 = vld [vmem:[%s8211_s5 + $0x410] sm:$0xff] }
 0x354   : > { %v7635_v39 = vmax.f32 %v2056_v47, 0.0  ;;  %v3340_v47 = vld [vmem:[%s8211_s5 + $0x358] sm:$0xff] }
 0x355   : > { %v2126_v53 = vrot.slane %v7624_v24, 1  ;;  %v4780_v40 = vpack.c.bf16 %v3340_v47, %v3339_v31  ;;  %v2411_v36 = vrot.slane %v7624_v24, 3  ;;  %v3382_v31 = vld [vmem:[%s8211_s5 + $0x4a8] sm:$0xff]  ;;  %v4830_v47 = vpack.c.bf16 %v3414_v2, %v3413_v9  ;;  %v3416_v19 = vld [vmem:[%s8211_s5 + $0x5b8] sm:$0xff]  ;;  %v3423_v9 = vld [vmem:[%s8211_s5 + $0x5f0] sm:$0xff] }
 0x356   : > { %2264 = vmatprep.mubr.f32.mxu1 %v7635_v39  ;;  %v2127_v5 = vrot.slane %v7635_v39, 1  ;;  %v2412_v0 = vrot.slane %v7635_v39, 3  ;;  %v2304_v11 = vrot.slane %v7635_v39, 2  ;;  %v2628_v55 = vrot.slane %v7635_v39, 5  ;;  %v3424_v2 = vld [vmem:[%s8211_s5 + $0x5f8] sm:$0xff] }
 0x357   : > { %2265 = vmatmul.mubr.f32.vlgmr.msra.gmra.mrb[12].mxu1 %v7624_v24 }
 0x358   : > { %4761 = vmatpush3.bf16.msra.mxu1 %v4760_v32  ;;  %2194 = vmatprep.mubr.f32.mxu0 %v2127_v5  ;;  %v4746_v32 = vpack.c.bf16 %v3324_v61, %v3323_v10  ;;  %v4782_v5 = vpack.c.bf16 %v3358_v20, %v3357_v28  ;;  %v2520_v10 = vrot.slane %v7635_v39, 4  ;;  %v3398_v28 = vld [vmem:[%s8211_s5 + $0x528] sm:$0xff] }
 0x359   : > { %2479 = vmatprep.mubr.f32.mxu1 %v2412_v0  ;;  %2195 = vmatmul.mubr.f32.vlgmr.msra.gmra.mrb[12].mxu0 %v2126_v53  ;;  %v3341_v0 = vld [vmem:[%s8211_s5 + $0x360] sm:$0xff]  ;;  %v3360_v53 = vld [vmem:[%s8211_s5 + $0x3f8] sm:$0xff] }
 0x35a   : > { %4729 = vmatpush3.bf16.msra.mxu0 %v4728_v43  ;;  %2371 = vmatprep.mubr.f32.mxu0 %v2304_v11  ;;  %v3342_v43 = vld [vmem:[%s8211_s5 + $0x368] sm:$0xff]  ;;  %v3327_v11 = vld [vmem:[%s8211_s5 + $0x2f0] sm:$0xff]  ;;  %v4786_v21 = vpack.c.bf16 %v3360_v53, %v3359_v54  ;;  %v3400_v54 = vld [vmem:[%s8211_s5 + $0x538] sm:$0xff] }
 0x35b   : > { %4763 = vmatprep.subr.bf16.mxu1 %v4762_v58  ;;  %4731 = vmatprep.subr.bf16.mxu0 %v4730_v59  ;;  %v4750_v58 = vpack.c.bf16 %v3326_v15, %v3325_v41  ;;  %v3309_v59 = vld [vmem:[%s8211_s5 + $0x260] sm:$0xff]  ;;  %v4784_v8 = vpack.c.bf16 %v3342_v43, %v3341_v0  ;;  %v3366_v41 = vld [vmem:[%s8211_s5 + $0x428] sm:$0xff]  ;;  %v3384_v0 = vld [vmem:[%s8211_s5 + $0x4b8] sm:$0xff] }
 0x35c   : > { %4765 = vmatpush3.bf16.msra.mxu1 %v4764_v12  ;;  %v3328_v12 = vld [vmem:[%s8211_s5 + $0x2f8] sm:$0xff]  ;;  %v4752_v26 = vpack.c.bf16 %v3310_v6, %v3309_v59  ;;  %v3418_v59 = vld [vmem:[%s8211_s5 + $0x5c8] sm:$0xff] }
 0x35d   : > { %4767 = vmatprep.subr.bf16.mxu1 %v4766_v25  ;;  %v3344_v25 = vld [vmem:[%s8211_s5 + $0x378] sm:$0xff]  ;;  %v4754_v37 = vpack.c.bf16 %v3328_v12, %v3327_v11 }
 0x35e   : > { %4733 = vmatpush3.bf16.msra.mxu0 %v4732_v34  ;;  %v3410_v34 = vld [vmem:[%s8211_s5 + $0x588] sm:$0xff]  ;;  %v4788_v46 = vpack.c.bf16 %v3344_v25, %v3343_v22  ;;  %v3368_v11 = vld [vmem:[%s8211_s5 + $0x438] sm:$0xff] }
 0x35f   : > { %4735 = vmatprep.subr.bf16.mxu0 %v4734_v45  ;;  %v3312_v45 = vld [vmem:[%s8211_s5 + $0x278] sm:$0xff]  ;;  %v4822_v57 = vpack.c.bf16 %v3410_v34, %v3409_v33  ;;  %v3386_v22 = vld [vmem:[%s8211_s5 + $0x4c8] sm:$0xff] }
 0x360   : > { %4769 = vmatpush3.bf16.msra.mxu1 %v4768_v50  ;;  %v3378_v50 = vld [vmem:[%s8211_s5 + $0x488] sm:$0xff]  ;;  %v4756_v63 = vpack.c.bf16 %v3312_v45, %v3311_v38  ;;  %v3420_v38 = vld [vmem:[%s8211_s5 + $0x5d8] sm:$0xff] }
 0x361   : > { %4771 = vmatprep.subr.bf16.mxu1 %v4770_v62  ;;  %v3394_v62 = vld [vmem:[%s8211_s5 + $0x508] sm:$0xff]  ;;  %v4790_v13 = vpack.c.bf16 %v3378_v50, %v3377_v49 }
 0x362   : > { %4737 = vmatpush3.bf16.msra.mxu0 %v4736_v4  ;;  %v3412_v4 = vld [vmem:[%s8211_s5 + $0x598] sm:$0xff]  ;;  %v4824_v23 = vpack.c.bf16 %v3394_v62, %v3393_v60  ;;  %v3402_v33 = vld [vmem:[%s8211_s5 + $0x548] sm:$0xff] }
 0x363   : > { %4739 = vmatprep.subr.bf16.mxu0 %v4738_v18  ;;  %v3362_v18 = vld [vmem:[%s8211_s5 + $0x408] sm:$0xff]  ;;  %v4826_v42 = vpack.c.bf16 %v3412_v4, %v3411_v3  ;;  %v3388_v60 = vld [vmem:[%s8211_s5 + $0x4d8] sm:$0xff] }
 0x364   : > { %4773 = vmatpush3.bf16.msra.mxu1 %v4772_v35  ;;  %v3380_v35 = vld [vmem:[%s8211_s5 + $0x498] sm:$0xff]  ;;  %v3370_v49 = vld [vmem:[%s8211_s5 + $0x448] sm:$0xff] }
 0x365   : > { %4775 = vmatprep.subr.bf16.mxu1 %v4774_v48  ;;  %v3395_v48 = vld [vmem:[%s8211_s5 + $0x510] sm:$0xff]  ;;  %v4794_v44 = vpack.c.bf16 %v3380_v35, %v3379_v29  ;;  %v3404_v3 = vld [vmem:[%s8211_s5 + $0x558] sm:$0xff] }
 0x366   : > { %4741 = vmatpush3.bf16.msra.mxu0 %v4740_v1  ;;  %v4792_v1 = vpack.c.bf16 %v3362_v18, %v3361_v17  ;;  %v4828_v61 = vpack.c.bf16 %v3396_v51, %v3395_v48  ;;  %v3422_v17 = vld [vmem:[%s8211_s5 + $0x5e8] sm:$0xff]  ;;  %v3372_v29 = vld [vmem:[%s8211_s5 + $0x458] sm:$0xff]  ;;  %v3405_v51 = vld [vmem:[%s8211_s5 + $0x560] sm:$0xff] }
 0x367   : > { %4743 = vmatprep.subr.bf16.mxu0 %v4742_v14  ;;  %v2303_v14 = vrot.slane %v7624_v24, 2 }
 0x368   : > { %4777 = vmatpush3.bf16.msra.mxu1 %v4776_v27  ;;  %v3364_v27 = vld [vmem:[%s8211_s5 + $0x418] sm:$0xff] }
 0x369   : > { %4779 = vmatprep.subr.bf16.mxu1 %v4778_v52  ;;  %v3381_v52 = vld [vmem:[%s8211_s5 + $0x4a0] sm:$0xff]  ;;  %v4796_v20 = vpack.c.bf16 %v3364_v27, %v3363_v56  ;;  %v3374_v56 = vld [vmem:[%s8211_s5 + $0x468] sm:$0xff] }
 0x36a   : > { %4745 = vmatpush3.bf16.msra.mxu0 %v4744_v16  ;;  %v3397_v16 = vld [vmem:[%s8211_s5 + $0x520] sm:$0xff]  ;;  %v4798_v30 = vpack.c.bf16 %v3382_v31, %v3381_v52  ;;  %v4850_v52 = vpack.c.bf16 %v3424_v2, %v3423_v9  ;;  %v3407_v31 = vld [vmem:[%s8211_s5 + $0x570] sm:$0xff] }
 0x36b   : > { %4747 = vmatprep.subr.bf16.mxu0 %v4746_v32  ;;  %v3415_v32 = vld [vmem:[%s8211_s5 + $0x5b0] sm:$0xff]  ;;  %v4832_v15 = vpack.c.bf16 %v3398_v28, %v3397_v16 }
 0x36c   : > { %4781 = vmatpush3.bf16.msra.mxu1 %v4780_v40  ;;  %v3365_v40 = vld [vmem:[%s8211_s5 + $0x420] sm:$0xff]  ;;  %v4834_v43 = vpack.c.bf16 %v3416_v19, %v3415_v32  ;;  %v3376_v32 = vld [vmem:[%s8211_s5 + $0x478] sm:$0xff] }
 0x36d   : > { %4783 = vmatprep.subr.bf16.mxu1 %v4782_v5  ;;  %v3383_v5 = vld [vmem:[%s8211_s5 + $0x4b0] sm:$0xff]  ;;  %v4800_v53 = vpack.c.bf16 %v3366_v41, %v3365_v40  ;;  %v3442_v40 = vld [vmem:[%s8211_s5 + $0x688] sm:$0xff] }
 0x36e   : > { %4749 = vmatpush3.bf16.msra.mxu0 %v4748_v7  ;;  %v3399_v7 = vld [vmem:[%s8211_s5 + $0x530] sm:$0xff]  ;;  %v4802_v6 = vpack.c.bf16 %v3384_v0, %v3383_v5  ;;  %v3425_v5 = vld [vmem:[%s8211_s5 + $0x600] sm:$0xff]  ;;  %v3426_v0 = vld [vmem:[%s8211_s5 + $0x608] sm:$0xff] }
 0x36f   : > { %4751 = vmatprep.subr.bf16.mxu0 %v4750_v58  ;;  %v3417_v58 = vld [vmem:[%s8211_s5 + $0x5c0] sm:$0xff]  ;;  %v4836_v12 = vpack.c.bf16 %v3400_v54, %v3399_v7  ;;  %v3444_v7 = vld [vmem:[%s8211_s5 + $0x698] sm:$0xff]  ;;  %v2627_v54 = vrot.slane %v7624_v24, 5 }
 0x370   : > { %4785 = vmatpush3.bf16.msra.mxu1 %v4784_v8  ;;  %v3367_v8 = vld [vmem:[%s8211_s5 + $0x430] sm:$0xff]  ;;  %v4838_v25 = vpack.c.bf16 %v3418_v59, %v3417_v58  ;;  %v2519_v58 = vrot.slane %v7624_v24, 4 }
 0x371   : > { %4787 = vmatprep.subr.bf16.mxu1 %v4786_v21  ;;  %v3385_v21 = vld [vmem:[%s8211_s5 + $0x4c0] sm:$0xff]  ;;  %v4804_v34 = vpack.c.bf16 %v3368_v11, %v3367_v8  ;;  %v3428_v8 = vld [vmem:[%s8211_s5 + $0x618] sm:$0xff]  ;;  %v2736_v11 = vrot.slane %v7635_v39, 6  ;;  %v3430_v39 = vld [vmem:[%s8211_s5 + $0x628] sm:$0xff] }
 0x372   : > { %4753 = vmatpush3.bf16.msra.mxu0 %v4752_v26  ;;  %v3401_v26 = vld [vmem:[%s8211_s5 + $0x540] sm:$0xff]  ;;  %v4806_v45 = vpack.c.bf16 %v3386_v22, %v3385_v21  ;;  %v3446_v21 = vld [vmem:[%s8211_s5 + $0x6a8] sm:$0xff] }
 0x373   : > { %4755 = vmatprep.subr.bf16.mxu0 %v4754_v37  ;;  %v3419_v37 = vld [vmem:[%s8211_s5 + $0x5d0] sm:$0xff]  ;;  %v4840_v50 = vpack.c.bf16 %v3402_v33, %v3401_v26  ;;  %v3429_v26 = vld [vmem:[%s8211_s5 + $0x620] sm:$0xff] }
 0x374   : > { %4789 = vmatpush3.bf16.msra.mxu1 %v4788_v46  ;;  %v3369_v46 = vld [vmem:[%s8211_s5 + $0x440] sm:$0xff]  ;;  %v4842_v62 = vpack.c.bf16 %v3420_v38, %v3419_v37  ;;  %v3447_v33 = vld [vmem:[%s8211_s5 + $0x6b0] sm:$0xff]  ;;  %v4864_v37 = vpack.c.bf16 %v3430_v39, %v3429_v26 }
 0x375   : > { %4823 = vmatprep.subr.bf16.mxu1 %v4822_v57  ;;  %v3387_v57 = vld [vmem:[%s8211_s5 + $0x4d0] sm:$0xff]  ;;  %v4808_v4 = vpack.c.bf16 %v3370_v49, %v3369_v46  ;;  %v3432_v46 = vld [vmem:[%s8211_s5 + $0x638] sm:$0xff]  ;;  %v3449_v49 = vld [vmem:[%s8211_s5 + $0x6c0] sm:$0xff] }
 0x376   : > { %4757 = vmatpush3.bf16.msra.mxu0 %v4756_v63  ;;  %v3403_v63 = vld [vmem:[%s8211_s5 + $0x550] sm:$0xff]  ;;  %v4810_v18 = vpack.c.bf16 %v3388_v60, %v3387_v57 }
 0x377   : > { %2480 = vmatmul.mubr.f32.vlgmr.msra.gmra.mrb[14].mxu1 %v2411_v36  ;;  %4791 = vmatprep.subr.bf16.mxu0 %v4790_v13  ;;  %v3421_v13 = vld [vmem:[%s8211_s5 + $0x5e0] sm:$0xff]  ;;  %v4844_v35 = vpack.c.bf16 %v3404_v3, %v3403_v63  ;;  %v3434_v63 = vld [vmem:[%s8211_s5 + $0x648] sm:$0xff]  ;;  %v3451_v3 = vld [vmem:[%s8211_s5 + $0x6d0] sm:$0xff] }
 0x378   : > { %4825 = vmatpush3.bf16.msra.mxu1 %v4824_v23  ;;  %2695 = vmatprep.mubr.f32.mxu1 %v2628_v55  ;;  %v3371_v23 = vld [vmem:[%s8211_s5 + $0x450] sm:$0xff]  ;;  %v3389_v36 = vld [vmem:[%s8211_s5 + $0x4e0] sm:$0xff]  ;;  %v4846_v48 = vpack.c.bf16 %v3422_v17, %v3421_v13  ;;  %v3406_v55 = vld [vmem:[%s8211_s5 + $0x568] sm:$0xff] }
 0x379   : > { %2372 = vmatmul.mubr.f32.vlgmr.msra.gmra.mrb[14].mxu0 %v2303_v14  ;;  %4827 = vmatprep.subr.bf16.mxu1 %v4826_v42  ;;  %v3390_v42 = vld [vmem:[%s8211_s5 + $0x4e8] sm:$0xff]  ;;  %v4848_v27 = vpack.c.bf16 %v3406_v55, %v3405_v51  ;;  %v3455_v55 = vld [vmem:[%s8211_s5 + $0x6f0] sm:$0xff] }
 0x37a   : > { %4793 = vmatpush3.bf16.msra.mxu0 %v4792_v1  ;;  %2587 = vmatprep.mubr.f32.mxu0 %v2520_v10  ;;  %v4812_v1 = vpack.c.bf16 %v3372_v29, %v3371_v23  ;;  %v4814_v14 = vpack.c.bf16 %v3390_v42, %v3389_v36  ;;  %v3391_v10 = vld [vmem:[%s8211_s5 + $0x4f0] sm:$0xff]  ;;  %v3436_v23 = vld [vmem:[%s8211_s5 + $0x658] sm:$0xff]  ;;  %v3453_v29 = vld [vmem:[%s8211_s5 + $0x6e0] sm:$0xff] }
 0x37b   : > { %4795 = vmatprep.subr.bf16.mxu0 %v4794_v44  ;;  %v3373_v44 = vld [vmem:[%s8211_s5 + $0x460] sm:$0xff]  ;;  %v3438_v51 = vld [vmem:[%s8211_s5 + $0x668] sm:$0xff] }
 0x37c   : > { %4829 = vmatpush3.bf16.msra.mxu1 %v4828_v61  ;;  %v3392_v61 = vld [vmem:[%s8211_s5 + $0x4f8] sm:$0xff]  ;;  %v4816_v16 = vpack.c.bf16 %v3374_v56, %v3373_v44 }
 0x37d   : > { %4831 = vmatprep.subr.bf16.mxu1 %v4830_v47  ;;  %v3408_v47 = vld [vmem:[%s8211_s5 + $0x578] sm:$0xff]  ;;  %v4818_v28 = vpack.c.bf16 %v3392_v61, %v3391_v10  ;;  %v2813_v10 = vld [vmem:[%s8213_s7] sm:$0xff]  ;;  %v2814_v61 = vld [vmem:[%s8213_s7 + $0x8] sm:$0xff] }
 0x37e   : > { %4797 = vmatpush3.bf16.msra.mxu0 %v4796_v20  ;;  %v3375_v20 = vld [vmem:[%s8211_s5 + $0x470] sm:$0xff]  ;;  %v4852_v19 = vpack.c.bf16 %v3408_v47, %v3407_v31  ;;  %v3440_v44 = vld [vmem:[%s8211_s5 + $0x678] sm:$0xff]  ;;  %v5035_v31 = vmov 0.0|0.0   ;;  %v4887_v47 = vpack.c.bf16 %v2814_v61, %v2813_v10 }
 0x37f   : > { %4799 = vmatprep.subr.bf16.mxu0 %v4798_v30  ;;  %v3441_v30 = vld [vmem:[%s8211_s5 + $0x680] sm:$0xff]  ;;  %v4820_v41 = vpack.c.bf16 %v3376_v32, %v3375_v20  ;;  %v2818_v20 = vld [vmem:[%s8213_s7 + $0x28] sm:$0xff] }
 0x380   : > { %4833 = vmatpush3.bf16.msra.mxu1 %v4832_v15  ;;  %v4854_v15 = vpack.c.bf16 %v3442_v40, %v3441_v30  ;;  %v2820_v30 = vld [vmem:[%s8213_s7 + $0x38] sm:$0xff] }
 0x381   : > { %4835 = vmatprep.subr.bf16.mxu1 %v4834_v43  ;;  %v3443_v43 = vld [vmem:[%s8211_s5 + $0x690] sm:$0xff] }
 0x382   : > { %4801 = vmatpush3.bf16.msra.mxu0 %v4800_v53  ;;  %v4856_v53 = vpack.c.bf16 %v3426_v0, %v3425_v5  ;;  %v4858_v59 = vpack.c.bf16 %v3444_v7, %v3443_v43  ;;  %v2823_v0 = vld [vmem:[%s8213_s7 + $0x50] sm:$0xff]  ;;  %v2824_v43 = vld [vmem:[%s8213_s7 + $0x58] sm:$0xff] }
 0x383   : > { %4803 = vmatprep.subr.bf16.mxu0 %v4802_v6  ;;  %v3427_v6 = vld [vmem:[%s8211_s5 + $0x610] sm:$0xff]  ;;  %v4902_v7 = vpack.c.bf16 %v2824_v43, %v2823_v0 }
 0x384   : > { %4837 = vmatpush3.bf16.msra.mxu1 %v4836_v12  ;;  %v3445_v12 = vld [vmem:[%s8211_s5 + $0x6a0] sm:$0xff]  ;;  %v4860_v22 = vpack.c.bf16 %v3428_v8, %v3427_v6  ;;  %v2828_v6 = vld [vmem:[%s8213_s7 + $0x78] sm:$0xff] }
 0x385   : > { %4839 = vmatprep.subr.bf16.mxu1 %v4838_v25  ;;  %v4862_v25 = vpack.c.bf16 %v3446_v21, %v3445_v12 }
 0x386   : > { %4805 = vmatpush3.bf16.msra.mxu0 %v4804_v34  ;;  %v3448_v34 = vld [vmem:[%s8211_s5 + $0x6b8] sm:$0xff] }
 0x387   : > { %4807 = vmatprep.subr.bf16.mxu0 %v4806_v45  ;;  %v4866_v38 = vpack.c.bf16 %v3448_v34, %v3447_v33  ;;  %v3431_v45 = vld [vmem:[%s8211_s5 + $0x630] sm:$0xff] }
 0x388   : > { %4841 = vmatpush3.bf16.msra.mxu1 %v4840_v50  ;;  %v3450_v50 = vld [vmem:[%s8211_s5 + $0x6c8] sm:$0xff]  ;;  %v4868_v57 = vpack.c.bf16 %v3432_v46, %v3431_v45 }
 0x389   : > { %4843 = vmatprep.subr.bf16.mxu1 %v4842_v62  ;;  %v4870_v60 = vpack.c.bf16 %v3450_v50, %v3449_v49  ;;  %v3433_v62 = vld [vmem:[%s8211_s5 + $0x640] sm:$0xff] }
 0x38a   : > { %4809 = vmatpush3.bf16.msra.mxu0 %v4808_v4  ;;  %v3452_v4 = vld [vmem:[%s8211_s5 + $0x6d8] sm:$0xff]  ;;  %v4872_v13 = vpack.c.bf16 %v3434_v63, %v3433_v62 }
 0x38b   : > { %4811 = vmatprep.subr.bf16.mxu0 %v4810_v18  ;;  %v4874_v17 = vpack.c.bf16 %v3452_v4, %v3451_v3  ;;  %v3435_v18 = vld [vmem:[%s8211_s5 + $0x650] sm:$0xff] }
 0x38c   : > { %4845 = vmatpush3.bf16.msra.mxu1 %v4844_v35  ;;  %v3454_v35 = vld [vmem:[%s8211_s5 + $0x6e8] sm:$0xff]  ;;  %v4876_v36 = vpack.c.bf16 %v3436_v23, %v3435_v18 }
 0x38d   : > { %4847 = vmatprep.subr.bf16.mxu1 %v4846_v48  ;;  %v4878_v42 = vpack.c.bf16 %v3454_v35, %v3453_v29  ;;  %v3437_v48 = vld [vmem:[%s8211_s5 + $0x660] sm:$0xff] }
 0x38e   : > { %4813 = vmatpush3.bf16.msra.mxu0 %v4812_v1  ;;  %v3456_v1 = vld [vmem:[%s8211_s5 + $0x6f8] sm:$0xff]  ;;  %v4880_v9 = vpack.c.bf16 %v3438_v51, %v3437_v48 }
 0x38f   : > { %4815 = vmatprep.subr.bf16.mxu0 %v4814_v14  ;;  %v4882_v2 = vpack.c.bf16 %v3456_v1, %v3455_v55  ;;  %v3439_v14 = vld [vmem:[%s8211_s5 + $0x670] sm:$0xff]  ;;  %v2829_v55 = vld [vmem:[%s8214_s8] sm:$0x1] }
 0x390   : > { %4849 = vmatpush3.bf16.msra.mxu1 %v4848_v27  ;;  %v4884_v56 = vpack.c.bf16 %v3440_v44, %v3439_v14  ;;  %v2735_v27 = vrot.slane %v7624_v24, 6  ;;  %v2816_v24 = vld [vmem:[%s8213_s7 + $0x18] sm:$0xff] }
 0x391   : > { %4851 = vmatprep.subr.bf16.mxu1 %v4850_v52  ;;  %v2815_v52 = vld [vmem:[%s8213_s7 + $0x10] sm:$0xff] }
 0x392   : > { %4817 = vmatpush3.bf16.msra.mxu0 %v4816_v16  ;;  %v4890_v16 = vpack.c.bf16 %v2816_v24, %v2815_v52 }
 0x393   : > { %4819 = vmatprep.subr.bf16.mxu0 %v4818_v28  ;;  %v2817_v28 = vld [vmem:[%s8213_s7 + $0x20] sm:$0xff] }
 0x394   : > { %4853 = vmatpush3.bf16.msra.mxu1 %v4852_v19  ;;  %v4893_v32 = vpack.c.bf16 %v2818_v20, %v2817_v28  ;;  %v2819_v19 = vld [vmem:[%s8213_s7 + $0x30] sm:$0xff] }
 0x395   : > { %4886 = vmatprep.subr.bf16.mxu1 %v5035_v31  ;;  %v4896_v40 = vpack.c.bf16 %v2820_v30, %v2819_v19 }
 0x396   : > { %4821 = vmatpush3.bf16.msra.mxu0 %v4820_v41  ;;  %v2821_v41 = vld [vmem:[%s8213_s7 + $0x40] sm:$0xff] }
 0x397   : > { %2696 = vmatmul.mubr.f32.vlgmr.msra.gmra.mrb[16].mxu1 %v2627_v54  ;;  %4855 = vmatprep.subr.bf16.mxu0 %v4854_v15  ;;  %v2822_v15 = vld [vmem:[%s8213_s7 + $0x48] sm:$0xff]  ;;  %v2825_v54 = vld [vmem:[%s8213_s7 + $0x60] sm:$0xff] }
 0x398   : > { %4888 = vmatpush3.bf16.msra.mxu1 %v4887_v47  ;;  %v4899_v5 = vpack.c.bf16 %v2822_v15, %v2821_v41 }
 0x399   : > { %2588 = vmatmul.mubr.f32.vlgmr.msra.gmra.mrb[16].mxu0 %v2519_v58  ;;  %4889 = vmatprep.subr.bf16.mxu1 %v5035_v31 }
 0x39a   : > { %4857 = vmatpush3.bf16.msra.mxu0 %v4856_v53  ;;  %2803 = vmatprep.mubr.f32.mxu0 %v2736_v11  ;;  %v2826_v53 = vld [vmem:[%s8213_s7 + $0x68] sm:$0xff]  ;;  %v8655_v11 = vmov 0.0  }
 0x39b   : > { %4859 = vmatprep.subr.bf16.mxu0 %v4858_v59  ;;  %v4905_v58 = vpack.c.bf16 %v2826_v53, %v2825_v54  ;;  %v2827_v59 = vld [vmem:[%s8213_s7 + $0x70] sm:$0xff]  ;;  %3755 = vmatprep.mubr.msk.f32.mxu1 %vm5036_vm7, %v8655_v11 }
 0x39c   : > { %4891 = vmatpush3.bf16.msra.mxu1 %v4890_v16  ;;  %v4908_v8 = vpack.c.bf16 %v2828_v6, %v2827_v59 }
 0x39d   : > { %4892 = vmatprep.subr.bf16.mxu1 %v5035_v31 }
 0x39e   : > { %4861 = vmatpush3.bf16.msra.mxu0 %v4860_v22 }
 0x39f   : > { %4863 = vmatprep.subr.bf16.mxu0 %v4862_v25 }
 0x3a0   : > { %4894 = vmatpush3.bf16.msra.mxu1 %v4893_v32 }
 0x3a1   : > { %4895 = vmatprep.subr.bf16.mxu1 %v5035_v31 }
 0x3a2   : > { %4865 = vmatpush3.bf16.msra.mxu0 %v4864_v37 }
 0x3a3   : > { %4867 = vmatprep.subr.bf16.mxu0 %v4866_v38 }
 0x3a4   : > { %4897 = vmatpush3.bf16.msra.mxu1 %v4896_v40 }
 0x3a5   : > { %4898 = vmatprep.subr.bf16.mxu1 %v5035_v31 }
 0x3a6   : > { %4869 = vmatpush3.bf16.msra.mxu0 %v4868_v57 }
 0x3a7   : > { %4871 = vmatprep.subr.bf16.mxu0 %v4870_v60 }
 0x3a8   : > { %4900 = vmatpush3.bf16.msra.mxu1 %v4899_v5 }
 0x3a9   : > { %4901 = vmatprep.subr.bf16.mxu1 %v5035_v31 }
 0x3aa   : > { %4873 = vmatpush3.bf16.msra.mxu0 %v4872_v13 }
 0x3ab   : > { %4875 = vmatprep.subr.bf16.mxu0 %v4874_v17 }
 0x3ac   : > { %4903 = vmatpush3.bf16.msra.mxu1 %v4902_v7 }
 0x3ad   : > { %4904 = vmatprep.subr.bf16.mxu1 %v5035_v31 }
 0x3ae   : > { %4877 = vmatpush3.bf16.msra.mxu0 %v4876_v36  ;;  %v2810_v36 = vld [vmem:[%s8212_s6] sm:$0x1] }
 0x3af   : > { %4879 = vmatprep.subr.bf16.mxu0 %v4878_v42 }
 0x3b0   : > { %4906 = vmatpush3.bf16.msra.mxu1 %v4905_v58 }
 0x3b1   : > { %4907 = vmatprep.subr.bf16.mxu1 %v5035_v31 }
 0x3b2   : > { %4881 = vmatpush3.bf16.msra.mxu0 %v4880_v9 }
 0x3b3   : > { %4883 = vmatprep.subr.bf16.mxu0 %v4882_v2 }
 0x3b4   : > { %4909 = vmatpush3.bf16.msra.mxu1 %v4908_v8 }
 0x3b6   : > { %4885 = vmatpush3.bf16.msra.mxu0 %v4884_v56 }
 0x3b9   : > { %2804 = vmatmul.mubr.f32.vlgmr.msra.gmra.mrb[18].mxu0 %v2735_v27 }
 0x42a   : > { %v3528_v12 = vpop.f32.mrb[12].mxu1 }
 0x42b   : > { %v3529_v21 = vpop.f32.mrb[13].mxu1 }
 0x42c   : > { %v3530_v22 = vadd.f32 %v3529_v21, %v3528_v12  ;;  %v3493_v25 = vpop.f32.mrb[12].mxu0 }
 0x42d   : > { %v3494_v26 = vpop.f32.mrb[13].mxu0 }
 0x42e   : > { %v3495_v39 = vadd.f32 %v3494_v26, %v3493_v25 }
 0x430   : > { %v2267_v33 = vadd.f32 %v3530_v22, %v3495_v39 }
 0x44a   : > { %v3598_v34 = vpop.f32.mrb[14].mxu1 }
 0x44b   : > { %v3599_v37 = vpop.f32.mrb[15].mxu1 }
 0x44c   : > { %v3600_v38 = vadd.f32 %v3599_v37, %v3598_v34  ;;  %v3563_v45 = vpop.f32.mrb[14].mxu0 }
 0x44d   : > { %v3564_v46 = vpop.f32.mrb[15].mxu0 }
 0x44e   : > { %v3565_v49 = vadd.f32 %v3564_v46, %v3563_v45 }
 0x450   : > { %v2377_v50 = vadd.f32 %v3565_v49, %v2267_v33 }
 0x452   : > { %v2485_v57 = vadd.f32 %v3600_v38, %v2377_v50 }
 0x46a   : > { %v3668_v60 = vpop.f32.mrb[16].mxu1 }
 0x46b   : > { %v3669_v62 = vpop.f32.mrb[17].mxu1 }
 0x46c   : > { %v3670_v63 = vadd.f32 %v3669_v62, %v3668_v60  ;;  %v3633_v3 = vpop.f32.mrb[16].mxu0 }
 0x46d   : > { %v3634_v4 = vpop.f32.mrb[17].mxu0 }
 0x46e   : > { %v3635_v13 = vadd.f32 %v3634_v4, %v3633_v3 }
 0x470   : > { %v2593_v17 = vadd.f32 %v3635_v13, %v2485_v57 }
 0x472   : > { %v2701_v18 = vadd.f32 %v3670_v63, %v2593_v17 }
 0x48c   : > { %v3703_v23 = vpop.f32.mrb[18].mxu0 }
 0x48d   : > { %v3704_v29 = vpop.f32.mrb[19].mxu0 }
 0x48e   : > { %v3705_v35 = vadd.f32 %v3704_v29, %v3703_v23 }
 0x490   : > { %v2809_v42 = vadd.f32 %v3705_v35, %v2701_v18 }
 0x492   : > { %v2811_v48 = vadd.f32 %v2810_v36, %v2809_v42 }
 0x494   : > { %v2812_v51 = vmax.f32 %v2811_v48, 0.0 }
 0x496   : > { %3756 = vmatmul.mubr.f32.vlgmr.msra.gmra.mrb[18].mxu1 %v2812_v51 }
 0x569   : > { %v2896_v1 = vpop.f32.mrb[18].mxu1 }
 0x56a   : > { %v2897_v9 = vadd.f32 %v2896_v1, %v2829_v55  ;;  %v3757_v2 = vpop.f32.mrb[19].mxu1 }
 0x56c   : > { %2900 = vst [vmem:[%s324_s0] sm:$0x1] %v2897_v9 }
 0x56d   : > { %4982 = shalt.err (!%p4979_p3)
}
 0x56e   : > { %s4983_s26 = scalar_lea.hbm %s8164_s22, 16  ;;  %s4987_s14 = scalar_lea.hbm %s8215_s9, 32 }
 0x56f   : > { %p4984_p4 = scmp.ne.s32.totalorder %s8164_s22, %s4983_s26  ;;  %p4988_p9 = scmp.lt.u32.totalorder %s8164_s22, %s8215_s9 }
 0x570   : > { %p4989_p10 = scmp.lt.u32.totalorder %s4987_s14, %s4983_s26  ;;  %p4991_p12 = scmp.lt.u32.totalorder %s4983_s26, %s8164_s22 }
 0x571   : > { %p4985_p7 = pnand %p4984_p4, %p5126_p5 }
 0x572   : > { %p4990_p11 = por %p4989_p10, %p4988_p9 }
 0x573   : > { %p4986_p8 = pneg %p4985_p7 }
 0x574   : > { %p4992_p13 = por %p4991_p12, %p4990_p11 }
 0x576   : > { %p4993_p0 = pnand %p4992_p13, %p4986_p8 }
 0x578   : > { %4996 = shalt.err (!%p4993_p0)
}
 0x579   : > { %4926 = dma.vmem_to_hbm [thread:$0]  (%p5126_p5), %s8166_s16, 16, %s8164_s22, %s2902_s23  }
 0x57a PF: > { %p4932_p1 = scmp.ge.s32.totalorder %s5031_s12, 2  ;;  %s2926_s21 = sand.u32 1, %s5019_s30  }
 0x57b   : > { %s2927_s24 = scalar_lea.sflag [#allocation3], %s2926_s21 }
 0x57c   : > { %p4929_p2 = pnand %p4932_p1, %p5130_p6 }
 0x57e   : > { %5014 = dma.done.wait (!%p4929_p2), %s2927_s24, 16  }
 0x57f   : > { %5016 = vsyncadd (!%p4929_p2), %s2927_s24, 4294967280  ;;  %p19_p3 = scmp.ge.s32.totalorder %s5113_s15, 4   ;;  %s8656_s30 = smov %s5023_s10 }
 0x580   : > { %s8657_s10 = smov %s5027_s11  ;;  %s8658_s11 = smov %s5124_s18 }
 0x581   : > { %s8659_s12 = smov %s5113_s15  ;;  %21 = sbr.rel (!%p19_p3) target bundleno = 5 (0x5), region = 102 }
 0x588   :  { %2931 = vsyncpa [#allocation3], 1 }
 0x589   :  { %2933 = vsyncpa [#allocation3 + $0x1], 1 }

</bundles_post_ra>
